<compile_context>
chip_gen: v7x
topology: tpu7x:2x2x1
jax: 0.10.0
libtpu: 0.0.40
codegen_flags: <defaults>
</compile_context>

<pallas_src>
import functools

import jax
import jax.numpy as jnp
from jax import lax
from jax.experimental import pallas as pl
from jax.experimental.pallas import tpu as pltpu


def _elu(x):
    # ELU(alpha=1): x if x > 0 else expm1(x).  Built from guaranteed-lowerable
    # ops: a Taylor branch where exp(x)-1 would cancel catastrophically
    # (|x| tiny), the EUP exp elsewhere.  Max relative deviation from torch's
    # expm1 is ~1e-4 at the branch point - far below the tolerances used here.
    em1 = jnp.where(x > -1e-3, x + 0.5 * x * x, jnp.exp(x) - 1.0)
    return jnp.where(x > 0, x, em1)


def _bn_train(h, gamma, beta, eps=1e-5):
    # BatchNorm1d training mode: batch mean, *biased* variance, eps=1e-5.
    # Two-pass variance (sum of squared deviations) rather than E[h^2]-mu^2:
    # at B=2 the one-pass form can catastrophically cancel in f32 when
    # |mu| >> sigma.  Costs one extra tiny reduction at these sizes.
    n = h.shape[0]
    mu = jnp.sum(h, axis=0, keepdims=True) * (1.0 / n)
    d = h - mu
    var = jnp.sum(d * d, axis=0, keepdims=True) * (1.0 / n)
    return d * lax.rsqrt(var + eps) * gamma + beta


def generator_d3_kernel(x_ref,
                        w1_ref, b1_ref, g1_ref, be1_ref,
                        w2_ref, b2_ref, g2_ref, be2_ref,
                        w3_ref, b3_ref,
                        o_ref):
    # All matmuls: bf16 inputs, f32 accumulation (single MXU path).  BN / ELU
    # math stays f32 (v5e has no bf16 VPU/EUP).
    x = x_ref[...].astype(jnp.bfloat16)

    h1 = jnp.dot(x, w1_ref[...], preferred_element_type=jnp.float32) + b1_ref[...]
    h1 = _elu(_bn_train(h1, g1_ref[...], be1_ref[...]))

    h2 = jnp.dot(h1.astype(jnp.bfloat16), w2_ref[...],
                 preferred_element_type=jnp.float32) + b2_ref[...]
    h2 = _elu(_bn_train(h2, g2_ref[...], be2_ref[...]))

    # Dominant layer.  Default single-step grid: one lane-dense (1024, n_pad)
    # bf16 tile.  If the caller picks tn < n_pad (v7x, 2 TCs) the layers above
    # are recomputed per step (a few MFLOP; their operands have constant
    # index_maps so they stay VMEM-resident) which keeps every grid step
    # independent and "parallel"-safe.
    out = jnp.dot(h2.astype(jnp.bfloat16), w3_ref[...],
                  preferred_element_type=jnp.float32) + b3_ref[...]
    o_ref[...] = out.astype(o_ref.dtype)


def generator_d3_forward(x, params, ddim, *, tn=None):
    """x: (B, z) float32. Returns (B, ddim*2, ddim, 5, 5) float32.

    tn: output-feature tile of the final layer.  Default (None) = single grid
    step - the right choice on the 1-TensorCore v5e/v6e, where multi-step
    pipelining is pure overhead at this compute/DMA ratio.  On v7x try
    tn = n_pad // 2 to shard the w3 stream across both TensorCores (benchmark,
    don't assume).

    NOTE: at B=2 the kernel is weight-HBM bound (weights re-streamed per call);
    batch as many rows as possible per call.
    TODO(synk): if B stays tiny in production, hide the weight stream with a
    cross-pallas_call prefetch (start the w2/w3 DMA in a prior call, return
    semaphore + VMEM ref, consume here).
    """
    B = x.shape[0]
    out_dim = ddim * (ddim * 2) * 5 * 5

    (w1, b1, g1, be1, w2, b2, g2, be2, w3, b3) = params
    n_pad = w3.shape[1]
    if tn is None:
        tn = n_pad                      # single grid step
    assert n_pad >= out_dim and n_pad % tn == 0 and tn % 128 == 0

    resident_ops = (x, w1, b1, g1, be1, w2, b2, g2, be2)

    def resident(a):
        # Full-array block, constant index map: DMA'd once, VMEM-resident for
        # the whole grid.
        # TODO(synk): pipeline_mode=pl.Buffered(1) here would drop the useless
        # second buffer copy (~1 MB for w2); only matters on v7x's smaller
        # VMEM, left at the default to keep the lowering conservative.
        return pl.BlockSpec(a.shape, lambda j: (0,) * a.ndim)

    grid = (n_pad // tn,)

    flops = 2 * B * (x.shape[1] * 512 + 512 * 1024 + 1024 * n_pad)
    transcendentals = B * (512 + 1024)   # one exp per ELU element
    bytes_accessed = (sum(int(a.size) * a.dtype.itemsize
                          for a in (*resident_ops, w3, b3))
                      + B * n_pad * 4)

    out2d = pl.pallas_call(
        generator_d3_kernel,
        out_shape=jax.ShapeDtypeStruct((B, n_pad), jnp.float32),
        grid=grid,
        in_specs=[resident(a) for a in resident_ops] + [
            pl.BlockSpec((1024, tn), lambda j: (0, j)),   # w3 N-tile(s)
            pl.BlockSpec((1, tn), lambda j: (0, j)),      # b3 N-tile(s)
        ],
        out_specs=pl.BlockSpec((B, tn), lambda j: (0, j)),
        compiler_params=pltpu.CompilerParams(
            dimension_semantics=("parallel",),   # only matters when tn < n_pad
            vmem_limit_bytes=16 * 1024 * 1024,
        ),
        cost_estimate=pl.CostEstimate(
            flops=flops,
            transcendentals=transcendentals,
            bytes_accessed=bytes_accessed,
        ),
    )(*resident_ops, w3, b3)

    # Drop the lane padding; view(-1, ddim*2, ddim, 5, 5) stays in JAX.
    return out2d[:, :out_dim].reshape(B, ddim * 2, ddim, 5, 5)


def init_params(key, z, ddim):
    """Full-f32 master parameters.  PyTorch Linear stores W as (out, in);
    pre-transposed here to (in, out).  Biases / BN params are 2D (1, N)."""
    out_dim = ddim * (ddim * 2) * 5 * 5
    ks = jax.random.split(key, 10)

    def lin(kw, kb, fan_in, fan_out):
        bound = 1.0 / jnp.sqrt(fan_in)
        w = jax.random.uniform(kw, (fan_in, fan_out), jnp.float32, -bound, bound)
        b = jax.random.uniform(kb, (1, fan_out), jnp.float32, -bound, bound)
        return w, b

    w1, b1 = lin(ks[0], ks[1], z, 512)
    w2, b2 = lin(ks[2], ks[3], 512, 1024)
    w3, b3 = lin(ks[4], ks[5], 1024, out_dim)

    # BatchNorm affine (PyTorch default gamma=1, beta=0; small deterministic
    # perturbation so the affine path is exercised).
    g1 = 1.0 + 0.1 * jax.random.normal(ks[6], (1, 512), jnp.float32)
    be1 = 0.1 * jax.random.normal(ks[7], (1, 512), jnp.float32)
    g2 = 1.0 + 0.1 * jax.random.normal(ks[8], (1, 1024), jnp.float32)
    be2 = 0.1 * jax.random.normal(ks[9], (1, 1024), jnp.float32)

    return (w1, b1, g1, be1, w2, b2, g2, be2, w3, b3)


def pack_params(params_f32, *, lane=128):
    """Kernel-format parameters: weights bf16 (MXU-native input, f32 accumulate
    in-kernel), w3/b3 padded on the output-feature axis to a multiple of 128
    lanes so the final matmul and output stores are lane-dense.  Biases & BN
    params stay f32.
    TODO(synk): int8 (v5e/v6e) or fp8-e4m3 (v7x) w2/w3 with per-column scales
    would halve the binding HBM stream again; needs a per-generation dtype
    switch, so it is left out of this portable version.
    """
    (w1, b1, g1, be1, w2, b2, g2, be2, w3, b3) = params_f32
    out_dim = w3.shape[1]
    n_pad = ((out_dim + lane - 1) // lane) * lane
    w3p = (jnp.zeros((w3.shape[0], n_pad), jnp.float32).at[:, :out_dim].set(w3)
           .astype(jnp.bfloat16))
    b3p = jnp.zeros((1, n_pad), jnp.float32).at[:, :out_dim].set(b3)
    return (w1.astype(jnp.bfloat16), b1, g1, be1,
            w2.astype(jnp.bfloat16), b2, g2, be2, w3p, b3p)


def reference_forward_matched(x, packed_params, ddim):
    """Pure-jnp reference mirroring the kernel's exact numerics
    (bf16 weights/inputs, f32 accumulate, two-pass train-mode BN)."""
    (w1, b1, g1, be1, w2, b2, g2, be2, w3, b3) = packed_params
    out_dim = ddim * (ddim * 2) * 5 * 5
    h = jnp.dot(x.astype(jnp.bfloat16), w1,
                preferred_element_type=jnp.float32) + b1
    h = _elu(_bn_train(h, g1, be1))
    h = jnp.dot(h.astype(jnp.bfloat16), w2,
                preferred_element_type=jnp.float32) + b2
    h = _elu(_bn_train(h, g2, be2))
    out = jnp.dot(h.astype(jnp.bfloat16), w3,
                  preferred_element_type=jnp.float32) + b3
    return out[:, :out_dim].reshape(x.shape[0], ddim * 2, ddim, 5, 5)


def reference_forward_f32(x, params_f32, ddim):
    """Full-f32 reference with the PyTorch GeneratorD3 forward semantics
    (train-mode BN, ELU).  The kernel deviates from this only by its bf16
    weight/input quantization."""
    (w1, b1, g1, be1, w2, b2, g2, be2, w3, b3) = params_f32
    hp = lax.Precision.HIGHEST
    h = _elu(_bn_train(jnp.dot(x, w1, precision=hp) + b1, g1, be1))
    h = _elu(_bn_train(jnp.dot(h, w2, precision=hp) + b2, g2, be2))
    out = jnp.dot(h, w3, precision=hp) + b3
    return out.reshape(x.shape[0], ddim * 2, ddim, 5, 5)


if __name__ == "__main__":
    B, Z, DDIM = 2, 32, 4  # small shapes consistent with the module

    key = jax.random.PRNGKey(0)
    kx, kp = jax.random.split(key)
    x = jax.random.normal(kx, (B, Z), jnp.float32)

    params_f32 = init_params(kp, Z, DDIM)
    params = pack_params(params_f32)

    fwd = jax.jit(functools.partial(generator_d3_forward, ddim=DDIM))
    y = fwd(x, params)
    jax.block_until_ready(y)
    assert y.shape == (B, DDIM * 2, DDIM, 5, 5), y.shape

    # Check 1 (tight): reference with the kernel's own bf16 / two-pass-BN
    # numerics -- catches wiring / BlockSpec / padding bugs.
    y_match = reference_forward_matched(x, params, DDIM)
    assert jnp.allclose(y, y_match, atol=2e-3, rtol=2e-3), (
        float(jnp.max(jnp.abs(y - y_match))))

    # Check 2 (documented tolerance): full-f32 PyTorch-semantics reference.
    # The only intended deviation is the bf16 weight/input quantization, but
    # train-mode BatchNorm at B=2 can amplify it on features where the two
    # rows nearly coincide (batch variance ~ 0, rsqrt(var+eps) sensitivity),
    # so this is a loose semantic sanity check, not bitwise parity.
    y_f32 = reference_forward_f32(x, params_f32, DDIM)
    rel = (jnp.linalg.norm((y - y_f32).ravel())
           / jnp.linalg.norm(y_f32.ravel()))
    max_abs = jnp.max(jnp.abs(y - y_f32))
    assert float(rel) < 0.2, float(rel)
    assert float(max_abs) < 0.35, float(max_abs)

    print("KERNEL_OK")
</pallas_src>

<mosaic_0001>
module attributes {stable_mosaic.version = 11 : i64} {
  func.func @generator_d3_kernel(%arg0: i32, %arg1: memref<2x32xf32, #tpu.memory_space<vmem>>, %arg2: memref<32x512xbf16, #tpu.memory_space<vmem>>, %arg3: memref<1x512xf32, #tpu.memory_space<vmem>>, %arg4: memref<1x512xf32, #tpu.memory_space<vmem>>, %arg5: memref<1x512xf32, #tpu.memory_space<vmem>>, %arg6: memref<512x1024xbf16, #tpu.memory_space<vmem>>, %arg7: memref<1x1024xf32, #tpu.memory_space<vmem>>, %arg8: memref<1x1024xf32, #tpu.memory_space<vmem>>, %arg9: memref<1x1024xf32, #tpu.memory_space<vmem>>, %arg10: memref<1024x896xbf16, #tpu.memory_space<vmem>>, %arg11: memref<1x896xf32, #tpu.memory_space<vmem>>, %arg12: memref<2x896xf32, #tpu.memory_space<vmem>>) attributes {dimension_semantics = [#tpu.dimension_semantics<parallel>], iteration_bounds = array<i64: 1>, scalar_prefetch = 0 : i64, scratch_operands = 0 : i64, tpu.core_type = #tpu.core_type<tc>, window_params = [{pipeline_mode = #tpu.pipeline_mode<synchronous>, transform_indices = @transform_0, window_bounds = array<i64: 2, 32>}, {pipeline_mode = #tpu.pipeline_mode<synchronous>, transform_indices = @transform_1, window_bounds = array<i64: 32, 512>}, {pipeline_mode = #tpu.pipeline_mode<synchronous>, transform_indices = @transform_2, window_bounds = array<i64: 1, 512>}, {pipeline_mode = #tpu.pipeline_mode<synchronous>, transform_indices = @transform_3, window_bounds = array<i64: 1, 512>}, {pipeline_mode = #tpu.pipeline_mode<synchronous>, transform_indices = @transform_4, window_bounds = array<i64: 1, 512>}, {pipeline_mode = #tpu.pipeline_mode<synchronous>, transform_indices = @transform_5, window_bounds = array<i64: 512, 1024>}, {pipeline_mode = #tpu.pipeline_mode<synchronous>, transform_indices = @transform_6, window_bounds = array<i64: 1, 1024>}, {pipeline_mode = #tpu.pipeline_mode<synchronous>, transform_indices = @transform_7, window_bounds = array<i64: 1, 1024>}, {pipeline_mode = #tpu.pipeline_mode<synchronous>, transform_indices = @transform_8, window_bounds = array<i64: 1, 1024>}, {transform_indices = @transform_9, window_bounds = array<i64: 1024, 896>}, {transform_indices = @transform_10, window_bounds = array<i64: 1, 896>}, {transform_indices = @transform_11, window_bounds = array<i64: 2, 896>}]} {
    %c0 = arith.constant 0 : index
    %c0_0 = arith.constant 0 : index
    %0 = vector.load %arg1[%c0, %c0_0] : memref<2x32xf32, #tpu.memory_space<vmem>>, vector<2x32xf32>
    %1 = arith.truncf %0 : vector<2x32xf32> to vector<2x32xbf16>
    %c0_1 = arith.constant 0 : index
    %c0_2 = arith.constant 0 : index
    %2 = vector.load %arg2[%c0_1, %c0_2] : memref<32x512xbf16, #tpu.memory_space<vmem>>, vector<32x512xbf16>
    %cst = arith.constant dense<0.000000e+00> : vector<2x512xf32>
    %3 = tpu.matmul %1, %2, %cst {dimension_numbers = #tpu.dot_dimension_numbers<[1], [0], [0], [1], [0, 0, 1, 1], [], []>} : vector<2x32xbf16>, vector<32x512xbf16>, vector<2x512xf32> -> vector<2x512xf32>
    %c0_3 = arith.constant 0 : index
    %c0_4 = arith.constant 0 : index
    %4 = vector.load %arg3[%c0_3, %c0_4] : memref<1x512xf32, #tpu.memory_space<vmem>>, vector<1x512xf32>
    %5 = vector.broadcast %4 : vector<1x512xf32> to vector<2x512xf32>
    %6 = arith.addf %3, %5 : vector<2x512xf32>
    %c0_5 = arith.constant 0 : index
    %c0_6 = arith.constant 0 : index
    %7 = vector.load %arg4[%c0_5, %c0_6] : memref<1x512xf32, #tpu.memory_space<vmem>>, vector<1x512xf32>
    %c0_7 = arith.constant 0 : index
    %c0_8 = arith.constant 0 : index
    %8 = vector.load %arg5[%c0_7, %c0_8] : memref<1x512xf32, #tpu.memory_space<vmem>>, vector<1x512xf32>
    %cst_9 = arith.constant dense<0.000000e+00> : vector<512xf32>
    %9 = vector.multi_reduction <add>, %6, %cst_9 [0] : vector<2x512xf32> to vector<512xf32>
    %10 = vector.shape_cast %9 : vector<512xf32> to vector<1x512xf32>
    %cst_10 = arith.constant 5.000000e-01 : f32
    %11 = vector.broadcast %cst_10 : f32 to vector<1x512xf32>
    %12 = arith.mulf %10, %11 : vector<1x512xf32>
    %13 = vector.broadcast %12 : vector<1x512xf32> to vector<2x512xf32>
    %14 = arith.subf %6, %13 : vector<2x512xf32>
    %15 = arith.mulf %14, %14 : vector<2x512xf32>
    %cst_11 = arith.constant dense<0.000000e+00> : vector<512xf32>
    %16 = vector.multi_reduction <add>, %15, %cst_11 [0] : vector<2x512xf32> to vector<512xf32>
    %17 = vector.shape_cast %16 : vector<512xf32> to vector<1x512xf32>
    %cst_12 = arith.constant 5.000000e-01 : f32
    %18 = vector.broadcast %cst_12 : f32 to vector<1x512xf32>
    %19 = arith.mulf %17, %18 : vector<1x512xf32>
    %cst_13 = arith.constant 9.99999974E-6 : f32
    %20 = vector.broadcast %cst_13 : f32 to vector<1x512xf32>
    %21 = arith.addf %19, %20 : vector<1x512xf32>
    %22 = math.rsqrt %21 : vector<1x512xf32>
    %23 = vector.broadcast %22 : vector<1x512xf32> to vector<2x512xf32>
    %24 = arith.mulf %14, %23 : vector<2x512xf32>
    %25 = vector.broadcast %7 : vector<1x512xf32> to vector<2x512xf32>
    %26 = arith.mulf %24, %25 : vector<2x512xf32>
    %27 = vector.broadcast %8 : vector<1x512xf32> to vector<2x512xf32>
    %28 = arith.addf %26, %27 : vector<2x512xf32>
    %cst_14 = arith.constant -1.000000e-03 : f32
    %29 = vector.broadcast %cst_14 : f32 to vector<2x512xf32>
    %30 = arith.cmpf ogt, %28, %29 : vector<2x512xf32>
    %cst_15 = arith.constant 5.000000e-01 : f32
    %31 = vector.broadcast %cst_15 : f32 to vector<2x512xf32>
    %32 = arith.mulf %31, %28 : vector<2x512xf32>
    %33 = arith.mulf %32, %28 : vector<2x512xf32>
    %34 = arith.addf %28, %33 : vector<2x512xf32>
    %35 = math.exp %28 : vector<2x512xf32>
    %cst_16 = arith.constant 1.000000e+00 : f32
    %36 = vector.broadcast %cst_16 : f32 to vector<2x512xf32>
    %37 = arith.subf %35, %36 : vector<2x512xf32>
    %38 = arith.select %30, %34, %37 : vector<2x512xi1>, vector<2x512xf32>
    %cst_17 = arith.constant 0.000000e+00 : f32
    %39 = vector.broadcast %cst_17 : f32 to vector<2x512xf32>
    %40 = arith.cmpf ogt, %28, %39 : vector<2x512xf32>
    %41 = arith.select %40, %28, %38 : vector<2x512xi1>, vector<2x512xf32>
    %42 = arith.truncf %41 : vector<2x512xf32> to vector<2x512xbf16>
    %c0_18 = arith.constant 0 : index
    %c0_19 = arith.constant 0 : index
    %43 = vector.load %arg6[%c0_18, %c0_19] : memref<512x1024xbf16, #tpu.memory_space<vmem>>, vector<512x1024xbf16>
    %cst_20 = arith.constant dense<0.000000e+00> : vector<2x1024xf32>
    %44 = tpu.matmul %42, %43, %cst_20 {dimension_numbers = #tpu.dot_dimension_numbers<[1], [0], [0], [1], [0, 0, 1, 1], [], []>} : vector<2x512xbf16>, vector<512x1024xbf16>, vector<2x1024xf32> -> vector<2x1024xf32>
    %c0_21 = arith.constant 0 : index
    %c0_22 = arith.constant 0 : index
    %45 = vector.load %arg7[%c0_21, %c0_22] : memref<1x1024xf32, #tpu.memory_space<vmem>>, vector<1x1024xf32>
    %46 = vector.broadcast %45 : vector<1x1024xf32> to vector<2x1024xf32>
    %47 = arith.addf %44, %46 : vector<2x1024xf32>
    %c0_23 = arith.constant 0 : index
    %c0_24 = arith.constant 0 : index
    %48 = vector.load %arg8[%c0_23, %c0_24] : memref<1x1024xf32, #tpu.memory_space<vmem>>, vector<1x1024xf32>
    %c0_25 = arith.constant 0 : index
    %c0_26 = arith.constant 0 : index
    %49 = vector.load %arg9[%c0_25, %c0_26] : memref<1x1024xf32, #tpu.memory_space<vmem>>, vector<1x1024xf32>
    %cst_27 = arith.constant dense<0.000000e+00> : vector<1024xf32>
    %50 = vector.multi_reduction <add>, %47, %cst_27 [0] : vector<2x1024xf32> to vector<1024xf32>
    %51 = vector.shape_cast %50 : vector<1024xf32> to vector<1x1024xf32>
    %cst_28 = arith.constant 5.000000e-01 : f32
    %52 = vector.broadcast %cst_28 : f32 to vector<1x1024xf32>
    %53 = arith.mulf %51, %52 : vector<1x1024xf32>
    %54 = vector.broadcast %53 : vector<1x1024xf32> to vector<2x1024xf32>
    %55 = arith.subf %47, %54 : vector<2x1024xf32>
    %56 = arith.mulf %55, %55 : vector<2x1024xf32>
    %cst_29 = arith.constant dense<0.000000e+00> : vector<1024xf32>
    %57 = vector.multi_reduction <add>, %56, %cst_29 [0] : vector<2x1024xf32> to vector<1024xf32>
    %58 = vector.shape_cast %57 : vector<1024xf32> to vector<1x1024xf32>
    %cst_30 = arith.constant 5.000000e-01 : f32
    %59 = vector.broadcast %cst_30 : f32 to vector<1x1024xf32>
    %60 = arith.mulf %58, %59 : vector<1x1024xf32>
    %cst_31 = arith.constant 9.99999974E-6 : f32
    %61 = vector.broadcast %cst_31 : f32 to vector<1x1024xf32>
    %62 = arith.addf %60, %61 : vector<1x1024xf32>
    %63 = math.rsqrt %62 : vector<1x1024xf32>
    %64 = vector.broadcast %63 : vector<1x1024xf32> to vector<2x1024xf32>
    %65 = arith.mulf %55, %64 : vector<2x1024xf32>
    %66 = vector.broadcast %48 : vector<1x1024xf32> to vector<2x1024xf32>
    %67 = arith.mulf %65, %66 : vector<2x1024xf32>
    %68 = vector.broadcast %49 : vector<1x1024xf32> to vector<2x1024xf32>
    %69 = arith.addf %67, %68 : vector<2x1024xf32>
    %cst_32 = arith.constant -1.000000e-03 : f32
    %70 = vector.broadcast %cst_32 : f32 to vector<2x1024xf32>
    %71 = arith.cmpf ogt, %69, %70 : vector<2x1024xf32>
    %cst_33 = arith.constant 5.000000e-01 : f32
    %72 = vector.broadcast %cst_33 : f32 to vector<2x1024xf32>
    %73 = arith.mulf %72, %69 : vector<2x1024xf32>
    %74 = arith.mulf %73, %69 : vector<2x1024xf32>
    %75 = arith.addf %69, %74 : vector<2x1024xf32>
    %76 = math.exp %69 : vector<2x1024xf32>
    %cst_34 = arith.constant 1.000000e+00 : f32
    %77 = vector.broadcast %cst_34 : f32 to vector<2x1024xf32>
    %78 = arith.subf %76, %77 : vector<2x1024xf32>
    %79 = arith.select %71, %75, %78 : vector<2x1024xi1>, vector<2x1024xf32>
    %cst_35 = arith.constant 0.000000e+00 : f32
    %80 = vector.broadcast %cst_35 : f32 to vector<2x1024xf32>
    %81 = arith.cmpf ogt, %69, %80 : vector<2x1024xf32>
    %82 = arith.select %81, %69, %79 : vector<2x1024xi1>, vector<2x1024xf32>
    %83 = arith.truncf %82 : vector<2x1024xf32> to vector<2x1024xbf16>
    %c0_36 = arith.constant 0 : index
    %c0_37 = arith.constant 0 : index
    %84 = vector.load %arg10[%c0_36, %c0_37] : memref<1024x896xbf16, #tpu.memory_space<vmem>>, vector<1024x896xbf16>
    %cst_38 = arith.constant dense<0.000000e+00> : vector<2x896xf32>
    %85 = tpu.matmul %83, %84, %cst_38 {dimension_numbers = #tpu.dot_dimension_numbers<[1], [0], [0], [1], [0, 0, 1, 1], [], []>} : vector<2x1024xbf16>, vector<1024x896xbf16>, vector<2x896xf32> -> vector<2x896xf32>
    %c0_39 = arith.constant 0 : index
    %c0_40 = arith.constant 0 : index
    %86 = vector.load %arg11[%c0_39, %c0_40] : memref<1x896xf32, #tpu.memory_space<vmem>>, vector<1x896xf32>
    %87 = vector.broadcast %86 : vector<1x896xf32> to vector<2x896xf32>
    %88 = arith.addf %85, %87 : vector<2x896xf32>
    %c0_41 = arith.constant 0 : index
    %c0_42 = arith.constant 0 : index
    %89 = vector.load %arg12[%c0_41, %c0_42] : memref<2x896xf32, #tpu.memory_space<vmem>>, vector<2x896xf32>
    tpu.vector_store %arg12[%c0_41, %c0_42], %88 {strides = array<i32>} : memref<2x896xf32, #tpu.memory_space<vmem>>, vector<2x896xf32>,
    return
  }
  func.func @transform_0(%arg0: i32) -> (i32, i32) {
    %c0_i32 = arith.constant 0 : i32
    %c0_i32_0 = arith.constant 0 : i32
    %c0_i32_1 = arith.constant 0 : i32
    return %c0_i32, %c0_i32_0 : i32, i32
  }
  func.func @transform_1(%arg0: i32) -> (i32, i32) {
    %c0_i32 = arith.constant 0 : i32
    %c0_i32_0 = arith.constant 0 : i32
    %c0_i32_1 = arith.constant 0 : i32
    return %c0_i32, %c0_i32_0 : i32, i32
  }
  func.func @transform_2(%arg0: i32) -> (i32, i32) {
    %c0_i32 = arith.constant 0 : i32
    %c0_i32_0 = arith.constant 0 : i32
    %c0_i32_1 = arith.constant 0 : i32
    return %c0_i32, %c0_i32_0 : i32, i32
  }
  func.func @transform_3(%arg0: i32) -> (i32, i32) {
    %c0_i32 = arith.constant 0 : i32
    %c0_i32_0 = arith.constant 0 : i32
    %c0_i32_1 = arith.constant 0 : i32
    return %c0_i32, %c0_i32_0 : i32, i32
  }
  func.func @transform_4(%arg0: i32) -> (i32, i32) {
    %c0_i32 = arith.constant 0 : i32
    %c0_i32_0 = arith.constant 0 : i32
    %c0_i32_1 = arith.constant 0 : i32
    return %c0_i32, %c0_i32_0 : i32, i32
  }
  func.func @transform_5(%arg0: i32) -> (i32, i32) {
    %c0_i32 = arith.constant 0 : i32
    %c0_i32_0 = arith.constant 0 : i32
    %c0_i32_1 = arith.constant 0 : i32
    return %c0_i32, %c0_i32_0 : i32, i32
  }
  func.func @transform_6(%arg0: i32) -> (i32, i32) {
    %c0_i32 = arith.constant 0 : i32
    %c0_i32_0 = arith.constant 0 : i32
    %c0_i32_1 = arith.constant 0 : i32
    return %c0_i32, %c0_i32_0 : i32, i32
  }
  func.func @transform_7(%arg0: i32) -> (i32, i32) {
    %c0_i32 = arith.constant 0 : i32
    %c0_i32_0 = arith.constant 0 : i32
    %c0_i32_1 = arith.constant 0 : i32
    return %c0_i32, %c0_i32_0 : i32, i32
  }
  func.func @transform_8(%arg0: i32) -> (i32, i32) {
    %c0_i32 = arith.constant 0 : i32
    %c0_i32_0 = arith.constant 0 : i32
    %c0_i32_1 = arith.constant 0 : i32
    return %c0_i32, %c0_i32_0 : i32, i32
  }
  func.func @transform_9(%arg0: i32) -> (i32, i32) {
    %c0_i32 = arith.constant 0 : i32
    %c0_i32_0 = arith.constant 0 : i32
    return %c0_i32, %arg0 : i32, i32
  }
  func.func @transform_10(%arg0: i32) -> (i32, i32) {
    %c0_i32 = arith.constant 0 : i32
    %c0_i32_0 = arith.constant 0 : i32
    return %c0_i32, %arg0 : i32, i32
  }
  func.func @transform_11(%arg0: i32) -> (i32, i32) {
    %c0_i32 = arith.constant 0 : i32
    %c0_i32_0 = arith.constant 0 : i32
    return %c0_i32, %arg0 : i32, i32
  }
}

</mosaic_0001>

<bundles_post_ra>
// kernel: generator_d3_forward.1
= control target key start
LH: loop header
LB: loop body
LE: loop exit
PB: predicated region body
PF: predicated region fallthrough
CT: control target
= control target key end

     0   :  { %16 = vsyncpa [#allocation3], 0  ;;  %s8711_s0 = inlined_call_operand.hbm [shape: f32[2,32], index: 0, kind: input, shape index: {}]   ;;  %s8712_s1 = inlined_call_operand.hbm [shape: bf16[32,512], index: 1, kind: input, shape index: {}]   ;;  %s8713_s2 = inlined_call_operand.hbm [shape: f32[1,512], index: 2, kind: input, shape index: {}]   ;;  %s8714_s3 = inlined_call_operand.hbm [shape: f32[1,512], index: 3, kind: input, shape index: {}]   ;;  %s8715_s4 = inlined_call_operand.hbm [shape: f32[1,512], index: 4, kind: input, shape index: {}]   ;;  %s8716_s5 = inlined_call_operand.hbm [shape: bf16[512,1024], index: 5, kind: input, shape index: {}]   ;;  %s8717_s6 = inlined_call_operand.hbm [shape: f32[1,1024], index: 6, kind: input, shape index: {}]   ;;  %s8718_s7 = inlined_call_operand.hbm [shape: f32[1,1024], index: 7, kind: input, shape index: {}]   ;;  %s8719_s8 = inlined_call_operand.hbm [shape: f32[1,1024], index: 8, kind: input, shape index: {}]   ;;  %s8720_s9 = inlined_call_operand.hbm [shape: bf16[1024,896], index: 9, kind: input, shape index: {}]   ;;  %s8721_s10 = inlined_call_operand.hbm [shape: f32[1,896], index: 10, kind: input, shape index: {}]   ;;  %s8722_s11 = inlined_call_operand.vmem [shape: f32[2,896], index: 11, kind: output, shape index: {}]  }
   0x1   :  { %17 = vsyncpa [#allocation5], 0 }
   0x2   :  { %18 = vsyncpa [#allocation8], 0 }
   0x3   :  { %19 = vsyncpa [#allocation11], 0 }
   0x4   :  { %20 = vsyncpa [#allocation14], 0 }
   0x5   :  { %21 = vsyncpa [#allocation17], 0  ;;  %s8186_s17 = smov [#allocation4]   ;;  %s7932_s21 = scalar_lea.hbm %s8712_s1, 1024 }
   0x6   :  { %s37_s18 = sshll.u32 %s8186_s17, 4  ;;  %p7933_p0 = scmp.ne.s32.totalorder %s8712_s1, %s7932_s21  ;;  %s38_s18 = int_to_ptr.vmem [resolvable:$true] %s37_s18 }
   0x7   :  { %p7936_p1 = scmp.lt.u32.totalorder %s7932_s21, %s8712_s1 }
   0x9   :  { %p7938_p2 = pnand %p7936_p1, %p7933_p0 }
   0xb   :  { %7941 = shalt.err (!%p7938_p2)
}
   0xc   :  { %s7942_s26 = scalar_lea.vmem %s38_s18, 1024  ;;  %p7947_p4 = scmp.lt.s32.totalorder %s38_s18, %s38_s18 }
   0xd   :  { %p7943_p3 = scmp.ne.s32.totalorder %s38_s18, %s7942_s26  ;;  %p7948_p5 = scmp.lt.s32.totalorder %s7942_s26, %s7942_s26 }
   0xf   :  { %p7949_p6 = por %p7948_p5, %p7947_p4 }
  0x11   :  { %p7950_p7 = pnand %p7949_p6, %p7943_p3 }
  0x13   :  { %7953 = shalt.err (!%p7950_p7)
}
  0x14   :  { %s8187_s27 = smov 256   ;;  %s8188_s28 = smov 16  }
  0x15   :  { %43 = dma.hbm_to_vmem [thread:$0]  %s8712_s1, 1024, %s38_s18, [#allocation5], %s8187_s27, %s8187_s27, %s8188_s28  }
  0x16   :  { %s8189_s12 = smov [#allocation7]   ;;  %s8190_s14 = smov [#allocation10]  }
  0x17   :  { %s60_s13 = sshll.u32 %s8189_s12, 4  ;;  %s79_s15 = sshll.u32 %s8190_s14, 4  ;;  %s61_s13 = int_to_ptr.vmem [resolvable:$true] %s60_s13  ;;  %s80_s15 = int_to_ptr.vmem [resolvable:$true] %s79_s15 }
  0x18   :  { %s7954_s19 = scalar_lea.hbm %s8714_s3, 64 }
  0x19   :  { %p7955_p8 = scmp.ne.s32.totalorder %s8714_s3, %s7954_s19  ;;  %p7958_p9 = scmp.lt.u32.totalorder %s7954_s19, %s8714_s3 }
  0x1b   :  { %p7960_p10 = pnand %p7958_p9, %p7955_p8 }
  0x1d   :  { %7963 = shalt.err (!%p7960_p10)
}
  0x1e   :  { %s7964_s1 = scalar_lea.vmem %s61_s13, 64  ;;  %p7969_p12 = scmp.lt.s32.totalorder %s61_s13, %s61_s13 }
  0x1f   :  { %p7965_p11 = scmp.ne.s32.totalorder %s61_s13, %s7964_s1  ;;  %p7970_p13 = scmp.lt.s32.totalorder %s7964_s1, %s7964_s1 }
  0x21   :  { %p7971_p0 = por %p7970_p13, %p7969_p12 }
  0x23   :  { %p7972_p1 = pnand %p7971_p0, %p7965_p11 }
  0x25   :  { %7975 = shalt.err (!%p7972_p1)
}
  0x26   :  { %63 = dma.hbm_to_vmem [thread:$0]  %s8714_s3, 64, %s61_s13, [#allocation8]  }
  0x27   :  { %s7976_s27 = scalar_lea.hbm %s8716_s5, 32768 }
  0x28   :  { %p7977_p2 = scmp.ne.s32.totalorder %s8716_s5, %s7976_s27  ;;  %p7980_p3 = scmp.lt.u32.totalorder %s7976_s27, %s8716_s5 }
  0x2a   :  { %p7982_p4 = pnand %p7980_p3, %p7977_p2 }
  0x2c   :  { %7985 = shalt.err (!%p7982_p4)
}
  0x2d   :  { %s7986_s14 = scalar_lea.vmem %s80_s15, 32768  ;;  %p7991_p6 = scmp.lt.s32.totalorder %s80_s15, %s80_s15 }
  0x2e   :  { %p7987_p5 = scmp.ne.s32.totalorder %s80_s15, %s7986_s14  ;;  %p7992_p7 = scmp.lt.s32.totalorder %s7986_s14, %s7986_s14 }
  0x30   :  { %p7993_p8 = por %p7992_p7, %p7991_p6 }
  0x32   :  { %p7994_p9 = pnand %p7993_p8, %p7987_p5 }
  0x34   :  { %7997 = shalt.err (!%p7994_p9)
}
  0x35   :  { %s8191_s3 = smov 512   ;;  %s8192_s13 = smov 32  }
  0x36   :  { %85 = dma.hbm_to_vmem [thread:$0]  %s8716_s5, 32768, %s80_s15, [#allocation11], %s8191_s3, %s8191_s3, %s8192_s13  }
  0x37   :  { %s8193_s19 = smov [#allocation13]   ;;  %s8194_s21 = smov [#allocation16]  }
  0x38   :  { %s102_s20 = sshll.u32 %s8193_s19, 4  ;;  %s121_s22 = sshll.u32 %s8194_s21, 4  ;;  %s103_s20 = int_to_ptr.vmem [resolvable:$true] %s102_s20  ;;  %s122_s22 = int_to_ptr.vmem [resolvable:$true] %s121_s22 }
  0x39   :  { %s7998_s18 = scalar_lea.hbm %s8718_s7, 128 }
  0x3a   :  { %p7999_p10 = scmp.ne.s32.totalorder %s8718_s7, %s7998_s18  ;;  %p8002_p11 = scmp.lt.u32.totalorder %s7998_s18, %s8718_s7 }
  0x3c   :  { %p8004_p12 = pnand %p8002_p11, %p7999_p10 }
  0x3e   :  { %8007 = shalt.err (!%p8004_p12)
}
  0x3f   :  { %s8008_s5 = scalar_lea.vmem %s103_s20, 128  ;;  %p8013_p0 = scmp.lt.s32.totalorder %s103_s20, %s103_s20 }
  0x40   :  { %p8009_p13 = scmp.ne.s32.totalorder %s103_s20, %s8008_s5  ;;  %p8014_p1 = scmp.lt.s32.totalorder %s8008_s5, %s8008_s5 }
  0x42   :  { %p8015_p2 = por %p8014_p1, %p8013_p0 }
  0x44   :  { %p8016_p3 = pnand %p8015_p2, %p8009_p13 }
  0x46   :  { %8019 = shalt.err (!%p8016_p3)
}
  0x47   :  { %105 = dma.hbm_to_vmem [thread:$0]  %s8718_s7, 128, %s103_s20, [#allocation14]  }
  0x48   :  { %s8020_s12 = scalar_lea.hbm %s8720_s9, 57344 }
  0x49   :  { %p8021_p4 = scmp.ne.s32.totalorder %s8720_s9, %s8020_s12  ;;  %p8024_p5 = scmp.lt.u32.totalorder %s8020_s12, %s8720_s9 }
  0x4b   :  { %p8026_p6 = pnand %p8024_p5, %p8021_p4 }
  0x4d   :  { %8029 = shalt.err (!%p8026_p6)
}
  0x4e   :  { %s8030_s17 = scalar_lea.vmem %s122_s22, 57344  ;;  %p8035_p8 = scmp.lt.s32.totalorder %s122_s22, %s122_s22 }
  0x4f   :  { %p8031_p7 = scmp.ne.s32.totalorder %s122_s22, %s8030_s17  ;;  %p8036_p9 = scmp.lt.s32.totalorder %s8030_s17, %s8030_s17 }
  0x51   :  { %p8037_p10 = por %p8036_p9, %p8035_p8 }
  0x53   :  { %p8038_p11 = pnand %p8037_p10, %p8031_p7 }
  0x55   :  { %8041 = shalt.err (!%p8038_p11)
}
  0x56   :  { %s8195_s7 = smov 448   ;;  %s8196_s19 = smov 28  }
  0x57   :  { %127 = dma.hbm_to_vmem [thread:$0]  %s8720_s9, 57344, %s122_s22, [#allocation17], %s8195_s7, %s8195_s7, %s8196_s19  }
  0x58   :  { %s8197_s23 = smov [#allocation2]   ;;  %s8198_s18 = smov [#allocation6]  }
  0x59   :  { %s28_s1 = sshll.u32 %s8197_s23, 4  ;;  %s50_s24 = sshll.u32 %s8198_s18, 4  ;;  %s29_s1 = int_to_ptr.vmem [resolvable:$true] %s28_s1  ;;  %s51_s24 = int_to_ptr.vmem [resolvable:$true] %s50_s24 }
  0x5a   :  { %s8042_s27 = scalar_lea.hbm %s8711_s0, 32 }
  0x5b   :  { %p8043_p12 = scmp.ne.s32.totalorder %s8711_s0, %s8042_s27  ;;  %p8046_p13 = scmp.lt.u32.totalorder %s8042_s27, %s8711_s0 }
  0x5d   :  { %p8048_p0 = pnand %p8046_p13, %p8043_p12 }
  0x5f   :  { %8051 = shalt.err (!%p8048_p0)
}
  0x60   :  { %s8052_s9 = scalar_lea.vmem %s29_s1, 32  ;;  %p8057_p2 = scmp.lt.s32.totalorder %s29_s1, %s29_s1 }
  0x61   :  { %p8053_p1 = scmp.ne.s32.totalorder %s29_s1, %s8052_s9  ;;  %p8058_p3 = scmp.lt.s32.totalorder %s8052_s9, %s8052_s9 }
  0x63   :  { %p8059_p4 = por %p8058_p3, %p8057_p2 }
  0x65   :  { %p8060_p5 = pnand %p8059_p4, %p8053_p1 }
  0x67   :  { %8063 = shalt.err (!%p8060_p5)
}
  0x68   :  { %31 = dma.hbm_to_vmem [thread:$0]  %s8711_s0, 32, %s29_s1, [#allocation3]  }
  0x69   :  { %s8064_s3 = scalar_lea.hbm %s8713_s2, 64 }
  0x6a   :  { %p8065_p6 = scmp.ne.s32.totalorder %s8713_s2, %s8064_s3  ;;  %p8068_p7 = scmp.lt.u32.totalorder %s8064_s3, %s8713_s2 }
  0x6c   :  { %p8070_p8 = pnand %p8068_p7, %p8065_p6 }
  0x6e   :  { %8073 = shalt.err (!%p8070_p8)
}
  0x6f   :  { %s8074_s19 = scalar_lea.vmem %s51_s24, 64  ;;  %p8079_p10 = scmp.lt.s32.totalorder %s51_s24, %s51_s24 }
  0x70   :  { %p8075_p9 = scmp.ne.s32.totalorder %s51_s24, %s8074_s19  ;;  %p8080_p11 = scmp.lt.s32.totalorder %s8074_s19, %s8074_s19 }
  0x72   :  { %p8081_p12 = por %p8080_p11, %p8079_p10 }
  0x74   :  { %p8082_p13 = pnand %p8081_p12, %p8075_p9 }
  0x76   :  { %8085 = shalt.err (!%p8082_p13)
}
  0x77   :  { %53 = dma.hbm_to_vmem [thread:$0]  %s8713_s2, 64, %s51_s24, [#allocation5]  }
  0x78   :  { %s8199_s21 = smov [#allocation9]   ;;  %s8200_s1 = smov [#allocation12]  }
  0x79   :  { %s70_s23 = sshll.u32 %s8199_s21, 4  ;;  %s92_s18 = sshll.u32 %s8200_s1, 4  ;;  %s71_s23 = int_to_ptr.vmem [resolvable:$true] %s70_s23  ;;  %s93_s18 = int_to_ptr.vmem [resolvable:$true] %s92_s18 }
  0x7a   :  { %s8086_s27 = scalar_lea.hbm %s8715_s4, 64 }
  0x7b   :  { %p8087_p0 = scmp.ne.s32.totalorder %s8715_s4, %s8086_s27  ;;  %p8090_p1 = scmp.lt.u32.totalorder %s8086_s27, %s8715_s4 }
  0x7d   :  { %p8092_p2 = pnand %p8090_p1, %p8087_p0 }
  0x7f   :  { %8095 = shalt.err (!%p8092_p2)
}
  0x80   :  { %s8096_s2 = scalar_lea.vmem %s71_s23, 64  ;;  %p8101_p4 = scmp.lt.s32.totalorder %s71_s23, %s71_s23 }
  0x81   :  { %p8097_p3 = scmp.ne.s32.totalorder %s71_s23, %s8096_s2  ;;  %p8102_p5 = scmp.lt.s32.totalorder %s8096_s2, %s8096_s2 }
  0x83   :  { %p8103_p6 = por %p8102_p5, %p8101_p4 }
  0x85   :  { %p8104_p7 = pnand %p8103_p6, %p8097_p3 }
  0x87   :  { %8107 = shalt.err (!%p8104_p7)
}
  0x88   :  { %73 = dma.hbm_to_vmem [thread:$0]  %s8715_s4, 64, %s71_s23, [#allocation8]  }
  0x89   :  { %s8108_s12 = scalar_lea.hbm %s8717_s6, 128 }
  0x8a   :  { %p8109_p8 = scmp.ne.s32.totalorder %s8717_s6, %s8108_s12  ;;  %p8112_p9 = scmp.lt.u32.totalorder %s8108_s12, %s8717_s6 }
  0x8c   :  { %p8114_p10 = pnand %p8112_p9, %p8109_p8 }
  0x8e   :  { %8117 = shalt.err (!%p8114_p10)
}
  0x8f   :  { %s8118_s17 = scalar_lea.vmem %s93_s18, 128  ;;  %p8123_p12 = scmp.lt.s32.totalorder %s93_s18, %s93_s18 }
  0x90   :  { %p8119_p11 = scmp.ne.s32.totalorder %s93_s18, %s8118_s17  ;;  %p8124_p13 = scmp.lt.s32.totalorder %s8118_s17, %s8118_s17 }
  0x92   :  { %p8125_p0 = por %p8124_p13, %p8123_p12 }
  0x94   :  { %p8126_p1 = pnand %p8125_p0, %p8119_p11 }
  0x96   :  { %8129 = shalt.err (!%p8126_p1)
}
  0x97   :  { %95 = dma.hbm_to_vmem [thread:$0]  %s8717_s6, 128, %s93_s18, [#allocation11]  }
  0x98   :  { %s8201_s19 = smov [#allocation15]   ;;  %s8202_s20 = smov [#allocation18]  }
  0x99   :  { %s112_s0 = sshll.u32 %s8201_s19, 4  ;;  %s134_s21 = sshll.u32 %s8202_s20, 4  ;;  %s113_s0 = int_to_ptr.vmem [resolvable:$true] %s112_s0  ;;  %s135_s21 = int_to_ptr.vmem [resolvable:$true] %s134_s21 }
  0x9a   :  { %s8130_s25 = scalar_lea.hbm %s8719_s8, 128 }
  0x9b   :  { %p8131_p2 = scmp.ne.s32.totalorder %s8719_s8, %s8130_s25  ;;  %p8134_p3 = scmp.lt.u32.totalorder %s8130_s25, %s8719_s8 }
  0x9d   :  { %p8136_p4 = pnand %p8134_p3, %p8131_p2 }
  0x9f   :  { %8139 = shalt.err (!%p8136_p4)
}
  0xa0   :  { %s8140_s6 = scalar_lea.vmem %s113_s0, 128  ;;  %p8145_p6 = scmp.lt.s32.totalorder %s113_s0, %s113_s0 }
  0xa1   :  { %p8141_p5 = scmp.ne.s32.totalorder %s113_s0, %s8140_s6  ;;  %p8146_p7 = scmp.lt.s32.totalorder %s8140_s6, %s8140_s6 }
  0xa3   :  { %p8147_p8 = por %p8146_p7, %p8145_p6 }
  0xa5   :  { %p8148_p9 = pnand %p8147_p8, %p8141_p5 }
  0xa7   :  { %8151 = shalt.err (!%p8148_p9)
}
  0xa8   :  { %115 = dma.hbm_to_vmem [thread:$0]  %s8719_s8, 128, %s113_s0, [#allocation14]  }
  0xa9   :  { %s8152_s24 = scalar_lea.hbm %s8721_s10, 112 }
  0xaa   :  { %p8153_p10 = scmp.ne.s32.totalorder %s8721_s10, %s8152_s24  ;;  %p8156_p11 = scmp.lt.u32.totalorder %s8152_s24, %s8721_s10 }
  0xac   :  { %p8158_p12 = pnand %p8156_p11, %p8153_p10 }
  0xae   :  { %8161 = shalt.err (!%p8158_p12)
}
  0xaf   :  { %s8162_s14 = scalar_lea.vmem %s135_s21, 112  ;;  %s8166_s3 = scalar_lea.vmem %s135_s21, 128 }
  0xb0   :  { %p8163_p13 = scmp.ne.s32.totalorder %s135_s21, %s8162_s14  ;;  %p8167_p0 = scmp.lt.s32.totalorder %s135_s21, %s135_s21 }
  0xb1   :  { %p8168_p1 = scmp.lt.s32.totalorder %s8166_s3, %s8162_s14 }
  0xb3   :  { %p8169_p2 = por %p8168_p1, %p8167_p0 }
  0xb5   :  { %p8170_p3 = pnand %p8169_p2, %p8163_p13 }
  0xb7   :  { %8173 = shalt.err (!%p8170_p3)
}
  0xb8   :  { %137 = dma.hbm_to_vmem [thread:$0]  %s8721_s10, 112, %s135_s21, [#allocation17]  }
  0xb9   :  { %8174 = dma.done.wait [#allocation3], 32  }
  0xba   :  { %8175 = vsyncadd [#allocation3], 4294967264 }
  0xbb   :  { %8176 = dma.done.wait [#allocation5], 1088  }
  0xbc   :  { %8177 = vsyncadd [#allocation5], 4294966208 }
  0xbd   :  { %8178 = dma.done.wait [#allocation8], 128  }
  0xbe   :  { %8179 = vsyncadd [#allocation8], 4294967168 }
  0xbf   :  { %8180 = dma.done.wait [#allocation11], 32896  }
  0xc0   :  { %8181 = vsyncadd [#allocation11], 4294934400 }
  0xc1   :  { %8182 = dma.done.wait [#allocation14], 256  }
  0xc2   :  { %8183 = vsyncadd [#allocation14], 4294967040 }
  0xc3   :  { %8184 = dma.done.wait [#allocation17], 57456  }
  0xc4   :  { %8185 = vsyncadd [#allocation17], 4294909840  ;;  %v8203_v0 = vmov 0   ;;  %v7229_v1 = vld [vmem:[#allocation4 + $0x4] ss:$16 sps:$4 sm:$0xff]   ;;  %vm244_vm0 = vcmask 261120  }
  0xc5   :  { %280 = vmatprep.mubr.bf16.mxu0 %v8203_v0  ;;  %321 = vmatprep.mubr.bf16.mxu1 %v8203_v0  ;;  %v7231_v2 = vld [vmem:[#allocation4 + $0xc] ss:$16 sps:$4 sm:$0xff]   ;;  %v7233_v3 = vld [vmem:[#allocation4] ss:$16 sps:$4 sm:$0xff]   ;;  %v7234_v4 = vld [vmem:[#allocation4 + $0x8] ss:$16 sps:$4 sm:$0xff]  }
  0xc6   :  { %248 = vmatprep.subr.bf16.mxu0 %v7229_v1  ;;  %289 = vmatprep.subr.bf16.mxu1 %v7231_v2  ;;  %v7235_v5 = vld [vmem:[#allocation4 + $0x24] ss:$16 sps:$4 sm:$0xff]   ;;  %v7237_v6 = vld [vmem:[#allocation4 + $0x2c] ss:$16 sps:$4 sm:$0xff]   ;;  %v7239_v7 = vld [vmem:[#allocation4 + $0x20] ss:$16 sps:$4 sm:$0xff]  }
  0xc7   :  { %249 = vmatpush1.bf16.msra.mxu0 %v7233_v3  ;;  %290 = vmatpush1.bf16.msra.mxu1 %v7234_v4  ;;  %v7240_v8 = vld [vmem:[#allocation4 + $0x28] ss:$16 sps:$4 sm:$0xff]   ;;  %v172_v9 = vld [vmem:[#allocation2] sm:$0x3]  ;;  %v511_v11 = vld [vmem:[#allocation10] sm:$0xff]  ;;  %vm332_vm1 = vcmask 1041408  }
  0xc8   :  { %250 = vmatprep.subr.bf16.mxu0 %v7235_v5  ;;  %291 = vmatprep.subr.bf16.mxu1 %v7237_v6  ;;  %v173_v10 = vpack.c.bf16 %v172_v9, %v172_v9  ;;  %v515_v12 = vld [vmem:[#allocation10 + $0x20] sm:$0xff] }
  0xc9   :  { %v639_v13 = vld [vmem:[#allocation10 + $0x400] sm:$0xff]  ;;  %v6347_v14 = vcombine.high %v511_v11, %v515_v12  ;;  %v6346_v16 = vcombine.low %v511_v11, %v515_v12 }
  0xca   :  { %v643_v15 = vld [vmem:[#allocation10 + $0x420] sm:$0xff] }
  0xcb   :  { %251 = vmatpush1.bf16.msra.mxu0 %v7239_v7  ;;  %292 = vmatpush1.bf16.msra.mxu1 %v7240_v8  ;;  %v6474_v17 = vcombine.low %v639_v13, %v643_v15  ;;  %v6475_v18 = vcombine.high %v639_v13, %v643_v15  ;;  %v519_v19 = vld [vmem:[#allocation10 + $0x40] sm:$0xff] }
  0xcc   :  { %2089 = vmatprep.subr.bf16.mxu1 %v6347_v14  ;;  %v523_v20 = vld [vmem:[#allocation10 + $0x60] sm:$0xff] }
  0xcd   :  { %2130 = vmatprep.subr.bf16.mxu0 %v6475_v18  ;;  %v647_v21 = vld [vmem:[#allocation10 + $0x440] sm:$0xff]  ;;  %v6355_v22 = vcombine.high %v519_v19, %v523_v20  ;;  %v6354_v24 = vcombine.low %v519_v19, %v523_v20 }
  0xce   :  { %6340 = vmatmul.mubr.msk.bf16.vlgmr.msra.gmra.mrb[0].mxu0 %vm244_vm0, %v173_v10  ;;  %6341 = vmatmul.mubr.msk.bf16.vlgmr.msra.gmra.mrb[0].mxu1 %vm244_vm0, %v173_v10  ;;  %v651_v23 = vld [vmem:[#allocation10 + $0x460] sm:$0xff] }
  0xcf   :  { %2090 = vmatpush1.bf16.msra.mxu1 %v6346_v16  ;;  %2131 = vmatpush1.bf16.msra.mxu0 %v6474_v17  ;;  %v6482_v25 = vcombine.low %v647_v21, %v651_v23  ;;  %v6483_v26 = vcombine.high %v647_v21, %v651_v23  ;;  %v527_v27 = vld [vmem:[#allocation10 + $0x80] sm:$0xff] }
  0xd0   :  { %2091 = vmatprep.subr.bf16.mxu1 %v6355_v22  ;;  %v531_v28 = vld [vmem:[#allocation10 + $0xa0] sm:$0xff] }
  0xd1   :  { %2132 = vmatprep.subr.bf16.mxu0 %v6483_v26  ;;  %v655_v29 = vld [vmem:[#allocation10 + $0x480] sm:$0xff]  ;;  %v6363_v30 = vcombine.high %v527_v27, %v531_v28  ;;  %v6362_v32 = vcombine.low %v527_v27, %v531_v28 }
  0xd2   :  { %v659_v31 = vld [vmem:[#allocation10 + $0x4a0] sm:$0xff] }
  0xd3   :  { %2092 = vmatpush1.bf16.msra.mxu1 %v6354_v24  ;;  %2133 = vmatpush1.bf16.msra.mxu0 %v6482_v25  ;;  %v6490_v33 = vcombine.low %v655_v29, %v659_v31  ;;  %v6491_v34 = vcombine.high %v655_v29, %v659_v31  ;;  %v535_v35 = vld [vmem:[#allocation10 + $0xc0] sm:$0xff] }
  0xd4   :  { %2093 = vmatprep.subr.bf16.mxu1 %v6363_v30  ;;  %v539_v36 = vld [vmem:[#allocation10 + $0xe0] sm:$0xff] }
  0xd5   :  { %2134 = vmatprep.subr.bf16.mxu0 %v6491_v34  ;;  %v663_v37 = vld [vmem:[#allocation10 + $0x4c0] sm:$0xff]  ;;  %v6371_v38 = vcombine.high %v535_v35, %v539_v36  ;;  %v6370_v40 = vcombine.low %v535_v35, %v539_v36 }
  0xd6   :  { %v667_v39 = vld [vmem:[#allocation10 + $0x4e0] sm:$0xff] }
  0xd7   :  { %2094 = vmatpush1.bf16.msra.mxu1 %v6362_v32  ;;  %2135 = vmatpush1.bf16.msra.mxu0 %v6490_v33  ;;  %v6498_v41 = vcombine.low %v663_v37, %v667_v39  ;;  %v6499_v42 = vcombine.high %v663_v37, %v667_v39  ;;  %v543_v43 = vld [vmem:[#allocation10 + $0x100] sm:$0xff] }
  0xd8   :  { %2095 = vmatprep.subr.bf16.mxu1 %v6371_v38  ;;  %v547_v44 = vld [vmem:[#allocation10 + $0x120] sm:$0xff] }
  0xd9   :  { %2136 = vmatprep.subr.bf16.mxu0 %v6499_v42  ;;  %v671_v45 = vld [vmem:[#allocation10 + $0x500] sm:$0xff]  ;;  %v6379_v46 = vcombine.high %v543_v43, %v547_v44  ;;  %v6378_v48 = vcombine.low %v543_v43, %v547_v44 }
  0xda   :  { %v675_v47 = vld [vmem:[#allocation10 + $0x520] sm:$0xff] }
  0xdb   :  { %2096 = vmatpush1.bf16.msra.mxu1 %v6370_v40  ;;  %2137 = vmatpush1.bf16.msra.mxu0 %v6498_v41  ;;  %v6506_v49 = vcombine.low %v671_v45, %v675_v47  ;;  %v6507_v50 = vcombine.high %v671_v45, %v675_v47  ;;  %v551_v51 = vld [vmem:[#allocation10 + $0x140] sm:$0xff] }
  0xdc   :  { %2097 = vmatprep.subr.bf16.mxu1 %v6379_v46  ;;  %v555_v52 = vld [vmem:[#allocation10 + $0x160] sm:$0xff] }
  0xdd   :  { %2138 = vmatprep.subr.bf16.mxu0 %v6507_v50  ;;  %v679_v53 = vld [vmem:[#allocation10 + $0x540] sm:$0xff]  ;;  %v6387_v54 = vcombine.high %v551_v51, %v555_v52  ;;  %v6386_v56 = vcombine.low %v551_v51, %v555_v52 }
  0xde   :  { %v683_v55 = vld [vmem:[#allocation10 + $0x560] sm:$0xff] }
  0xdf   :  { %2098 = vmatpush1.bf16.msra.mxu1 %v6378_v48  ;;  %2139 = vmatpush1.bf16.msra.mxu0 %v6506_v49  ;;  %v6514_v57 = vcombine.low %v679_v53, %v683_v55  ;;  %v6515_v58 = vcombine.high %v679_v53, %v683_v55  ;;  %v559_v59 = vld [vmem:[#allocation10 + $0x180] sm:$0xff] }
  0xe0   :  { %2099 = vmatprep.subr.bf16.mxu1 %v6387_v54  ;;  %v563_v60 = vld [vmem:[#allocation10 + $0x1a0] sm:$0xff] }
  0xe1   :  { %2140 = vmatprep.subr.bf16.mxu0 %v6515_v58  ;;  %v687_v61 = vld [vmem:[#allocation10 + $0x580] sm:$0xff]  ;;  %v6395_v62 = vcombine.high %v559_v59, %v563_v60  ;;  %v6394_v0 = vcombine.low %v559_v59, %v563_v60 }
  0xe2   :  { %v691_v63 = vld [vmem:[#allocation10 + $0x5a0] sm:$0xff] }
  0xe3   :  { %2100 = vmatpush1.bf16.msra.mxu1 %v6386_v56  ;;  %2141 = vmatpush1.bf16.msra.mxu0 %v6514_v57  ;;  %v6522_v1 = vcombine.low %v687_v61, %v691_v63  ;;  %v6523_v2 = vcombine.high %v687_v61, %v691_v63  ;;  %v567_v3 = vld [vmem:[#allocation10 + $0x1c0] sm:$0xff] }
  0xe4   :  { %2101 = vmatprep.subr.bf16.mxu1 %v6395_v62  ;;  %v571_v4 = vld [vmem:[#allocation10 + $0x1e0] sm:$0xff] }
  0xe5   :  { %2142 = vmatprep.subr.bf16.mxu0 %v6523_v2  ;;  %v695_v5 = vld [vmem:[#allocation10 + $0x5c0] sm:$0xff]  ;;  %v6403_v6 = vcombine.high %v567_v3, %v571_v4  ;;  %v6402_v8 = vcombine.low %v567_v3, %v571_v4 }
  0xe6   :  { %v699_v7 = vld [vmem:[#allocation10 + $0x5e0] sm:$0xff] }
  0xe7   :  { %2102 = vmatpush1.bf16.msra.mxu1 %v6394_v0  ;;  %2143 = vmatpush1.bf16.msra.mxu0 %v6522_v1  ;;  %v6530_v9 = vcombine.low %v695_v5, %v699_v7  ;;  %v6531_v10 = vcombine.high %v695_v5, %v699_v7  ;;  %v575_v11 = vld [vmem:[#allocation10 + $0x200] sm:$0xff] }
  0xe8   :  { %2103 = vmatprep.subr.bf16.mxu1 %v6403_v6  ;;  %v579_v12 = vld [vmem:[#allocation10 + $0x220] sm:$0xff] }
  0xe9   :  { %2144 = vmatprep.subr.bf16.mxu0 %v6531_v10  ;;  %v703_v13 = vld [vmem:[#allocation10 + $0x600] sm:$0xff]  ;;  %v6411_v14 = vcombine.high %v575_v11, %v579_v12  ;;  %v6410_v16 = vcombine.low %v575_v11, %v579_v12  ;;  %v8397_v11 = vld [vmem:[#allocation10 + $0x8] sm:$0xff] }
  0xea   :  { %v707_v15 = vld [vmem:[#allocation10 + $0x620] sm:$0xff]  ;;  %v8399_v12 = vld [vmem:[#allocation10 + $0x28] sm:$0xff] }
  0xeb   :  { %2104 = vmatpush1.bf16.msra.mxu1 %v6402_v8  ;;  %2145 = vmatpush1.bf16.msra.mxu0 %v6530_v9  ;;  %v6538_v17 = vcombine.low %v703_v13, %v707_v15  ;;  %v6539_v18 = vcombine.high %v703_v13, %v707_v15  ;;  %v583_v19 = vld [vmem:[#allocation10 + $0x240] sm:$0xff]  ;;  %v8401_v13 = vld [vmem:[#allocation10 + $0x10] sm:$0xff] }
  0xec   :  { %2105 = vmatprep.subr.bf16.mxu1 %v6411_v14  ;;  %v587_v20 = vld [vmem:[#allocation10 + $0x260] sm:$0xff]  ;;  %v6349_v14 = vcombine.high %v8397_v11, %v8399_v12  ;;  %v8405_v15 = vld [vmem:[#allocation10 + $0x30] sm:$0xff] }
  0xed   :  { %2146 = vmatprep.subr.bf16.mxu0 %v6539_v18  ;;  %v711_v21 = vld [vmem:[#allocation10 + $0x640] sm:$0xff]  ;;  %v6419_v22 = vcombine.high %v583_v19, %v587_v20  ;;  %v6418_v24 = vcombine.low %v583_v19, %v587_v20  ;;  %v6351_v18 = vcombine.high %v8401_v13, %v8405_v15  ;;  %v184_v19 = vlaneseq }
  0xee   :  { %v715_v23 = vld [vmem:[#allocation10 + $0x660] sm:$0xff] }
  0xef   :  { %2106 = vmatpush1.bf16.msra.mxu1 %v6410_v16  ;;  %2147 = vmatpush1.bf16.msra.mxu0 %v6538_v17  ;;  %v6546_v25 = vcombine.low %v711_v21, %v715_v23  ;;  %v6547_v26 = vcombine.high %v711_v21, %v715_v23  ;;  %v591_v27 = vld [vmem:[#allocation10 + $0x280] sm:$0xff]  ;;  %v6348_v16 = vcombine.low %v8397_v11, %v8399_v12  ;;  %v8413_v20 = vshrl.u32 %v184_v19, 7  ;;  %v182_v23 = vld [vmem:[#allocation6] sm:$0xf] }
  0xf0   :  { %2107 = vmatprep.subr.bf16.mxu1 %v6419_v22  ;;  %v595_v28 = vld [vmem:[#allocation10 + $0x2a0] sm:$0xff]  ;;  %v6350_v17 = vcombine.low %v8401_v13, %v8405_v15 }
  0xf1   :  { %2148 = vmatprep.subr.bf16.mxu0 %v6547_v26  ;;  %v719_v29 = vld [vmem:[#allocation10 + $0x680] sm:$0xff]  ;;  %v6427_v30 = vcombine.high %v591_v27, %v595_v28  ;;  %v6426_v32 = vcombine.low %v591_v27, %v595_v28  ;;  %v8416_v21 = vsub.s32 0, %v8413_v20  ;;  %v8419_v22 = vsub.s32 2, %v8413_v20 }
  0xf2   :  { %v723_v31 = vld [vmem:[#allocation10 + $0x6a0] sm:$0xff] }
  0xf3   :  { %2108 = vmatpush1.bf16.msra.mxu1 %v6418_v24  ;;  %2149 = vmatpush1.bf16.msra.mxu0 %v6546_v25  ;;  %v6554_v33 = vcombine.low %v719_v29, %v723_v31  ;;  %v6555_v34 = vcombine.high %v719_v29, %v723_v31  ;;  %v599_v35 = vld [vmem:[#allocation10 + $0x2c0] sm:$0xff]  ;;  %v8422_v24 = vsub.s32 1, %v8413_v20  ;;  %v8425_v25 = vsub.s32 3, %v8413_v20 }
  0xf4   :  { %2109 = vmatprep.subr.bf16.mxu1 %v6427_v30  ;;  %v603_v36 = vld [vmem:[#allocation10 + $0x2e0] sm:$0xff]  ;;  %v187_v26 = vrot.slane %v182_v23, %v8416_v21  ;;  %v195_v27 = vrot.slane %v182_v23, %v8419_v22 }
  0xf5   :  { %2150 = vmatprep.subr.bf16.mxu0 %v6555_v34  ;;  %v727_v37 = vld [vmem:[#allocation10 + $0x6c0] sm:$0xff]  ;;  %v6435_v38 = vcombine.high %v599_v35, %v603_v36  ;;  %v6434_v40 = vcombine.low %v599_v35, %v603_v36  ;;  %v191_v28 = vrot.slane %v182_v23, %v8422_v24  ;;  %v199_v29 = vrot.slane %v182_v23, %v8425_v25 }
  0xf6   :  { %v731_v39 = vld [vmem:[#allocation10 + $0x6e0] sm:$0xff] }
  0xf7   :  { %2110 = vmatpush1.bf16.msra.mxu1 %v6426_v32  ;;  %2151 = vmatpush1.bf16.msra.mxu0 %v6554_v33  ;;  %v6562_v41 = vcombine.low %v727_v37, %v731_v39  ;;  %v6563_v42 = vcombine.high %v727_v37, %v731_v39  ;;  %v607_v43 = vld [vmem:[#allocation10 + $0x300] sm:$0xff] }
  0xf8   :  { %v611_v44 = vld [vmem:[#allocation10 + $0x320] sm:$0xff]  ;;  %2111 = vmatprep.subr.bf16.mxu1 %v6435_v38 }
  0xf9   :  { %v735_v45 = vld [vmem:[#allocation10 + $0x700] sm:$0xff]  ;;  %v6443_v46 = vcombine.high %v607_v43, %v611_v44  ;;  %2152 = vmatprep.subr.bf16.mxu0 %v6563_v42  ;;  %v6442_v50 = vcombine.low %v607_v43, %v611_v44 }
  0xfa   :  { %v739_v47 = vld [vmem:[#allocation10 + $0x720] sm:$0xff] }
  0xfb   :  { %v615_v48 = vld [vmem:[#allocation10 + $0x340] sm:$0xff]  ;;  %2112 = vmatpush1.bf16.msra.mxu1 %v6434_v40  ;;  %v6571_v51 = vcombine.high %v735_v45, %v739_v47  ;;  %2153 = vmatpush1.bf16.msra.mxu0 %v6562_v41  ;;  %v6570_v54 = vcombine.low %v735_v45, %v739_v47 }
  0xfc   :  { %v619_v49 = vld [vmem:[#allocation10 + $0x360] sm:$0xff]  ;;  %2113 = vmatprep.subr.bf16.mxu1 %v6443_v46 }
  0xfd   :  { %v743_v52 = vld [vmem:[#allocation10 + $0x740] sm:$0xff]  ;;  %v6451_v55 = vcombine.high %v615_v48, %v619_v49  ;;  %2154 = vmatprep.subr.bf16.mxu0 %v6571_v51  ;;  %v6450_v61 = vcombine.low %v615_v48, %v619_v49 }
  0xfe   :  { %v747_v53 = vld [vmem:[#allocation10 + $0x760] sm:$0xff] }
  0xff   :  { %v6579_v56 = vcombine.high %v743_v52, %v747_v53  ;;  %v623_v57 = vld [vmem:[#allocation10 + $0x380] sm:$0xff]  ;;  %2114 = vmatpush1.bf16.msra.mxu1 %v6442_v50  ;;  %2155 = vmatpush1.bf16.msra.mxu0 %v6570_v54  ;;  %v6578_v0 = vcombine.low %v743_v52, %v747_v53 }
 0x100   :  { %v627_v58 = vld [vmem:[#allocation10 + $0x3a0] sm:$0xff]  ;;  %2115 = vmatprep.subr.bf16.mxu1 %v6451_v55 }
 0x101   :  { %v751_v59 = vld [vmem:[#allocation10 + $0x780] sm:$0xff]  ;;  %v6459_v1 = vcombine.high %v623_v57, %v627_v58  ;;  %2156 = vmatprep.subr.bf16.mxu0 %v6579_v56  ;;  %v6458_v5 = vcombine.low %v623_v57, %v627_v58 }
 0x102   :  { %v755_v60 = vld [vmem:[#allocation10 + $0x7a0] sm:$0xff] }
 0x103   :  { %v631_v62 = vld [vmem:[#allocation10 + $0x3c0] sm:$0xff]  ;;  %v6587_v4 = vcombine.high %v751_v59, %v755_v60  ;;  %2116 = vmatpush1.bf16.msra.mxu1 %v6450_v61  ;;  %2157 = vmatpush1.bf16.msra.mxu0 %v6578_v0  ;;  %v6586_v6 = vcombine.low %v751_v59, %v755_v60 }
 0x104   :  { %v635_v63 = vld [vmem:[#allocation10 + $0x3e0] sm:$0xff]  ;;  %2117 = vmatprep.subr.bf16.mxu1 %v6459_v1 }
 0x105   :  { %v759_v2 = vld [vmem:[#allocation10 + $0x7c0] sm:$0xff]  ;;  %v6467_v7 = vcombine.high %v631_v62, %v635_v63  ;;  %2158 = vmatprep.subr.bf16.mxu0 %v6587_v4  ;;  %v6466_v9 = vcombine.low %v631_v62, %v635_v63 }
 0x106   :  { %v763_v3 = vld [vmem:[#allocation10 + $0x7e0] sm:$0xff] }
 0x107   :  { %v6595_v8 = vcombine.high %v759_v2, %v763_v3  ;;  %2118 = vmatpush1.bf16.msra.mxu1 %v6458_v5  ;;  %2159 = vmatpush1.bf16.msra.mxu0 %v6586_v6  ;;  %v6594_v10 = vcombine.low %v759_v2, %v763_v3 }
 0x108   :  { %2119 = vmatprep.subr.bf16.mxu1 %v6467_v7 }
 0x109   :  { %2160 = vmatprep.subr.bf16.mxu0 %v6595_v8 }
 0x10b   :  { %2120 = vmatpush1.bf16.msra.mxu1 %v6466_v9  ;;  %2161 = vmatpush1.bf16.msra.mxu0 %v6594_v10 }
 0x10c   :  { %2171 = vmatprep.subr.bf16.mxu1 %v6349_v14  ;;  %2253 = vmatprep.subr.bf16.mxu0 %v6351_v18 }
 0x1a1   :  { %v282_v30 = vpop.f32.mrb[0].mxu0  ;;  %v323_v31 = vpop.f32.mrb[0].mxu1 }
 0x1a2   :  { %v283_v32 = vadd.f32 %v282_v30, %v187_v26  ;;  %v324_v33 = vadd.f32 %v323_v31, %v195_v27  ;;  %v284_v34 = vpop.f32.mrb[1].mxu0  ;;  %v325_v35 = vpop.f32.mrb[1].mxu1 }
 0x1a3   :  { %v285_v36 = vadd.f32 %v284_v34, %v191_v28  ;;  %v326_v37 = vadd.f32 %v325_v35, %v199_v29  ;;  %v286_v38 = vpop.f32.mrb[2].mxu0  ;;  %v327_v39 = vpop.f32.mrb[2].mxu1 }
 0x1a4   :  { %v333_v40 = vsel %vm332_vm1, %v283_v32, 0.0  ;;  %v347_v41 = vsel %vm332_vm1, %v324_v33, 0.0  ;;  %v287_v42 = vpop.f32.mrb[3].mxu0  ;;  %v328_v43 = vpop.f32.mrb[3].mxu1 }
 0x1a5   :  { %v334_v44 = vrot.slane %v333_v40, 4  ;;  %v348_v45 = vrot.slane %v347_v41, 4  ;;  %v340_v46 = vsel %vm332_vm1, %v285_v36, 0.0  ;;  %v354_v47 = vsel %vm332_vm1, %v326_v37, 0.0 }
 0x1a6   :  { %v341_v48 = vrot.slane %v340_v46, 4  ;;  %v355_v49 = vrot.slane %v354_v47, 4 }
 0x1a7   :  { %v335_v50 = vadd.f32 %v334_v44, %v333_v40  ;;  %v349_v51 = vadd.f32 %v348_v45, %v347_v41 }
 0x1a8   :  { %v342_v52 = vadd.f32 %v341_v48, %v340_v46  ;;  %v356_v53 = vadd.f32 %v355_v49, %v354_v47 }
 0x1a9   :  { %v336_v54 = vrot.slane %v335_v50, 2  ;;  %v350_v55 = vrot.slane %v349_v51, 2 }
 0x1aa   :  { %v343_v56 = vrot.slane %v342_v52, 2  ;;  %v357_v57 = vrot.slane %v356_v53, 2 }
 0x1ab   :  { %v337_v58 = vadd.f32 %v336_v54, %v335_v50  ;;  %v351_v59 = vadd.f32 %v350_v55, %v349_v51 }
 0x1ac   :  { %v344_v60 = vadd.f32 %v343_v56, %v342_v52  ;;  %v358_v61 = vadd.f32 %v357_v57, %v356_v53 }
 0x1ad   :  { %v338_v62 = vrot.slane %v337_v58, 1  ;;  %v352_v63 = vrot.slane %v351_v59, 1 }
 0x1ae   :  { %v345_v0 = vrot.slane %v344_v60, 1  ;;  %v359_v1 = vrot.slane %v358_v61, 1 }
 0x1af   :  { %v339_v2 = vadd.f32 %v338_v62, %v337_v58  ;;  %v353_v3 = vadd.f32 %v352_v63, %v351_v59 }
 0x1b0   :  { %v346_v4 = vadd.f32 %v345_v0, %v344_v60  ;;  %v360_v5 = vadd.f32 %v359_v1, %v358_v61  ;;  %v330_v1 = vld [vmem:[#allocation7] sm:$0xf] }
 0x1b1   :  { %v361_v6 = vmul.f32 0.5, %v339_v2  ;;  %v363_v7 = vmul.f32 0.5, %v353_v3  ;;  %v331_v2 = vld [vmem:[#allocation9] sm:$0xf]  ;;  %v421_v3 = vrot.slane %v330_v1, %v8416_v21 }
 0x1b2   :  { %v362_v8 = vmul.f32 0.5, %v346_v4  ;;  %v364_v9 = vmul.f32 0.5, %v360_v5  ;;  %v429_v5 = vrot.slane %v330_v1, %v8419_v22 }
 0x1b3   :  { %v365_v10 = vsub.f32 %v283_v32, %v361_v6  ;;  %v367_v14 = vsub.f32 %v324_v33, %v363_v7 }
 0x1b4   :  { %v366_v18 = vsub.f32 %v285_v36, %v362_v8  ;;  %v8435_v19 = vsub.f32 %v326_v37, %v364_v9  ;;  %v446_v8 = vrot.slane %v331_v2, %v8416_v21  ;;  %v425_v9 = vrot.slane %v330_v1, %v8422_v24 }
 0x1b5   :  { %v369_v23 = vmul.f32 %v365_v10, %v365_v10  ;;  %v371_v26 = vmul.f32 %v367_v14, %v367_v14 }
 0x1b6   :  { %v370_v27 = vmul.f32 %v366_v18, %v366_v18  ;;  %v372_v28 = vmul.f32 %v8435_v19, %v8435_v19 }
 0x1b7   :  { %v373_v29 = vsel %vm332_vm1, %v369_v23, 0.0  ;;  %v387_v30 = vsel %vm332_vm1, %v371_v26, 0.0 }
 0x1b8   :  { %v374_v31 = vrot.slane %v373_v29, 4  ;;  %v388_v34 = vrot.slane %v387_v30, 4  ;;  %v380_v35 = vsel %vm332_vm1, %v370_v27, 0.0  ;;  %v394_v32 = vsel %vm332_vm1, %v372_v28, 0.0 }
 0x1b9   :  { %v381_v33 = vrot.slane %v380_v35, 4  ;;  %v395_v36 = vrot.slane %v394_v32, 4  ;;  %v433_v27 = vrot.slane %v330_v1, %v8425_v25 }
 0x1ba   :  { %v375_v37 = vadd.f32 %v374_v31, %v373_v29  ;;  %v389_v38 = vadd.f32 %v388_v34, %v387_v30  ;;  %v450_v31 = vrot.slane %v331_v2, %v8422_v24 }
 0x1bb   :  { %v382_v39 = vadd.f32 %v381_v33, %v380_v35  ;;  %v396_v40 = vadd.f32 %v395_v36, %v394_v32  ;;  %v454_v35 = vrot.slane %v331_v2, %v8419_v22 }
 0x1bc   :  { %v376_v41 = vrot.slane %v375_v37, 2  ;;  %v390_v42 = vrot.slane %v389_v38, 2 }
 0x1bd   :  { %v383_v43 = vrot.slane %v382_v39, 2  ;;  %v397_v44 = vrot.slane %v396_v40, 2 }
 0x1be   :  { %v377_v45 = vadd.f32 %v376_v41, %v375_v37  ;;  %v391_v46 = vadd.f32 %v390_v42, %v389_v38 }
 0x1bf   :  { %v384_v47 = vadd.f32 %v383_v43, %v382_v39  ;;  %v398_v48 = vadd.f32 %v397_v44, %v396_v40 }
 0x1c0   :  { %v378_v49 = vrot.slane %v377_v45, 1  ;;  %v392_v50 = vrot.slane %v391_v46, 1 }
 0x1c1   :  { %v385_v51 = vrot.slane %v384_v47, 1  ;;  %v399_v52 = vrot.slane %v398_v48, 1 }
 0x1c2   :  { %v379_v53 = vadd.f32 %v378_v49, %v377_v45  ;;  %v393_v54 = vadd.f32 %v392_v50, %v391_v46 }
 0x1c3   :  { %v386_v55 = vadd.f32 %v385_v51, %v384_v47  ;;  %v400_v56 = vadd.f32 %v399_v52, %v398_v48 }
 0x1c4   :  { %v401_v57 = vmul.f32 0.5, %v379_v53  ;;  %v403_v58 = vmul.f32 0.5, %v393_v54 }
 0x1c5   :  { %v402_v59 = vmul.f32 0.5, %v386_v55  ;;  %v404_v60 = vmul.f32 0.5, %v400_v56 }
 0x1c6   :  { %v405_v61 = vadd.f32 1e-05, %v401_v57  ;;  %v407_v62 = vadd.f32 1e-05, %v403_v58 }
 0x1c7   :  { %v406_v63 = vadd.f32 1e-05, %v402_v59  ;;  %v408_v0 = vadd.f32 1e-05, %v404_v60 }
 0x1c8   :  { %7881 = vrsqrt.f32 %v405_v61 }
 0x1c9   :  { %7883 = vrsqrt.f32 %v407_v62 }
 0x1ca   :  { %7885 = vrsqrt.f32 %v406_v63 }
 0x1cb   :  { %7887 = vrsqrt.f32 %v408_v0 }
 0x1d2   :  { %v7882_v4 = vpop.eup %7881 }
 0x1d3   :  { %v7884_v6 = vpop.eup %7883  ;;  %v413_v7 = vmul.f32 %v7882_v4, %v365_v10  ;;  %v458_v10 = vrot.slane %v331_v2, %v8425_v25  ;;  %v520_v4 = vld [vmem:[#allocation10 + $0x48] sm:$0xff] }
 0x1d4   :  { %v7886_v23 = vpop.eup %7885  ;;  %v415_v26 = vmul.f32 %v7884_v6, %v367_v14 }
 0x1d5   :  { %v7888_v28 = vpop.eup %7887  ;;  %v438_v29 = vmul.f32 %v421_v3, %v413_v7  ;;  %v414_v30 = vmul.f32 %v7886_v23, %v366_v18  ;;  %v525_v23 = vld [vmem:[#allocation10 + $0x70] sm:$0xff] }
 0x1d6   :  { %v440_v34 = vmul.f32 %v429_v5, %v415_v26  ;;  %v416_v32 = vmul.f32 %v7888_v28, %v8435_v19  ;;  %v524_v5 = vld [vmem:[#allocation10 + $0x68] sm:$0xff] }
 0x1d7   :  { %v463_v33 = vadd.f32 %v446_v8, %v438_v29  ;;  %v439_v36 = vmul.f32 %v425_v9, %v414_v30  ;;  %v521_v9 = vld [vmem:[#allocation10 + $0x50] sm:$0xff]  ;;  %v6357_v29 = vcombine.high %v520_v4, %v524_v5  ;;  %v528_v30 = vld [vmem:[#allocation10 + $0x88] sm:$0xff] }
 0x1d8   :  { %v441_v37 = vmul.f32 %v433_v27, %v416_v32  ;;  %v465_v39 = vadd.f32 %v454_v35, %v440_v34  ;;  %v6359_v34 = vcombine.high %v521_v9, %v525_v23  ;;  %v529_v35 = vld [vmem:[#allocation10 + $0x90] sm:$0xff] }
 0x1d9   :  { %v464_v38 = vadd.f32 %v450_v31, %v439_v36  ;;  %v483_v41 = vmul.f32 1.442695, %v463_v33  ;;  %v471_v19 = vmul.f32 0.5, %v463_v33  ;;  %vm467_vm2 = vcmp.gt.f32.partialorder %v463_v33, -0.001  ;;  %v532_v31 = vld [vmem:[#allocation10 + $0xa8] sm:$0xff] }
 0x1da   :  { %v466_v14 = vadd.f32 %v458_v10, %v441_v37  ;;  %v487_v18 = vmul.f32 1.442695, %v465_v39  ;;  %v473_v45 = vmul.f32 0.5, %v465_v39  ;;  %vm469_vm4 = vcmp.gt.f32.partialorder %v465_v39, -0.001  ;;  %v533_v32 = vld [vmem:[#allocation10 + $0xb0] sm:$0xff] }
 0x1db   :  { %v485_v40 = vmul.f32 1.442695, %v464_v38  ;;  %v472_v44 = vmul.f32 0.5, %v464_v38  ;;  %v475_v49 = vmul.f32 %v471_v19, %v463_v33  ;;  %vm468_vm5 = vcmp.gt.f32.partialorder %v464_v38, -0.001  ;;  %v552_v19 = vld [vmem:[#allocation10 + $0x148] sm:$0xff] }
 0x1dc   :  { %v489_v42 = vmul.f32 1.442695, %v466_v14  ;;  %v474_v43 = vmul.f32 0.5, %v466_v14  ;;  %v477_v48 = vmul.f32 %v473_v45, %v465_v39  ;;  %vm470_vm3 = vcmp.gt.f32.partialorder %v466_v14, -0.001 }
 0x1dd   :  { %7889 = vpow2.f32 %v485_v40  ;;  %v476_v47 = vmul.f32 %v472_v44, %v464_v38  ;;  %vm502_vm6 = vcmp.gt.f32.partialorder %v466_v14, 0.0  ;;  %vm500_vm7 = vcmp.gt.f32.partialorder %v464_v38, 0.0  ;;  %v541_v40 = vld [vmem:[#allocation10 + $0xf0] sm:$0xff] }
 0x1de   :  { %7891 = vpow2.f32 %v489_v42  ;;  %v478_v46 = vmul.f32 %v474_v43, %v466_v14  ;;  %v481_v57 = vadd.f32 %v477_v48, %v465_v39  ;;  %v479_v60 = vadd.f32 %v475_v49, %v463_v33  ;;  %v549_v42 = vld [vmem:[#allocation10 + $0x130] sm:$0xff] }
 0x1df   :  { %7893 = vpow2.f32 %v483_v41  ;;  %v480_v53 = vadd.f32 %v476_v47, %v464_v38  ;;  %vm501_vm8 = vcmp.gt.f32.partialorder %v465_v39, 0.0  ;;  %vm499_vm9 = vcmp.gt.f32.partialorder %v463_v33, 0.0  ;;  %v545_v41 = vld [vmem:[#allocation10 + $0x110] sm:$0xff] }
 0x1e0   :  { %7895 = vpow2.f32 %v487_v18  ;;  %v482_v51 = vadd.f32 %v478_v46, %v466_v14  ;;  %v6356_v10 = vcombine.low %v520_v4, %v524_v5  ;;  %v6365_v36 = vcombine.high %v528_v30, %v532_v31  ;;  %v556_v46 = vld [vmem:[#allocation10 + $0x168] sm:$0xff]  ;;  %v553_v47 = vld [vmem:[#allocation10 + $0x150] sm:$0xff] }
 0x1e1   :  { %v6367_v37 = vcombine.high %v529_v35, %v533_v32  ;;  %v6364_v11 = vcombine.low %v528_v30, %v532_v31  ;;  %v6366_v12 = vcombine.low %v529_v35, %v533_v32  ;;  %v6383_v45 = vcombine.high %v545_v41, %v549_v42  ;;  %v557_v48 = vld [vmem:[#allocation10 + $0x170] sm:$0xff]  ;;  %v588_v35 = vld [vmem:[#allocation10 + $0x268] sm:$0xff] }
 0x1e2   :  { %v585_v32 = vld [vmem:[#allocation10 + $0x250] sm:$0xff] }
 0x1e7   :  { %v7890_v50 = vpop.eup %7889 }
 0x1e8   :  { %v7892_v52 = vpop.eup %7891  ;;  %v6343_v54 = vadd.f32 -1.0, %v7890_v50  ;;  %v6382_v50 = vcombine.low %v545_v41, %v549_v42  ;;  %v604_v41 = vld [vmem:[#allocation10 + $0x2e8] sm:$0xff]  ;;  %v601_v42 = vld [vmem:[#allocation10 + $0x2d0] sm:$0xff] }
 0x1e9   :  { %v7894_v55 = vpop.eup %7893  ;;  %v6345_v56 = vadd.f32 -1.0, %v7892_v52  ;;  %v6391_v52 = vcombine.high %v553_v47, %v557_v48 }
 0x1ea   :  { %v7896_v58 = vpop.eup %7895  ;;  %v496_v59 = vsel %vm468_vm5, %v480_v53, %v6343_v54  ;;  %v6342_v61 = vadd.f32 -1.0, %v7894_v55  ;;  %v560_v53 = vld [vmem:[#allocation10 + $0x188] sm:$0xff]  ;;  %v561_v55 = vld [vmem:[#allocation10 + $0x190] sm:$0xff] }
 0x1eb   :  { %v504_v62 = vsel %vm500_vm7, %v464_v38, %v496_v59  ;;  %v498_v63 = vsel %vm470_vm3, %v482_v51, %v6345_v56  ;;  %v6344_v0 = vadd.f32 -1.0, %v7896_v58  ;;  %v536_v38 = vld [vmem:[#allocation10 + $0xc8] sm:$0xff]  ;;  %v6389_v51 = vcombine.high %v552_v19, %v556_v46  ;;  %v565_v56 = vld [vmem:[#allocation10 + $0x1b0] sm:$0xff] }
 0x1ec   :  { %v8452_v1 = vpack.c.bf16 %v504_v62, %v504_v62  ;;  %v506_v2 = vsel %vm502_vm6, %v466_v14, %v498_v63  ;;  %v495_v3 = vsel %vm467_vm2, %v479_v60, %v6342_v61  ;;  %v537_v14 = vld [vmem:[#allocation10 + $0xd0] sm:$0xff]  ;;  %v564_v54 = vld [vmem:[#allocation10 + $0x1a8] sm:$0xff]  ;;  %v6390_v58 = vcombine.low %v553_v47, %v557_v48 }
 0x1ed   :  { %v8455_v6 = vpack.c.bf16 %v506_v2, %v506_v2  ;;  %v503_v7 = vsel %vm499_vm9, %v463_v33, %v495_v3  ;;  %v497_v8 = vsel %vm469_vm4, %v481_v57, %v6344_v0  ;;  %v6358_v33 = vcombine.low %v521_v9, %v525_v23  ;;  %v568_v61 = vld [vmem:[#allocation10 + $0x1c8] sm:$0xff]  ;;  %v569_v63 = vld [vmem:[#allocation10 + $0x1d0] sm:$0xff] }
 0x1ee   :  { %2121 = vmatprep.mubr.bf16.mxu1 %v8452_v1  ;;  %v8459_v26 = vpack.c.bf16 %v503_v7, %v503_v7  ;;  %v505_v27 = vsel %vm501_vm8, %v465_v39, %v497_v8  ;;  %v540_v39 = vld [vmem:[#allocation10 + $0xe8] sm:$0xff]  ;;  %v6375_v15 = vcombine.high %v537_v14, %v541_v40  ;;  %v6374_v43 = vcombine.low %v537_v14, %v541_v40  ;;  %v573_v0 = vld [vmem:[#allocation10 + $0x1f0] sm:$0xff] }
 0x1ef   :  { %2162 = vmatprep.mubr.bf16.mxu0 %v8455_v6  ;;  %v8462_v28 = vpack.c.bf16 %v505_v27, %v505_v27  ;;  %v6373_v13 = vcombine.high %v536_v38, %v540_v39  ;;  %v6372_v18 = vcombine.low %v536_v38, %v540_v39  ;;  %v6388_v57 = vcombine.low %v552_v19, %v556_v46  ;;  %v572_v62 = vld [vmem:[#allocation10 + $0x1e8] sm:$0xff]  ;;  %v577_v9 = vld [vmem:[#allocation10 + $0x210] sm:$0xff] }
 0x1f0   :  { %2122 = vmatmul.mubr.bf16.vlgmr.msra.gmra.mrb[4].mxu1 %v8459_v26  ;;  %v6397_v59 = vcombine.high %v560_v53, %v564_v54  ;;  %v6399_v60 = vcombine.high %v561_v55, %v565_v56  ;;  %v6396_v2 = vcombine.low %v560_v53, %v564_v54  ;;  %v6398_v3 = vcombine.low %v561_v55, %v565_v56  ;;  %v576_v7 = vld [vmem:[#allocation10 + $0x208] sm:$0xff]  ;;  %v581_v23 = vld [vmem:[#allocation10 + $0x230] sm:$0xff] }
 0x1f1   :  { %2163 = vmatmul.mubr.bf16.vlgmr.msra.gmra.mrb[4].mxu0 %v8462_v28  ;;  %2172 = vmatpush1.bf16.msra.mxu1 %v6348_v16  ;;  %v544_v16 = vld [vmem:[#allocation10 + $0x108] sm:$0xff]  ;;  %v6405_v4 = vcombine.high %v568_v61, %v572_v62  ;;  %v6407_v5 = vcombine.high %v569_v63, %v573_v0  ;;  %v6404_v27 = vcombine.low %v568_v61, %v572_v62  ;;  %v593_v40 = vld [vmem:[#allocation10 + $0x290] sm:$0xff] }
 0x1f2   :  { %2254 = vmatpush1.bf16.msra.mxu0 %v6350_v17  ;;  %2203 = vmatprep.mubr.bf16.mxu1 %v8452_v1  ;;  %v548_v17 = vld [vmem:[#allocation10 + $0x128] sm:$0xff]  ;;  %v6415_v31 = vcombine.high %v577_v9, %v581_v23  ;;  %v609_v48 = vld [vmem:[#allocation10 + $0x310] sm:$0xff] }
 0x1f3   :  { %2285 = vmatprep.mubr.bf16.mxu0 %v8452_v1  ;;  %2173 = vmatprep.subr.bf16.mxu1 %v6357_v29  ;;  %v6381_v44 = vcombine.high %v544_v16, %v548_v17  ;;  %v6380_v49 = vcombine.low %v544_v16, %v548_v17  ;;  %v580_v8 = vld [vmem:[#allocation10 + $0x228] sm:$0xff]  ;;  %v6406_v29 = vcombine.low %v569_v63, %v573_v0  ;;  %v617_v56 = vld [vmem:[#allocation10 + $0x350] sm:$0xff] }
 0x1f4   :  { %2255 = vmatprep.subr.bf16.mxu0 %v6359_v34  ;;  %v6413_v30 = vcombine.high %v576_v7, %v580_v8  ;;  %v584_v34 = vld [vmem:[#allocation10 + $0x248] sm:$0xff]  ;;  %v625_v0 = vld [vmem:[#allocation10 + $0x390] sm:$0xff] }
 0x1f5   :  { %2174 = vmatpush1.bf16.msra.mxu1 %v6356_v10  ;;  %v589_v10 = vld [vmem:[#allocation10 + $0x270] sm:$0xff]  ;;  %v592_v39 = vld [vmem:[#allocation10 + $0x288] sm:$0xff] }
 0x1f6   :  { %2256 = vmatpush1.bf16.msra.mxu0 %v6358_v33  ;;  %2175 = vmatprep.subr.bf16.mxu1 %v6365_v36  ;;  %v6412_v33 = vcombine.low %v576_v7, %v580_v8  ;;  %v6414_v36 = vcombine.low %v577_v9, %v581_v23  ;;  %v6423_v38 = vcombine.high %v585_v32, %v589_v10  ;;  %v596_v14 = vld [vmem:[#allocation10 + $0x2a8] sm:$0xff]  ;;  %v633_v23 = vld [vmem:[#allocation10 + $0x3d0] sm:$0xff] }
 0x1f7   :  { %2257 = vmatprep.subr.bf16.mxu0 %v6367_v37  ;;  %v6421_v37 = vcombine.high %v584_v34, %v588_v35  ;;  %v600_v17 = vld [vmem:[#allocation10 + $0x2c8] sm:$0xff] }
 0x1f8   :  { %v608_v46 = vld [vmem:[#allocation10 + $0x308] sm:$0xff] }
 0x1f9   :  { %2176 = vmatpush1.bf16.msra.mxu1 %v6364_v11  ;;  %v597_v11 = vld [vmem:[#allocation10 + $0x2b0] sm:$0xff]  ;;  %v612_v47 = vld [vmem:[#allocation10 + $0x328] sm:$0xff] }
 0x1fa   :  { %2258 = vmatpush1.bf16.msra.mxu0 %v6366_v12  ;;  %2177 = vmatprep.subr.bf16.mxu1 %v6373_v13  ;;  %v6420_v12 = vcombine.low %v584_v34, %v588_v35  ;;  %v6422_v13 = vcombine.low %v585_v32, %v589_v10  ;;  %v6431_v16 = vcombine.high %v593_v40, %v597_v11  ;;  %v616_v54 = vld [vmem:[#allocation10 + $0x348] sm:$0xff]  ;;  %v641_v10 = vld [vmem:[#allocation10 + $0x410] sm:$0xff] }
 0x1fb   :  { %2259 = vmatprep.subr.bf16.mxu0 %v6375_v15  ;;  %v6429_v15 = vcombine.high %v592_v39, %v596_v14  ;;  %v620_v55 = vld [vmem:[#allocation10 + $0x368] sm:$0xff] }
 0x1fc   :  { %v624_v62 = vld [vmem:[#allocation10 + $0x388] sm:$0xff] }
 0x1fd   :  { %2178 = vmatpush1.bf16.msra.mxu1 %v6372_v18  ;;  %v605_v18 = vld [vmem:[#allocation10 + $0x2f0] sm:$0xff]  ;;  %v628_v63 = vld [vmem:[#allocation10 + $0x3a8] sm:$0xff] }
 0x1fe   :  { %2260 = vmatpush1.bf16.msra.mxu0 %v6374_v43  ;;  %2179 = vmatprep.subr.bf16.mxu1 %v6381_v44  ;;  %v6428_v43 = vcombine.low %v592_v39, %v596_v14  ;;  %v6430_v44 = vcombine.low %v593_v40, %v597_v11  ;;  %v6439_v19 = vcombine.high %v601_v42, %v605_v18  ;;  %v632_v8 = vld [vmem:[#allocation10 + $0x3c8] sm:$0xff] }
 0x1ff   :  { %2261 = vmatprep.subr.bf16.mxu0 %v6383_v45  ;;  %v6437_v45 = vcombine.high %v600_v17, %v604_v41  ;;  %v636_v9 = vld [vmem:[#allocation10 + $0x3e8] sm:$0xff] }
 0x200   :  { %v640_v35 = vld [vmem:[#allocation10 + $0x408] sm:$0xff] }
 0x201   :  { %2180 = vmatpush1.bf16.msra.mxu1 %v6380_v49  ;;  %v613_v49 = vld [vmem:[#allocation10 + $0x330] sm:$0xff]  ;;  %v644_v32 = vld [vmem:[#allocation10 + $0x428] sm:$0xff] }
 0x202   :  { %2262 = vmatpush1.bf16.msra.mxu0 %v6382_v50  ;;  %2181 = vmatprep.subr.bf16.mxu1 %v6389_v51  ;;  %v6436_v50 = vcombine.low %v600_v17, %v604_v41  ;;  %v6438_v51 = vcombine.low %v601_v42, %v605_v18  ;;  %v6447_v53 = vcombine.high %v609_v48, %v613_v49  ;;  %v648_v14 = vld [vmem:[#allocation10 + $0x448] sm:$0xff]  ;;  %v657_v18 = vld [vmem:[#allocation10 + $0x490] sm:$0xff] }
 0x203   :  { %2263 = vmatprep.subr.bf16.mxu0 %v6391_v52  ;;  %v6445_v52 = vcombine.high %v608_v46, %v612_v47  ;;  %v652_v40 = vld [vmem:[#allocation10 + $0x468] sm:$0xff]  ;;  %v6476_v11 = vcombine.low %v640_v35, %v644_v32 }
 0x204   :  { %v656_v17 = vld [vmem:[#allocation10 + $0x488] sm:$0xff] }
 0x205   :  { %2182 = vmatpush1.bf16.msra.mxu1 %v6388_v57  ;;  %v621_v57 = vld [vmem:[#allocation10 + $0x370] sm:$0xff]  ;;  %v660_v41 = vld [vmem:[#allocation10 + $0x4a8] sm:$0xff] }
 0x206   :  { %2264 = vmatpush1.bf16.msra.mxu0 %v6390_v58  ;;  %2183 = vmatprep.subr.bf16.mxu1 %v6397_v59  ;;  %v6444_v58 = vcombine.low %v608_v46, %v612_v47  ;;  %v6446_v59 = vcombine.low %v609_v48, %v613_v49  ;;  %v6455_v61 = vcombine.high %v617_v56, %v621_v57  ;;  %v664_v47 = vld [vmem:[#allocation10 + $0x4c8] sm:$0xff]  ;;  %v665_v49 = vld [vmem:[#allocation10 + $0x4d0] sm:$0xff] }
 0x207   :  { %2265 = vmatprep.subr.bf16.mxu0 %v6399_v60  ;;  %v6453_v60 = vcombine.high %v616_v54, %v620_v55  ;;  %v668_v48 = vld [vmem:[#allocation10 + $0x4e8] sm:$0xff] }
 0x209   :  { %2184 = vmatpush1.bf16.msra.mxu1 %v6396_v2  ;;  %v629_v2 = vld [vmem:[#allocation10 + $0x3b0] sm:$0xff] }
 0x20a   :  { %2266 = vmatpush1.bf16.msra.mxu0 %v6398_v3  ;;  %2185 = vmatprep.subr.bf16.mxu1 %v6405_v4  ;;  %v6452_v3 = vcombine.low %v616_v54, %v620_v55  ;;  %v6454_v4 = vcombine.low %v617_v56, %v621_v57  ;;  %v6463_v7 = vcombine.high %v625_v0, %v629_v2  ;;  %v672_v55 = vld [vmem:[#allocation10 + $0x508] sm:$0xff]  ;;  %v673_v57 = vld [vmem:[#allocation10 + $0x510] sm:$0xff] }
 0x20b   :  { %2267 = vmatprep.subr.bf16.mxu0 %v6407_v5  ;;  %v6461_v5 = vcombine.high %v624_v62, %v628_v63  ;;  %v676_v56 = vld [vmem:[#allocation10 + $0x528] sm:$0xff] }
 0x20d   :  { %2186 = vmatpush1.bf16.msra.mxu1 %v6404_v27  ;;  %v637_v27 = vld [vmem:[#allocation10 + $0x3f0] sm:$0xff] }
 0x20e   :  { %2268 = vmatpush1.bf16.msra.mxu0 %v6406_v29  ;;  %2187 = vmatprep.subr.bf16.mxu1 %v6413_v30  ;;  %v6460_v29 = vcombine.low %v624_v62, %v628_v63  ;;  %v6462_v30 = vcombine.low %v625_v0, %v629_v2  ;;  %v6471_v34 = vcombine.high %v633_v23, %v637_v27  ;;  %v680_v63 = vld [vmem:[#allocation10 + $0x548] sm:$0xff]  ;;  %v681_v2 = vld [vmem:[#allocation10 + $0x550] sm:$0xff] }
 0x20f   :  { %2269 = vmatprep.subr.bf16.mxu0 %v6415_v31  ;;  %v6469_v31 = vcombine.high %v632_v8, %v636_v9  ;;  %v684_v0 = vld [vmem:[#allocation10 + $0x568] sm:$0xff] }
 0x211   :  { %2188 = vmatpush1.bf16.msra.mxu1 %v6412_v33  ;;  %v645_v33 = vld [vmem:[#allocation10 + $0x430] sm:$0xff] }
 0x212   :  { %2270 = vmatpush1.bf16.msra.mxu0 %v6414_v36  ;;  %2189 = vmatprep.subr.bf16.mxu1 %v6421_v37  ;;  %v6468_v36 = vcombine.low %v632_v8, %v636_v9  ;;  %v6470_v37 = vcombine.low %v633_v23, %v637_v27  ;;  %v6479_v39 = vcombine.high %v641_v10, %v645_v33  ;;  %v688_v9 = vld [vmem:[#allocation10 + $0x588] sm:$0xff]  ;;  %v689_v27 = vld [vmem:[#allocation10 + $0x590] sm:$0xff] }
 0x213   :  { %2271 = vmatprep.subr.bf16.mxu0 %v6423_v38  ;;  %v6477_v38 = vcombine.high %v640_v35, %v644_v32  ;;  %v692_v23 = vld [vmem:[#allocation10 + $0x5a8] sm:$0xff] }
 0x214   :  { %v696_v32 = vld [vmem:[#allocation10 + $0x5c8] sm:$0xff] }
 0x215   :  { %2190 = vmatpush1.bf16.msra.mxu1 %v6420_v12  ;;  %v649_v12 = vld [vmem:[#allocation10 + $0x450] sm:$0xff] }
 0x216   :  { %2272 = vmatpush1.bf16.msra.mxu0 %v6422_v13  ;;  %2191 = vmatprep.subr.bf16.mxu1 %v6429_v15  ;;  %v653_v13 = vld [vmem:[#allocation10 + $0x470] sm:$0xff]  ;;  %v6478_v15 = vcombine.low %v641_v10, %v645_v33  ;;  %v700_v10 = vld [vmem:[#allocation10 + $0x5e8] sm:$0xff] }
 0x217   :  { %2273 = vmatprep.subr.bf16.mxu0 %v6431_v16  ;;  %v6485_v16 = vcombine.high %v648_v14, %v652_v40  ;;  %v6487_v42 = vcombine.high %v649_v12, %v653_v13  ;;  %v697_v33 = vld [vmem:[#allocation10 + $0x5d0] sm:$0xff] }
 0x219   :  { %2192 = vmatpush1.bf16.msra.mxu1 %v6428_v43  ;;  %v661_v43 = vld [vmem:[#allocation10 + $0x4b0] sm:$0xff] }
 0x21a   :  { %2274 = vmatpush1.bf16.msra.mxu0 %v6430_v44  ;;  %2193 = vmatprep.subr.bf16.mxu1 %v6437_v45  ;;  %v6484_v44 = vcombine.low %v648_v14, %v652_v40  ;;  %v6486_v45 = vcombine.low %v649_v12, %v653_v13  ;;  %v6495_v46 = vcombine.high %v657_v18, %v661_v43  ;;  %v704_v40 = vld [vmem:[#allocation10 + $0x608] sm:$0xff]  ;;  %v705_v12 = vld [vmem:[#allocation10 + $0x610] sm:$0xff] }
 0x21b   :  { %2275 = vmatprep.subr.bf16.mxu0 %v6439_v19  ;;  %v6493_v19 = vcombine.high %v656_v17, %v660_v41  ;;  %v709_v13 = vld [vmem:[#allocation10 + $0x630] sm:$0xff] }
 0x21d   :  { %2194 = vmatpush1.bf16.msra.mxu1 %v6436_v50  ;;  %v669_v50 = vld [vmem:[#allocation10 + $0x4f0] sm:$0xff] }
 0x21e   :  { %2276 = vmatpush1.bf16.msra.mxu0 %v6438_v51  ;;  %2195 = vmatprep.subr.bf16.mxu1 %v6445_v52  ;;  %v6492_v51 = vcombine.low %v656_v17, %v660_v41  ;;  %v6494_v52 = vcombine.low %v657_v18, %v661_v43  ;;  %v6503_v54 = vcombine.high %v665_v49, %v669_v50  ;;  %v716_v18 = vld [vmem:[#allocation10 + $0x668] sm:$0xff]  ;;  %v713_v43 = vld [vmem:[#allocation10 + $0x650] sm:$0xff] }
 0x21f   :  { %2277 = vmatprep.subr.bf16.mxu0 %v6447_v53  ;;  %v6501_v53 = vcombine.high %v664_v47, %v668_v48  ;;  %v6543_v41 = vcombine.high %v705_v12, %v709_v13 }
 0x221   :  { %2196 = vmatpush1.bf16.msra.mxu1 %v6444_v58  ;;  %v677_v58 = vld [vmem:[#allocation10 + $0x530] sm:$0xff] }
 0x222   :  { %2278 = vmatpush1.bf16.msra.mxu0 %v6446_v59  ;;  %2197 = vmatprep.subr.bf16.mxu1 %v6453_v60  ;;  %v6500_v59 = vcombine.low %v664_v47, %v668_v48  ;;  %v6502_v60 = vcombine.low %v665_v49, %v669_v50  ;;  %v6511_v62 = vcombine.high %v673_v57, %v677_v58  ;;  %v720_v48 = vld [vmem:[#allocation10 + $0x688] sm:$0xff]  ;;  %v721_v50 = vld [vmem:[#allocation10 + $0x690] sm:$0xff] }
 0x223   :  { %2279 = vmatprep.subr.bf16.mxu0 %v6455_v61  ;;  %v6509_v61 = vcombine.high %v672_v55, %v676_v56  ;;  %v724_v49 = vld [vmem:[#allocation10 + $0x6a8] sm:$0xff] }
 0x225   :  { %2198 = vmatpush1.bf16.msra.mxu1 %v6452_v3  ;;  %v685_v3 = vld [vmem:[#allocation10 + $0x570] sm:$0xff] }
 0x226   :  { %2280 = vmatpush1.bf16.msra.mxu0 %v6454_v4  ;;  %2199 = vmatprep.subr.bf16.mxu1 %v6461_v5  ;;  %v6508_v4 = vcombine.low %v672_v55, %v676_v56  ;;  %v6510_v5 = vcombine.low %v673_v57, %v677_v58  ;;  %v6519_v8 = vcombine.high %v681_v2, %v685_v3  ;;  %v728_v56 = vld [vmem:[#allocation10 + $0x6c8] sm:$0xff]  ;;  %v729_v58 = vld [vmem:[#allocation10 + $0x6d0] sm:$0xff] }
 0x227   :  { %2281 = vmatprep.subr.bf16.mxu0 %v6463_v7  ;;  %v6517_v7 = vcombine.high %v680_v63, %v684_v0  ;;  %v732_v57 = vld [vmem:[#allocation10 + $0x6e8] sm:$0xff] }
 0x229   :  { %2200 = vmatpush1.bf16.msra.mxu1 %v6460_v29  ;;  %v693_v29 = vld [vmem:[#allocation10 + $0x5b0] sm:$0xff] }
 0x22a   :  { %2282 = vmatpush1.bf16.msra.mxu0 %v6462_v30  ;;  %2201 = vmatprep.subr.bf16.mxu1 %v6469_v31  ;;  %v6516_v30 = vcombine.low %v680_v63, %v684_v0  ;;  %v6518_v31 = vcombine.low %v681_v2, %v685_v3  ;;  %v6527_v35 = vcombine.high %v689_v27, %v693_v29  ;;  %v736_v0 = vld [vmem:[#allocation10 + $0x708] sm:$0xff]  ;;  %v737_v3 = vld [vmem:[#allocation10 + $0x710] sm:$0xff] }
 0x22b   :  { %2283 = vmatprep.subr.bf16.mxu0 %v6471_v34  ;;  %v6525_v34 = vcombine.high %v688_v9, %v692_v23  ;;  %v740_v2 = vld [vmem:[#allocation10 + $0x728] sm:$0xff] }
 0x22d   :  { %2202 = vmatpush1.bf16.msra.mxu1 %v6468_v36  ;;  %v701_v36 = vld [vmem:[#allocation10 + $0x5f0] sm:$0xff] }
 0x22e   :  { %2284 = vmatpush1.bf16.msra.mxu0 %v6470_v37  ;;  %2212 = vmatprep.subr.bf16.mxu1 %v6477_v38  ;;  %v6524_v37 = vcombine.low %v688_v9, %v692_v23  ;;  %v6526_v38 = vcombine.low %v689_v27, %v693_v29  ;;  %v6535_v14 = vcombine.high %v697_v33, %v701_v36  ;;  %v744_v23 = vld [vmem:[#allocation10 + $0x748] sm:$0xff]  ;;  %v745_v29 = vld [vmem:[#allocation10 + $0x750] sm:$0xff] }
 0x22f   :  { %2294 = vmatprep.subr.bf16.mxu0 %v6479_v39  ;;  %v6533_v39 = vcombine.high %v696_v32, %v700_v10  ;;  %v748_v27 = vld [vmem:[#allocation10 + $0x768] sm:$0xff] }
 0x230   :  { %2204 = vmatmul.mubr.bf16.vlgmr.msra.gmra.mrb[8].mxu1 %v8459_v26 }
 0x231   :  { %2286 = vmatmul.mubr.bf16.vlgmr.msra.gmra.mrb[8].mxu0 %v8459_v26  ;;  %2213 = vmatpush1.bf16.msra.mxu1 %v6476_v11  ;;  %v708_v11 = vld [vmem:[#allocation10 + $0x628] sm:$0xff] }
 0x232   :  { %2244 = vmatprep.mubr.bf16.mxu1 %v8455_v6  ;;  %2295 = vmatpush1.bf16.msra.mxu0 %v6478_v15  ;;  %v6532_v15 = vcombine.low %v696_v32, %v700_v10  ;;  %v6541_v17 = vcombine.high %v704_v40, %v708_v11  ;;  %v752_v10 = vld [vmem:[#allocation10 + $0x788] sm:$0xff] }
 0x233   :  { %2326 = vmatprep.mubr.bf16.mxu0 %v8455_v6  ;;  %2214 = vmatprep.subr.bf16.mxu1 %v6485_v16  ;;  %v6534_v16 = vcombine.low %v697_v33, %v701_v36  ;;  %v756_v33 = vld [vmem:[#allocation10 + $0x7a8] sm:$0xff]  ;;  %v753_v36 = vld [vmem:[#allocation10 + $0x790] sm:$0xff] }
 0x234   :  { %2296 = vmatprep.subr.bf16.mxu0 %v6487_v42  ;;  %v712_v42 = vld [vmem:[#allocation10 + $0x648] sm:$0xff] }
 0x235   :  { %2215 = vmatpush1.bf16.msra.mxu1 %v6484_v44  ;;  %v717_v44 = vld [vmem:[#allocation10 + $0x670] sm:$0xff] }
 0x236   :  { %2297 = vmatpush1.bf16.msra.mxu0 %v6486_v45  ;;  %2216 = vmatprep.subr.bf16.mxu1 %v6493_v19  ;;  %v6540_v45 = vcombine.low %v704_v40, %v708_v11  ;;  %v6542_v19 = vcombine.low %v705_v12, %v709_v13  ;;  %v6551_v47 = vcombine.high %v713_v43, %v717_v44  ;;  %v760_v11 = vld [vmem:[#allocation10 + $0x7c8] sm:$0xff]  ;;  %v761_v13 = vld [vmem:[#allocation10 + $0x7d0] sm:$0xff] }
 0x237   :  { %2298 = vmatprep.subr.bf16.mxu0 %v6495_v46  ;;  %v6549_v46 = vcombine.high %v712_v42, %v716_v18  ;;  %v764_v12 = vld [vmem:[#allocation10 + $0x7e8] sm:$0xff] }
 0x239   :  { %2217 = vmatpush1.bf16.msra.mxu1 %v6492_v51  ;;  %v725_v51 = vld [vmem:[#allocation10 + $0x6b0] sm:$0xff] }
 0x23a   :  { %2299 = vmatpush1.bf16.msra.mxu0 %v6494_v52  ;;  %2218 = vmatprep.subr.bf16.mxu1 %v6501_v53  ;;  %v6548_v52 = vcombine.low %v712_v42, %v716_v18  ;;  %v6550_v53 = vcombine.low %v713_v43, %v717_v44  ;;  %v6559_v55 = vcombine.high %v721_v50, %v725_v51  ;;  %v514_v18 = vld [vmem:[#allocation10 + $0x18] sm:$0xff] }
 0x23b   :  { %2300 = vmatprep.subr.bf16.mxu0 %v6503_v54  ;;  %v6557_v54 = vcombine.high %v720_v48, %v724_v49  ;;  %v518_v43 = vld [vmem:[#allocation10 + $0x38] sm:$0xff]  ;;  %v6596_v44 = vcombine.low %v760_v11, %v764_v12 }
 0x23d   :  { %2219 = vmatpush1.bf16.msra.mxu1 %v6500_v59  ;;  %v733_v59 = vld [vmem:[#allocation10 + $0x6f0] sm:$0xff] }
 0x23e   :  { %2301 = vmatpush1.bf16.msra.mxu0 %v6502_v60  ;;  %2220 = vmatprep.subr.bf16.mxu1 %v6509_v61  ;;  %v6556_v60 = vcombine.low %v720_v48, %v724_v49  ;;  %v6558_v61 = vcombine.low %v721_v50, %v725_v51  ;;  %v6567_v63 = vcombine.high %v729_v58, %v733_v59  ;;  %v7243_v48 = vld [vmem:[#allocation16 + $0x4] ss:$28 sps:$4 sm:$0xff]  }
 0x23f   :  { %2302 = vmatprep.subr.bf16.mxu0 %v6511_v62  ;;  %v6565_v62 = vcombine.high %v728_v56, %v732_v57  ;;  %v6352_v49 = vcombine.low %v514_v18, %v518_v43  ;;  %v530_v51 = vld [vmem:[#allocation10 + $0x98] sm:$0xff] }
 0x241   :  { %2221 = vmatpush1.bf16.msra.mxu1 %v6508_v4  ;;  %v741_v4 = vld [vmem:[#allocation10 + $0x730] sm:$0xff] }
 0x242   :  { %2303 = vmatpush1.bf16.msra.mxu0 %v6510_v5  ;;  %2222 = vmatprep.subr.bf16.mxu1 %v6517_v7  ;;  %v6564_v5 = vcombine.low %v728_v56, %v732_v57  ;;  %v6566_v7 = vcombine.low %v729_v58, %v733_v59  ;;  %v6575_v9 = vcombine.high %v737_v3, %v741_v4  ;;  %v538_v57 = vld [vmem:[#allocation10 + $0xd8] sm:$0xff]  ;;  %v7244_v59 = vld [vmem:[#allocation16 + $0x38] ss:$28 sps:$4 sm:$0xff]  }
 0x243   :  { %2304 = vmatprep.subr.bf16.mxu0 %v6519_v8  ;;  %v6573_v8 = vcombine.high %v736_v0, %v740_v2  ;;  %v542_v58 = vld [vmem:[#allocation10 + $0xf8] sm:$0xff] }
 0x245   :  { %2223 = vmatpush1.bf16.msra.mxu1 %v6516_v30  ;;  %v749_v30 = vld [vmem:[#allocation10 + $0x770] sm:$0xff] }
 0x246   :  { %2305 = vmatpush1.bf16.msra.mxu0 %v6518_v31  ;;  %2224 = vmatprep.subr.bf16.mxu1 %v6525_v34  ;;  %v6572_v31 = vcombine.low %v736_v0, %v740_v2  ;;  %v6574_v34 = vcombine.low %v737_v3, %v741_v4  ;;  %v6583_v32 = vcombine.high %v745_v29, %v749_v30  ;;  %v550_v0 = vld [vmem:[#allocation10 + $0x138] sm:$0xff]  ;;  %v7247_v2 = vld [vmem:[#allocation16 + $0x70] ss:$28 sps:$4 sm:$0xff]  }
 0x247   :  { %2306 = vmatprep.subr.bf16.mxu0 %v6527_v35  ;;  %v6581_v35 = vcombine.high %v744_v23, %v748_v27  ;;  %v7252_v3 = vld [vmem:[#allocation16 + $0xac] ss:$28 sps:$4 sm:$0xff]  }
 0x249   :  { %2225 = vmatpush1.bf16.msra.mxu1 %v6524_v37  ;;  %v757_v37 = vld [vmem:[#allocation10 + $0x7b0] sm:$0xff] }
 0x24a   :  { %2307 = vmatpush1.bf16.msra.mxu0 %v6526_v38  ;;  %2226 = vmatprep.subr.bf16.mxu1 %v6533_v39  ;;  %v6580_v38 = vcombine.low %v744_v23, %v748_v27  ;;  %v6582_v39 = vcombine.low %v745_v29, %v749_v30  ;;  %v6591_v40 = vcombine.high %v753_v36, %v757_v37  ;;  %v562_v29 = vld [vmem:[#allocation10 + $0x198] sm:$0xff] }
 0x24b   :  { %2308 = vmatprep.subr.bf16.mxu0 %v6535_v14  ;;  %v6589_v14 = vcombine.high %v752_v10, %v756_v33  ;;  %v566_v30 = vld [vmem:[#allocation10 + $0x1b8] sm:$0xff] }
 0x24d   :  { %2227 = vmatpush1.bf16.msra.mxu1 %v6532_v15  ;;  %v765_v15 = vld [vmem:[#allocation10 + $0x7f0] sm:$0xff] }
 0x24e   :  { %2309 = vmatpush1.bf16.msra.mxu0 %v6534_v16  ;;  %2228 = vmatprep.subr.bf16.mxu1 %v6541_v17  ;;  %v6588_v16 = vcombine.low %v752_v10, %v756_v33  ;;  %v6590_v17 = vcombine.low %v753_v36, %v757_v37  ;;  %v6599_v42 = vcombine.high %v761_v13, %v765_v15  ;;  %v570_v10 = vld [vmem:[#allocation10 + $0x1d8] sm:$0xff]  ;;  %v7256_v36 = vld [vmem:[#allocation16 + $0x118] ss:$28 sps:$4 sm:$0xff]  }
 0x24f   :  { %2310 = vmatprep.subr.bf16.mxu0 %v6543_v41  ;;  %v6597_v41 = vcombine.high %v760_v11, %v764_v12  ;;  %v574_v33 = vld [vmem:[#allocation10 + $0x1f8] sm:$0xff]  ;;  %v7261_v37 = vld [vmem:[#allocation16 + $0x154] ss:$28 sps:$4 sm:$0xff]   ;;  %v7264_v12 = vld [vmem:[#allocation16 + $0x18c] ss:$28 sps:$4 sm:$0xff]  }
 0x250   :  { %v7259_v11 = vld [vmem:[#allocation16 + $0x150] ss:$28 sps:$4 sm:$0xff]  }
 0x251   :  { %2229 = vmatpush1.bf16.msra.mxu1 %v6540_v45  ;;  %v6598_v45 = vcombine.low %v761_v13, %v765_v15  ;;  %v6408_v13 = vcombine.low %v570_v10, %v574_v33 }
 0x252   :  { %2311 = vmatpush1.bf16.msra.mxu0 %v6542_v19  ;;  %2230 = vmatprep.subr.bf16.mxu1 %v6549_v46  ;;  %v6353_v19 = vcombine.high %v514_v18, %v518_v43  ;;  %v522_v46 = vld [vmem:[#allocation10 + $0x58] sm:$0xff] }
 0x253   :  { %2312 = vmatprep.subr.bf16.mxu0 %v6551_v47  ;;  %v526_v47 = vld [vmem:[#allocation10 + $0x78] sm:$0xff] }
 0x254   :  { %v6361_v50 = vcombine.high %v522_v46, %v526_v47 }
 0x255   :  { %2231 = vmatpush1.bf16.msra.mxu1 %v6548_v52  ;;  %v534_v52 = vld [vmem:[#allocation10 + $0xb8] sm:$0xff] }
 0x256   :  { %2313 = vmatpush1.bf16.msra.mxu0 %v6550_v53  ;;  %2232 = vmatprep.subr.bf16.mxu1 %v6557_v54  ;;  %v7241_v53 = vld [vmem:[#allocation16] ss:$28 sps:$4 sm:$0xff]   ;;  %v6369_v56 = vcombine.high %v530_v51, %v534_v52 }
 0x257   :  { %2314 = vmatprep.subr.bf16.mxu0 %v6559_v55  ;;  %v7246_v54 = vld [vmem:[#allocation16 + $0x3c] ss:$28 sps:$4 sm:$0xff]   ;;  %v6360_v55 = vcombine.low %v522_v46, %v526_v47 }
 0x258   :  { %v7276_v46 = vld [vmem:[#allocation16 + $0x1fc] ss:$28 sps:$4 sm:$0xff]  }
 0x259   :  { %2233 = vmatpush1.bf16.msra.mxu1 %v6556_v60  ;;  %v7249_v60 = vld [vmem:[#allocation16 + $0x74] ss:$28 sps:$4 sm:$0xff]  }
 0x25a   :  { %2315 = vmatpush1.bf16.msra.mxu0 %v6558_v61  ;;  %2234 = vmatprep.subr.bf16.mxu1 %v6565_v62  ;;  %v6368_v61 = vcombine.low %v530_v51, %v534_v52  ;;  %v6377_v62 = vcombine.high %v538_v57, %v542_v58  ;;  %v7274_v51 = vld [vmem:[#allocation16 + $0x1f8] ss:$28 sps:$4 sm:$0xff]  }
 0x25b   :  { %2316 = vmatprep.subr.bf16.mxu0 %v6567_v63  ;;  %v546_v63 = vld [vmem:[#allocation10 + $0x118] sm:$0xff]  ;;  %v7282_v52 = vld [vmem:[#allocation16 + $0x234] ss:$28 sps:$4 sm:$0xff]  }
 0x25c   :  { %v6385_v4 = vcombine.high %v546_v63, %v550_v0  ;;  %v6384_v23 = vcombine.low %v546_v63, %v550_v0  ;;  %v7286_v63 = vld [vmem:[#allocation16 + $0x268] ss:$28 sps:$4 sm:$0xff]  }
 0x25d   :  { %2235 = vmatpush1.bf16.msra.mxu1 %v6564_v5  ;;  %v554_v5 = vld [vmem:[#allocation10 + $0x158] sm:$0xff] }
 0x25e   :  { %2317 = vmatpush1.bf16.msra.mxu0 %v6566_v7  ;;  %2236 = vmatprep.subr.bf16.mxu1 %v6573_v8  ;;  %v558_v7 = vld [vmem:[#allocation10 + $0x178] sm:$0xff] }
 0x25f   :  { %2318 = vmatprep.subr.bf16.mxu0 %v6575_v9  ;;  %v7250_v8 = vld [vmem:[#allocation16 + $0xa8] ss:$28 sps:$4 sm:$0xff]   ;;  %v6393_v27 = vcombine.high %v554_v5, %v558_v7 }
 0x260   :  { %v7255_v9 = vld [vmem:[#allocation16 + $0xe4] ss:$28 sps:$4 sm:$0xff]  }
 0x261   :  { %2237 = vmatpush1.bf16.msra.mxu1 %v6572_v31  ;;  %v7253_v31 = vld [vmem:[#allocation16 + $0xe0] ss:$28 sps:$4 sm:$0xff]  }
 0x262   :  { %2319 = vmatpush1.bf16.msra.mxu0 %v6574_v34  ;;  %2238 = vmatprep.subr.bf16.mxu1 %v6581_v35  ;;  %v7258_v34 = vld [vmem:[#allocation16 + $0x11c] ss:$28 sps:$4 sm:$0xff]   ;;  %v6392_v35 = vcombine.low %v554_v5, %v558_v7  ;;  %v7294_v0 = vld [vmem:[#allocation16 + $0x2a4] ss:$28 sps:$4 sm:$0xff]  }
 0x263   :  { %2320 = vmatprep.subr.bf16.mxu0 %v6583_v32  ;;  %v6401_v32 = vcombine.high %v562_v29, %v566_v30  ;;  %v7292_v5 = vld [vmem:[#allocation16 + $0x2a0] ss:$28 sps:$4 sm:$0xff]  }
 0x264   :  { %v7300_v7 = vld [vmem:[#allocation16 + $0x2dc] ss:$28 sps:$4 sm:$0xff]  }
 0x265   :  { %2239 = vmatpush1.bf16.msra.mxu1 %v6580_v38  ;;  %v6400_v38 = vcombine.low %v562_v29, %v566_v30  ;;  %v7298_v29 = vld [vmem:[#allocation16 + $0x2d8] ss:$28 sps:$4 sm:$0xff]  }
 0x266   :  { %2321 = vmatpush1.bf16.msra.mxu0 %v6582_v39  ;;  %2240 = vmatprep.subr.bf16.mxu1 %v6589_v14  ;;  %v6409_v39 = vcombine.high %v570_v10, %v574_v33  ;;  %v578_v14 = vld [vmem:[#allocation10 + $0x218] sm:$0xff]  ;;  %v7306_v30 = vld [vmem:[#allocation16 + $0x314] ss:$28 sps:$4 sm:$0xff]   ;;  %v7312_v33 = vld [vmem:[#allocation16 + $0x34c] ss:$28 sps:$4 sm:$0xff]  }
 0x267   :  { %2322 = vmatprep.subr.bf16.mxu0 %v6591_v40  ;;  %v582_v40 = vld [vmem:[#allocation10 + $0x238] sm:$0xff]  ;;  %v7304_v10 = vld [vmem:[#allocation16 + $0x310] ss:$28 sps:$4 sm:$0xff]  }
 0x268   :  { %v6417_v15 = vcombine.high %v578_v14, %v582_v40  ;;  %v6416_v18 = vcombine.low %v578_v14, %v582_v40  ;;  %v7310_v14 = vld [vmem:[#allocation16 + $0x348] ss:$28 sps:$4 sm:$0xff]  }
 0x269   :  { %2241 = vmatpush1.bf16.msra.mxu1 %v6588_v16  ;;  %v586_v16 = vld [vmem:[#allocation10 + $0x258] sm:$0xff] }
 0x26a   :  { %2323 = vmatpush1.bf16.msra.mxu0 %v6590_v17  ;;  %2242 = vmatprep.subr.bf16.mxu1 %v6597_v41  ;;  %v590_v17 = vld [vmem:[#allocation10 + $0x278] sm:$0xff] }
 0x26b   :  { %2324 = vmatprep.subr.bf16.mxu0 %v6599_v42  ;;  %v7262_v41 = vld [vmem:[#allocation16 + $0x188] ss:$28 sps:$4 sm:$0xff]   ;;  %v6425_v43 = vcombine.high %v586_v16, %v590_v17  ;;  %v6424_v47 = vcombine.low %v586_v16, %v590_v17 }
 0x26c   :  { %v7270_v42 = vld [vmem:[#allocation16 + $0x1c4] ss:$28 sps:$4 sm:$0xff]  }
 0x26d   :  { %2243 = vmatpush1.bf16.msra.mxu1 %v6596_v44  ;;  %v594_v44 = vld [vmem:[#allocation10 + $0x298] sm:$0xff] }
 0x26e   :  { %2325 = vmatpush1.bf16.msra.mxu0 %v6598_v45  ;;  %2335 = vmatprep.subr.bf16.mxu1 %v6353_v19  ;;  %v598_v45 = vld [vmem:[#allocation10 + $0x2b8] sm:$0xff] }
 0x26f   :  { %5626 = vmatprep.subr.bf16.mxu0 %v7243_v48  ;;  %v7268_v19 = vld [vmem:[#allocation16 + $0x1c0] ss:$28 sps:$4 sm:$0xff]   ;;  %v6433_v48 = vcombine.high %v594_v44, %v598_v45 }
 0x270   :  { %2245 = vmatmul.mubr.bf16.vlgmr.msra.gmra.mrb[8].mxu1 %v8462_v28  ;;  %v666_v17 = vld [vmem:[#allocation10 + $0x4d8] sm:$0xff] }
 0x271   :  { %2327 = vmatmul.mubr.bf16.vlgmr.msra.gmra.mrb[8].mxu0 %v8462_v28  ;;  %2336 = vmatpush1.bf16.msra.mxu1 %v6352_v49  ;;  %v602_v49 = vld [vmem:[#allocation10 + $0x2d8] sm:$0xff] }
 0x272   :  { %2367 = vmatprep.mubr.bf16.mxu1 %v8452_v1  ;;  %2337 = vmatprep.subr.bf16.mxu1 %v6361_v50  ;;  %v6376_v1 = vcombine.low %v538_v57, %v542_v58  ;;  %v606_v50 = vld [vmem:[#allocation10 + $0x2f8] sm:$0xff]  ;;  %v7280_v57 = vld [vmem:[#allocation16 + $0x230] ss:$28 sps:$4 sm:$0xff]  }
 0x273   :  { %5627 = vmatpush1.bf16.msra.mxu0 %v7241_v53  ;;  %v6432_v53 = vcombine.low %v594_v44, %v598_v45  ;;  %v7288_v58 = vld [vmem:[#allocation16 + $0x26c] ss:$28 sps:$4 sm:$0xff]   ;;  %v678_v44 = vld [vmem:[#allocation10 + $0x538] sm:$0xff] }
 0x274   :  { %5628 = vmatprep.subr.bf16.mxu0 %v7246_v54  ;;  %v6441_v54 = vcombine.high %v602_v49, %v606_v50 }
 0x275   :  { %2338 = vmatpush1.bf16.msra.mxu1 %v6360_v55  ;;  %v610_v55 = vld [vmem:[#allocation10 + $0x318] sm:$0xff] }
 0x276   :  { %2339 = vmatprep.subr.bf16.mxu1 %v6369_v56  ;;  %v614_v56 = vld [vmem:[#allocation10 + $0x338] sm:$0xff] }
 0x277   :  { %5629 = vmatpush1.bf16.msra.mxu0 %v7244_v59  ;;  %v6440_v59 = vcombine.low %v602_v49, %v606_v50  ;;  %v690_v49 = vld [vmem:[#allocation10 + $0x598] sm:$0xff] }
 0x278   :  { %5630 = vmatprep.subr.bf16.mxu0 %v7249_v60  ;;  %v6449_v60 = vcombine.high %v610_v55, %v614_v56  ;;  %v694_v50 = vld [vmem:[#allocation10 + $0x5b8] sm:$0xff] }
 0x279   :  { %2340 = vmatpush1.bf16.msra.mxu1 %v6368_v61  ;;  %v618_v61 = vld [vmem:[#allocation10 + $0x358] sm:$0xff] }
 0x27a   :  { %2341 = vmatprep.subr.bf16.mxu1 %v6377_v62  ;;  %v622_v62 = vld [vmem:[#allocation10 + $0x378] sm:$0xff] }
 0x27b   :  { %5631 = vmatpush1.bf16.msra.mxu0 %v7247_v2  ;;  %v6448_v2 = vcombine.low %v610_v55, %v614_v56  ;;  %v698_v56 = vld [vmem:[#allocation10 + $0x5d8] sm:$0xff] }
 0x27c   :  { %5632 = vmatprep.subr.bf16.mxu0 %v7252_v3  ;;  %v6457_v3 = vcombine.high %v618_v61, %v622_v62 }
 0x27d   :  { %2342 = vmatpush1.bf16.msra.mxu1 %v6376_v1  ;;  %v626_v1 = vld [vmem:[#allocation10 + $0x398] sm:$0xff] }
 0x27e   :  { %2343 = vmatprep.subr.bf16.mxu1 %v6385_v4  ;;  %v630_v4 = vld [vmem:[#allocation10 + $0x3b8] sm:$0xff] }
 0x27f   :  { %5633 = vmatpush1.bf16.msra.mxu0 %v7250_v8  ;;  %v6456_v8 = vcombine.low %v618_v61, %v622_v62 }
 0x280   :  { %5634 = vmatprep.subr.bf16.mxu0 %v7255_v9  ;;  %v6465_v9 = vcombine.high %v626_v1, %v630_v4 }
 0x281   :  { %2344 = vmatpush1.bf16.msra.mxu1 %v6384_v23  ;;  %v634_v23 = vld [vmem:[#allocation10 + $0x3d8] sm:$0xff] }
 0x282   :  { %2345 = vmatprep.subr.bf16.mxu1 %v6393_v27  ;;  %v638_v27 = vld [vmem:[#allocation10 + $0x3f8] sm:$0xff] }
 0x283   :  { %5635 = vmatpush1.bf16.msra.mxu0 %v7253_v31  ;;  %v6464_v31 = vcombine.low %v626_v1, %v630_v4 }
 0x284   :  { %5636 = vmatprep.subr.bf16.mxu0 %v7258_v34  ;;  %v6473_v34 = vcombine.high %v634_v23, %v638_v27 }
 0x285   :  { %2346 = vmatpush1.bf16.msra.mxu1 %v6392_v35  ;;  %v642_v35 = vld [vmem:[#allocation10 + $0x418] sm:$0xff] }
 0x286   :  { %2347 = vmatprep.subr.bf16.mxu1 %v6401_v32  ;;  %v646_v32 = vld [vmem:[#allocation10 + $0x438] sm:$0xff] }
 0x287   :  { %5637 = vmatpush1.bf16.msra.mxu0 %v7256_v36  ;;  %v6472_v36 = vcombine.low %v634_v23, %v638_v27  ;;  %v6480_v40 = vcombine.low %v642_v35, %v646_v32 }
 0x288   :  { %5638 = vmatprep.subr.bf16.mxu0 %v7261_v37  ;;  %v6481_v37 = vcombine.high %v642_v35, %v646_v32  ;;  %v714_v32 = vld [vmem:[#allocation10 + $0x658] sm:$0xff] }
 0x289   :  { %2348 = vmatpush1.bf16.msra.mxu1 %v6400_v38  ;;  %v650_v38 = vld [vmem:[#allocation10 + $0x458] sm:$0xff] }
 0x28a   :  { %2349 = vmatprep.subr.bf16.mxu1 %v6409_v39  ;;  %v654_v39 = vld [vmem:[#allocation10 + $0x478] sm:$0xff] }
 0x28b   :  { %5639 = vmatpush1.bf16.msra.mxu0 %v7259_v11  ;;  %v6489_v11 = vcombine.high %v650_v38, %v654_v39 }
 0x28c   :  { %5640 = vmatprep.subr.bf16.mxu0 %v7264_v12  ;;  %v658_v12 = vld [vmem:[#allocation10 + $0x498] sm:$0xff] }
 0x28d   :  { %2350 = vmatpush1.bf16.msra.mxu1 %v6408_v13  ;;  %v662_v13 = vld [vmem:[#allocation10 + $0x4b8] sm:$0xff] }
 0x28e   :  { %2351 = vmatprep.subr.bf16.mxu1 %v6417_v15  ;;  %v6488_v15 = vcombine.low %v650_v38, %v654_v39  ;;  %v6497_v16 = vcombine.high %v658_v12, %v662_v13 }
 0x28f   :  { %5641 = vmatpush1.bf16.msra.mxu0 %v7262_v41  ;;  %v670_v41 = vld [vmem:[#allocation10 + $0x4f8] sm:$0xff] }
 0x290   :  { %5642 = vmatprep.subr.bf16.mxu0 %v7270_v42  ;;  %v6496_v42 = vcombine.low %v658_v12, %v662_v13  ;;  %v6504_v45 = vcombine.low %v666_v17, %v670_v41  ;;  %v7339_v12 = vld [vmem:[#allocation16 + $0x384] ss:$28 sps:$4 sm:$0xff]  }
 0x291   :  { %2352 = vmatpush1.bf16.msra.mxu1 %v6416_v18  ;;  %v6505_v18 = vcombine.high %v666_v17, %v670_v41 }
 0x292   :  { %2353 = vmatprep.subr.bf16.mxu1 %v6425_v43  ;;  %v674_v43 = vld [vmem:[#allocation10 + $0x518] sm:$0xff] }
 0x293   :  { %5643 = vmatpush1.bf16.msra.mxu0 %v7268_v19  ;;  %v6513_v19 = vcombine.high %v674_v43, %v678_v44 }
 0x294   :  { %5644 = vmatprep.subr.bf16.mxu0 %v7276_v46  ;;  %v682_v46 = vld [vmem:[#allocation10 + $0x558] sm:$0xff] }
 0x295   :  { %2354 = vmatpush1.bf16.msra.mxu1 %v6424_v47  ;;  %v6512_v47 = vcombine.low %v674_v43, %v678_v44  ;;  %v734_v43 = vld [vmem:[#allocation10 + $0x6f8] sm:$0xff] }
 0x296   :  { %2355 = vmatprep.subr.bf16.mxu1 %v6433_v48 }
 0x297   :  { %5645 = vmatpush1.bf16.msra.mxu0 %v7274_v51 }
 0x298   :  { %5646 = vmatprep.subr.bf16.mxu0 %v7282_v52 }
 0x299   :  { %2356 = vmatpush1.bf16.msra.mxu1 %v6432_v53 }
 0x29a   :  { %2357 = vmatprep.subr.bf16.mxu1 %v6441_v54  ;;  %v6529_v54 = vcombine.high %v690_v49, %v694_v50 }
 0x29b   :  { %5647 = vmatpush1.bf16.msra.mxu0 %v7280_v57  ;;  %v702_v57 = vld [vmem:[#allocation10 + $0x5f8] sm:$0xff] }
 0x29c   :  { %5648 = vmatprep.subr.bf16.mxu0 %v7288_v58  ;;  %v6537_v4 = vcombine.high %v698_v56, %v702_v57 }
 0x29d   :  { %2358 = vmatpush1.bf16.msra.mxu1 %v6440_v59 }
 0x29e   :  { %2359 = vmatprep.subr.bf16.mxu1 %v6449_v60 }
 0x29f   :  { %5649 = vmatpush1.bf16.msra.mxu0 %v7286_v63 }
 0x2a0   :  { %5650 = vmatprep.subr.bf16.mxu0 %v7294_v0  ;;  %v6528_v0 = vcombine.low %v690_v49, %v694_v50  ;;  %v742_v49 = vld [vmem:[#allocation10 + $0x738] sm:$0xff] }
 0x2a1   :  { %2360 = vmatpush1.bf16.msra.mxu1 %v6448_v2 }
 0x2a2   :  { %2361 = vmatprep.subr.bf16.mxu1 %v6457_v3 }
 0x2a3   :  { %5651 = vmatpush1.bf16.msra.mxu0 %v7292_v5 }
 0x2a4   :  { %5652 = vmatprep.subr.bf16.mxu0 %v7300_v7 }
 0x2a5   :  { %2362 = vmatpush1.bf16.msra.mxu1 %v6456_v8  ;;  %v706_v8 = vld [vmem:[#allocation10 + $0x618] sm:$0xff] }
 0x2a6   :  { %2363 = vmatprep.subr.bf16.mxu1 %v6465_v9  ;;  %v710_v9 = vld [vmem:[#allocation10 + $0x638] sm:$0xff] }
 0x2a7   :  { %5653 = vmatpush1.bf16.msra.mxu0 %v7298_v29 }
 0x2a8   :  { %5654 = vmatprep.subr.bf16.mxu0 %v7306_v30  ;;  %v6536_v30 = vcombine.low %v698_v56, %v702_v57  ;;  %v746_v56 = vld [vmem:[#allocation10 + $0x758] sm:$0xff] }
 0x2a9   :  { %2364 = vmatpush1.bf16.msra.mxu1 %v6464_v31  ;;  %v750_v57 = vld [vmem:[#allocation10 + $0x778] sm:$0xff] }
 0x2aa   :  { %2365 = vmatprep.subr.bf16.mxu1 %v6473_v34  ;;  %v6545_v34 = vcombine.high %v706_v8, %v710_v9 }
 0x2ab   :  { %5655 = vmatpush1.bf16.msra.mxu0 %v7304_v10  ;;  %v718_v10 = vld [vmem:[#allocation10 + $0x678] sm:$0xff] }
 0x2ac   :  { %5656 = vmatprep.subr.bf16.mxu0 %v7312_v33  ;;  %v6553_v39 = vcombine.high %v714_v32, %v718_v10 }
 0x2ad   :  { %2366 = vmatpush1.bf16.msra.mxu1 %v6472_v36 }
 0x2ae   :  { %2376 = vmatprep.subr.bf16.mxu1 %v6481_v37  ;;  %v6544_v37 = vcombine.low %v706_v8, %v710_v9 }
 0x2af   :  { %5657 = vmatpush1.bf16.msra.mxu0 %v7310_v14 }
 0x2b0   :  { %2368 = vmatmul.mubr.bf16.vlgmr.msra.gmra.mrb[12].mxu1 %v8459_v26  ;;  %v686_v26 = vld [vmem:[#allocation10 + $0x578] sm:$0xff]  ;;  %5667 = vmatprep.subr.bf16.mxu0 %v7339_v12  ;;  %v8502_v12 = vld [vmem:[#allocation13] sm:$0xff] }
 0x2b1   :  { %2377 = vmatpush1.bf16.msra.mxu1 %v6480_v40  ;;  %2408 = vmatprep.mubr.bf16.mxu1 %v8455_v6  ;;  %v8483_v6 = vld [vmem:[#allocation12] sm:$0xff]  ;;  %v6521_v48 = vcombine.high %v682_v46, %v686_v26  ;;  %v6520_v52 = vcombine.low %v682_v46, %v686_v26  ;;  %v722_v40 = vld [vmem:[#allocation10 + $0x698] sm:$0xff] }
 0x2b2   :  { %2378 = vmatprep.subr.bf16.mxu1 %v6489_v11  ;;  %v772_v51 = vrot.slane %v8483_v6, %v8416_v21  ;;  %v776_v53 = vrot.slane %v8483_v6, %v8422_v24  ;;  %v726_v11 = vld [vmem:[#allocation10 + $0x6b8] sm:$0xff] }
 0x2b3   :  { %v6561_v41 = vcombine.high %v722_v40, %v726_v11 }
 0x2b5   :  { %2379 = vmatpush1.bf16.msra.mxu1 %v6488_v15 }
 0x2b6   :  { %2380 = vmatprep.subr.bf16.mxu1 %v6497_v16  ;;  %v6552_v16 = vcombine.low %v714_v32, %v718_v10 }
 0x2b9   :  { %2381 = vmatpush1.bf16.msra.mxu1 %v6496_v42 }
 0x2ba   :  { %2382 = vmatprep.subr.bf16.mxu1 %v6505_v18  ;;  %v730_v18 = vld [vmem:[#allocation10 + $0x6d8] sm:$0xff] }
 0x2bb   :  { %v6569_v26 = vcombine.high %v730_v18, %v734_v43 }
 0x2bd   :  { %2383 = vmatpush1.bf16.msra.mxu1 %v6504_v45 }
 0x2be   :  { %2384 = vmatprep.subr.bf16.mxu1 %v6513_v19  ;;  %v6560_v19 = vcombine.low %v722_v40, %v726_v11  ;;  %v7273_v40 = vld [vmem:[#allocation16 + $0x44] ss:$28 sps:$4 sm:$0xff]  }
 0x2bf   :  { %v7271_v11 = vld [vmem:[#allocation16 + $0x40] ss:$28 sps:$4 sm:$0xff]  }
 0x2c1   :  { %2385 = vmatpush1.bf16.msra.mxu1 %v6512_v47 }
 0x2c2   :  { %2386 = vmatprep.subr.bf16.mxu1 %v6521_v48  ;;  %v738_v48 = vld [vmem:[#allocation10 + $0x718] sm:$0xff] }
 0x2c3   :  { %v2123_v55 = vpop.f32.mrb[4].mxu1 }
 0x2c4   :  { %v2124_v58 = vadd.f32 %v2123_v55, %v772_v51  ;;  %v2164_v59 = vpop.f32.mrb[4].mxu0  ;;  %v2125_v60 = vpop.f32.mrb[5].mxu1 }
 0x2c5   :  { %v2126_v61 = vadd.f32 %v2125_v60, %v776_v53  ;;  %v2166_v62 = vpop.f32.mrb[5].mxu0  ;;  %2387 = vmatpush1.bf16.msra.mxu1 %v6520_v52  ;;  %v2127_v63 = vpop.f32.mrb[6].mxu1  ;;  %v6568_v52 = vcombine.low %v730_v18, %v734_v43  ;;  %v7285_v18 = vld [vmem:[#allocation16 + $0xb4] ss:$28 sps:$4 sm:$0xff]  }
 0x2c6   :  { %v2165_v2 = vadd.f32 %v2164_v59, %v2124_v58  ;;  %v2168_v3 = vpop.f32.mrb[6].mxu0  ;;  %v2128_v1 = vpop.f32.mrb[7].mxu1  ;;  %2388 = vmatprep.subr.bf16.mxu1 %v6529_v54  ;;  %v6577_v54 = vcombine.high %v738_v48, %v742_v49  ;;  %v6585_v63 = vcombine.high %v746_v56, %v750_v57 }
 0x2c7   :  { %v2167_v5 = vadd.f32 %v2166_v62, %v2126_v61  ;;  %v2169_v7 = vpop.f32.mrb[7].mxu0  ;;  %v6576_v61 = vcombine.low %v738_v48, %v742_v49  ;;  %v758_v3 = vld [vmem:[#allocation10 + $0x7b8] sm:$0xff]  ;;  %v7291_v49 = vld [vmem:[#allocation16 + $0xec] ss:$28 sps:$4 sm:$0xff]  }
 0x2c8   :  { %v2419_v23 = vsel %vm332_vm1, %v2165_v2, 0.0 }
 0x2c9   :  { %v2420_v27 = vrot.slane %v2419_v23, 4  ;;  %v2426_v29 = vsel %vm332_vm1, %v2167_v5, 0.0  ;;  %2389 = vmatpush1.bf16.msra.mxu1 %v6528_v0 }
 0x2ca   :  { %v2427_v31 = vrot.slane %v2426_v29, 4  ;;  %2390 = vmatprep.subr.bf16.mxu1 %v6537_v4 }
 0x2cb   :  { %v2421_v35 = vadd.f32 %v2420_v27, %v2419_v23  ;;  %v762_v23 = vld [vmem:[#allocation10 + $0x7d8] sm:$0xff] }
 0x2cc   :  { %v2428_v33 = vadd.f32 %v2427_v31, %v2426_v29  ;;  %v766_v27 = vld [vmem:[#allocation10 + $0x7f8] sm:$0xff] }
 0x2cd   :  { %v2422_v36 = vrot.slane %v2421_v35, 2  ;;  %2391 = vmatpush1.bf16.msra.mxu1 %v6536_v30 }
 0x2ce   :  { %v2429_v38 = vrot.slane %v2428_v33, 2  ;;  %2392 = vmatprep.subr.bf16.mxu1 %v6545_v34 }
 0x2cf   :  { %v2423_v14 = vadd.f32 %v2422_v36, %v2421_v35  ;;  %v6601_v35 = vcombine.high %v762_v23, %v766_v27  ;;  %v6600_v36 = vcombine.low %v762_v23, %v766_v27 }
 0x2d0   :  { %v2430_v13 = vadd.f32 %v2429_v38, %v2428_v33  ;;  %v7267_v38 = vld [vmem:[#allocation16 + $0xc] ss:$28 sps:$4 sm:$0xff]  }
 0x2d1   :  { %v2424_v15 = vrot.slane %v2423_v14, 1  ;;  %2393 = vmatpush1.bf16.msra.mxu1 %v6544_v37 }
 0x2d2   :  { %v2431_v17 = vrot.slane %v2430_v13, 1  ;;  %2394 = vmatprep.subr.bf16.mxu1 %v6553_v39 }
 0x2d3   :  { %v2425_v42 = vadd.f32 %v2424_v15, %v2423_v14  ;;  %v7265_v14 = vld [vmem:[#allocation16 + $0x8] ss:$28 sps:$4 sm:$0xff]   ;;  %v8504_v15 = vld [vmem:[#allocation15] sm:$0xff] }
 0x2d4   :  { %v2432_v44 = vadd.f32 %v2431_v17, %v2430_v13  ;;  %v7279_v13 = vld [vmem:[#allocation16 + $0x7c] ss:$28 sps:$4 sm:$0xff]  }
 0x2d5   :  { %v2475_v45 = vmul.f32 0.5, %v2425_v42  ;;  %2395 = vmatpush1.bf16.msra.mxu1 %v6552_v16  ;;  %v2591_v16 = vrot.slane %v8502_v12, %v8416_v21  ;;  %v7277_v17 = vld [vmem:[#allocation16 + $0x78] ss:$28 sps:$4 sm:$0xff]   ;;  %v2595_v42 = vrot.slane %v8502_v12, %v8422_v24 }
 0x2d6   :  { %v2476_v46 = vmul.f32 0.5, %v2432_v44  ;;  %2396 = vmatprep.subr.bf16.mxu1 %v6561_v41  ;;  %v2640_v44 = vrot.slane %v8504_v15, %v8416_v21 }
 0x2d7   :  { %v8491_v47 = vsub.f32 %v2165_v2, %v2475_v45  ;;  %v754_v2 = vld [vmem:[#allocation10 + $0x798] sm:$0xff] }
 0x2d8   :  { %v8493_v50 = vsub.f32 %v2167_v5, %v2476_v46  ;;  %v6584_v5 = vcombine.low %v746_v56, %v750_v57  ;;  %v6593_v8 = vcombine.high %v754_v2, %v758_v3  ;;  %v6592_v31 = vcombine.low %v754_v2, %v758_v3  ;;  %v7303_v56 = vld [vmem:[#allocation16 + $0x15c] ss:$28 sps:$4 sm:$0xff]   ;;  %v7315_v3 = vld [vmem:[#allocation16 + $0x1cc] ss:$28 sps:$4 sm:$0xff]  }
 0x2d9   :  { %v2491_v51 = vmul.f32 %v8491_v47, %v8491_v47  ;;  %2397 = vmatpush1.bf16.msra.mxu1 %v6560_v19  ;;  %v2644_v19 = vrot.slane %v8504_v15, %v8422_v24 }
 0x2da   :  { %v2492_v53 = vmul.f32 %v8493_v50, %v8493_v50  ;;  %2398 = vmatprep.subr.bf16.mxu1 %v6569_v26  ;;  %v7283_v26 = vld [vmem:[#allocation16 + $0xb0] ss:$28 sps:$4 sm:$0xff]  }
 0x2db   :  { %v2499_v55 = vsel %vm332_vm1, %v2491_v51, 0.0 }
 0x2dc   :  { %v2500_v58 = vrot.slane %v2499_v55, 4  ;;  %v2506_v59 = vsel %vm332_vm1, %v2492_v53, 0.0  ;;  %v7289_v53 = vld [vmem:[#allocation16 + $0xe8] ss:$28 sps:$4 sm:$0xff]  }
 0x2dd   :  { %v2507_v60 = vrot.slane %v2506_v59, 4  ;;  %2399 = vmatpush1.bf16.msra.mxu1 %v6568_v52 }
 0x2de   :  { %v2501_v62 = vadd.f32 %v2500_v58, %v2499_v55  ;;  %2400 = vmatprep.subr.bf16.mxu1 %v6577_v54 }
 0x2df   :  { %v2508_v0 = vadd.f32 %v2507_v60, %v2506_v59  ;;  %v7301_v59 = vld [vmem:[#allocation16 + $0x158] ss:$28 sps:$4 sm:$0xff]  }
 0x2e0   :  { %v2502_v1 = vrot.slane %v2501_v62, 2  ;;  %v7309_v60 = vld [vmem:[#allocation16 + $0x194] ss:$28 sps:$4 sm:$0xff]  }
 0x2e1   :  { %v2509_v4 = vrot.slane %v2508_v0, 2  ;;  %2401 = vmatpush1.bf16.msra.mxu1 %v6576_v61 }
 0x2e2   :  { %v2503_v7 = vadd.f32 %v2502_v1, %v2501_v62  ;;  %2402 = vmatprep.subr.bf16.mxu1 %v6585_v63 }
 0x2e3   :  { %v2510_v9 = vadd.f32 %v2509_v4, %v2508_v0  ;;  %v7307_v0 = vld [vmem:[#allocation16 + $0x190] ss:$28 sps:$4 sm:$0xff]  }
 0x2e4   :  { %v2504_v29 = vrot.slane %v2503_v7, 1 }
 0x2e5   :  { %v2511_v30 = vrot.slane %v2510_v9, 1  ;;  %2403 = vmatpush1.bf16.msra.mxu1 %v6584_v5 }
 0x2e6   :  { %v2505_v34 = vadd.f32 %v2504_v29, %v2503_v7  ;;  %2404 = vmatprep.subr.bf16.mxu1 %v6593_v8 }
 0x2e7   :  { %v2512_v32 = vadd.f32 %v2511_v30, %v2510_v9  ;;  %v7313_v9 = vld [vmem:[#allocation16 + $0x1c8] ss:$28 sps:$4 sm:$0xff]  }
 0x2e8   :  { %v2555_v10 = vmul.f32 0.5, %v2505_v34  ;;  %v7337_v34 = vld [vmem:[#allocation16 + $0x380] ss:$28 sps:$4 sm:$0xff]  }
 0x2e9   :  { %v2556_v33 = vmul.f32 0.5, %v2512_v32  ;;  %2405 = vmatpush1.bf16.msra.mxu1 %v6592_v31  ;;  %v7318_v31 = vld [vmem:[#allocation16 + $0x204] ss:$28 sps:$4 sm:$0xff]   ;;  %v7345_v32 = vld [vmem:[#allocation16 + $0x3bc] ss:$28 sps:$4 sm:$0xff]  }
 0x2ea   :  { %v2563_v37 = vadd.f32 1e-05, %v2555_v10  ;;  %2406 = vmatprep.subr.bf16.mxu1 %v6601_v35  ;;  %v7316_v10 = vld [vmem:[#allocation16 + $0x200] ss:$28 sps:$4 sm:$0xff]  }
 0x2eb   :  { %v2564_v39 = vadd.f32 1e-05, %v2556_v33  ;;  %v7321_v33 = vld [vmem:[#allocation16 + $0x23c] ss:$28 sps:$4 sm:$0xff]  }
 0x2ec   :  { %7897 = vrsqrt.f32 %v2563_v37  ;;  %v7351_v37 = vld [vmem:[#allocation16 + $0x3f4] ss:$28 sps:$4 sm:$0xff]  }
 0x2ed   :  { %7899 = vrsqrt.f32 %v2564_v39  ;;  %2407 = vmatpush1.bf16.msra.mxu1 %v6600_v36  ;;  %v7343_v36 = vld [vmem:[#allocation16 + $0x3b8] ss:$28 sps:$4 sm:$0xff]  }
 0x2ee   :  { %5790 = vmatprep.subr.bf16.mxu1 %v7267_v38  ;;  %v7319_v38 = vld [vmem:[#allocation16 + $0x238] ss:$28 sps:$4 sm:$0xff]  }
 0x2ef   :  { %v7324_v39 = vld [vmem:[#allocation16 + $0x274] ss:$28 sps:$4 sm:$0xff]  }
 0x2f0   :  { %2409 = vmatmul.mubr.bf16.vlgmr.msra.gmra.mrb[12].mxu1 %v8462_v28 }
 0x2f1   :  { %5791 = vmatpush1.bf16.msra.mxu1 %v7265_v14  ;;  %v7349_v14 = vld [vmem:[#allocation16 + $0x3f0] ss:$28 sps:$4 sm:$0xff]  }
 0x2f2   :  { %5792 = vmatprep.subr.bf16.mxu1 %v7273_v40  ;;  %v7357_v40 = vld [vmem:[#allocation16 + $0x42c] ss:$28 sps:$4 sm:$0xff]  }
 0x2f5   :  { %5793 = vmatpush1.bf16.msra.mxu1 %v7271_v11  ;;  %v7322_v11 = vld [vmem:[#allocation16 + $0x270] ss:$28 sps:$4 sm:$0xff]  }
 0x2f6   :  { %v7898_v41 = vpop.eup %7897  ;;  %5794 = vmatprep.subr.bf16.mxu1 %v7279_v13  ;;  %v7327_v13 = vld [vmem:[#allocation16 + $0x2ac] ss:$28 sps:$4 sm:$0xff]  }
 0x2f7   :  { %v7900_v28 = vpop.eup %7899  ;;  %v2579_v43 = vmul.f32 %v7898_v41, %v8491_v47  ;;  %v7297_v47 = vld [vmem:[#allocation16 + $0x124] ss:$28 sps:$4 sm:$0xff]  }
 0x2f8   :  { %v2580_v45 = vmul.f32 %v7900_v28, %v8493_v50  ;;  %v7295_v50 = vld [vmem:[#allocation16 + $0x120] ss:$28 sps:$4 sm:$0xff]   ;;  %v7325_v41 = vld [vmem:[#allocation16 + $0x2a8] ss:$28 sps:$4 sm:$0xff]  }
 0x2f9   :  { %v2628_v46 = vmul.f32 %v2591_v16, %v2579_v43  ;;  %5795 = vmatpush1.bf16.msra.mxu1 %v7277_v17  ;;  %v7355_v16 = vld [vmem:[#allocation16 + $0x428] ss:$28 sps:$4 sm:$0xff]   ;;  %v7369_v28 = vld [vmem:[#allocation16 + $0x49c] ss:$28 sps:$4 sm:$0xff]  }
 0x2fa   :  { %v2629_v48 = vmul.f32 %v2595_v42, %v2580_v45  ;;  %5796 = vmatprep.subr.bf16.mxu1 %v7285_v18  ;;  %v7363_v17 = vld [vmem:[#allocation16 + $0x464] ss:$28 sps:$4 sm:$0xff]   ;;  %v7367_v45 = vld [vmem:[#allocation16 + $0x498] ss:$28 sps:$4 sm:$0xff]  }
 0x2fb   :  { %v2677_v51 = vadd.f32 %v2640_v44, %v2628_v46  ;;  %v7330_v42 = vld [vmem:[#allocation16 + $0x2e4] ss:$28 sps:$4 sm:$0xff]   ;;  %v7333_v44 = vld [vmem:[#allocation16 + $0x31c] ss:$28 sps:$4 sm:$0xff]  }
 0x2fc   :  { %v2678_v52 = vadd.f32 %v2644_v19, %v2629_v48  ;;  %v7361_v18 = vld [vmem:[#allocation16 + $0x460] ss:$28 sps:$4 sm:$0xff]   ;;  %v7375_v19 = vld [vmem:[#allocation16 + $0x4d4] ss:$28 sps:$4 sm:$0xff]  }
 0x2fd   :  { %5797 = vmatpush1.bf16.msra.mxu1 %v7283_v26  ;;  %v2717_v54 = vmul.f32 1.442695, %v2677_v51  ;;  %v2693_v57 = vmul.f32 0.5, %v2677_v51  ;;  %vm2685_vm10 = vcmp.gt.f32.partialorder %v2677_v51, -0.001  ;;  %vm2749_vm12 = vcmp.gt.f32.partialorder %v2677_v51, 0.0 }
 0x2fe   :  { %5798 = vmatprep.subr.bf16.mxu1 %v7291_v49  ;;  %v2719_v55 = vmul.f32 1.442695, %v2678_v52  ;;  %v2694_v58 = vmul.f32 0.5, %v2678_v52  ;;  %vm2686_vm11 = vcmp.gt.f32.partialorder %v2678_v52, -0.001  ;;  %vm2750_vm13 = vcmp.gt.f32.partialorder %v2678_v52, 0.0 }
 0x2ff   :  { %7901 = vpow2.f32 %v2717_v54  ;;  %v2701_v61 = vmul.f32 %v2693_v57, %v2677_v51  ;;  %v7328_v43 = vld [vmem:[#allocation16 + $0x2e0] ss:$28 sps:$4 sm:$0xff]   ;;  %v7331_v46 = vld [vmem:[#allocation16 + $0x318] ss:$28 sps:$4 sm:$0xff]   ;;  %v7373_v48 = vld [vmem:[#allocation16 + $0x4d0] ss:$28 sps:$4 sm:$0xff]  }
 0x300   :  { %7903 = vpow2.f32 %v2719_v55  ;;  %v2702_v62 = vmul.f32 %v2694_v58, %v2678_v52  ;;  %v7336_v26 = vld [vmem:[#allocation16 + $0x354] ss:$28 sps:$4 sm:$0xff]   ;;  %v7381_v49 = vld [vmem:[#allocation16 + $0x50c] ss:$28 sps:$4 sm:$0xff]   ;;  %v7387_v54 = vld [vmem:[#allocation16 + $0x544] ss:$28 sps:$4 sm:$0xff]  }
 0x301   :  { %5799 = vmatpush1.bf16.msra.mxu1 %v7289_v53  ;;  %v2709_v1 = vadd.f32 %v2701_v61, %v2677_v51  ;;  %v7379_v53 = vld [vmem:[#allocation16 + $0x508] ss:$28 sps:$4 sm:$0xff]   ;;  %v7346_v57 = vld [vmem:[#allocation16 + $0x3c0] ss:$28 sps:$4 sm:$0xff]   ;;  %v7352_v61 = vld [vmem:[#allocation16 + $0x3f8] ss:$28 sps:$4 sm:$0xff]  }
 0x302   :  { %5800 = vmatprep.subr.bf16.mxu1 %v7297_v47  ;;  %v2710_v5 = vadd.f32 %v2702_v62, %v2678_v52  ;;  %v7340_v47 = vld [vmem:[#allocation16 + $0x388] ss:$28 sps:$4 sm:$0xff]   ;;  %v7354_v58 = vld [vmem:[#allocation16 + $0x3fc] ss:$28 sps:$4 sm:$0xff]   ;;  %v7360_v62 = vld [vmem:[#allocation16 + $0x434] ss:$28 sps:$4 sm:$0xff]  }
 0x303   :  { %v7348_v55 = vld [vmem:[#allocation16 + $0x3c4] ss:$28 sps:$4 sm:$0xff]  }
 0x305   :  { %5801 = vmatpush1.bf16.msra.mxu1 %v7295_v50  ;;  %v7385_v50 = vld [vmem:[#allocation16 + $0x540] ss:$28 sps:$4 sm:$0xff]  }
 0x306   :  { %5802 = vmatprep.subr.bf16.mxu1 %v7303_v56  ;;  %v7393_v56 = vld [vmem:[#allocation16 + $0x57c] ss:$28 sps:$4 sm:$0xff]  }
 0x309   :  { %v7902_v63 = vpop.eup %7901  ;;  %5803 = vmatpush1.bf16.msra.mxu1 %v7301_v59  ;;  %v7391_v59 = vld [vmem:[#allocation16 + $0x578] ss:$28 sps:$4 sm:$0xff]  }
 0x30a   :  { %v7904_v2 = vpop.eup %7903  ;;  %5804 = vmatprep.subr.bf16.mxu1 %v7309_v60  ;;  %v6602_v4 = vadd.f32 -1.0, %v7902_v63  ;;  %v7399_v60 = vld [vmem:[#allocation16 + $0x5b4] ss:$28 sps:$4 sm:$0xff]  }
 0x30b   :  { %v6603_v7 = vadd.f32 -1.0, %v7904_v2  ;;  %v7397_v63 = vld [vmem:[#allocation16 + $0x5b0] ss:$28 sps:$4 sm:$0xff]  }
 0x30c   :  { %v2741_v8 = vsel %vm2685_vm10, %v2709_v1, %v6602_v4  ;;  %v7358_v2 = vld [vmem:[#allocation16 + $0x430] ss:$28 sps:$4 sm:$0xff]   ;;  %v7403_v1 = vld [vmem:[#allocation16 + $0x5e8] ss:$28 sps:$4 sm:$0xff]  }
 0x30d   :  { %5805 = vmatpush1.bf16.msra.mxu1 %v7307_v0  ;;  %v2742_v23 = vsel %vm2686_vm11, %v2710_v5, %v6603_v7  ;;  %v2757_v27 = vsel %vm2749_vm12, %v2677_v51, %v2741_v8  ;;  %v7334_v51 = vld [vmem:[#allocation16 + $0x350] ss:$28 sps:$4 sm:$0xff]   ;;  %v7411_v4 = vld [vmem:[#allocation16 + $0x624] ss:$28 sps:$4 sm:$0xff]   ;;  %v8525_v7 = vsub.s32 5, %v8413_v20 }
 0x30e   :  { %5806 = vmatprep.subr.bf16.mxu1 %v7315_v3  ;;  %v2758_v29 = vsel %vm2750_vm13, %v2678_v52, %v2742_v23  ;;  %v8518_v35 = vpack.c.bf16 %v2757_v27, %v2757_v27  ;;  %v7342_v52 = vld [vmem:[#allocation16 + $0x38c] ss:$28 sps:$4 sm:$0xff]   ;;  %v7372_v8 = vld [vmem:[#allocation16 + $0x4a4] ss:$28 sps:$4 sm:$0xff]   ;;  %v780_v23 = vrot.slane %v8483_v6, %v8419_v22  ;;  %v7417_v27 = vld [vmem:[#allocation16 + $0x65c] ss:$28 sps:$4 sm:$0xff]  }
 0x30f   :  { %v8516_v30 = vpack.c.bf16 %v2758_v29, %v2758_v29  ;;  %v7405_v0 = vld [vmem:[#allocation16 + $0x5ec] ss:$28 sps:$4 sm:$0xff]   ;;  %v784_v29 = vrot.slane %v8483_v6, %v8425_v25 }
 0x310   :  { %v7366_v3 = vld [vmem:[#allocation16 + $0x46c] ss:$28 sps:$4 sm:$0xff]  }
 0x311   :  { %5807 = vmatpush1.bf16.msra.mxu1 %v7313_v9  ;;  %5658 = vmatprep.mubr.bf16.mxu0 %v8516_v30  ;;  %v7364_v5 = vld [vmem:[#allocation16 + $0x468] ss:$28 sps:$4 sm:$0xff]   ;;  %v7409_v9 = vld [vmem:[#allocation16 + $0x620] ss:$28 sps:$4 sm:$0xff]  }
 0x312   :  { %5822 = vmatprep.mubr.bf16.mxu1 %v8516_v30  ;;  %5659 = vmatmul.mubr.bf16.vlgmr.msra.gmra.mrb[12].mxu0 %v8518_v35 }
 0x313   :  { %5808 = vmatprep.subr.bf16.mxu1 %v7318_v31  ;;  %5668 = vmatpush1.bf16.msra.mxu0 %v7337_v34  ;;  %v7370_v31 = vld [vmem:[#allocation16 + $0x4a0] ss:$28 sps:$4 sm:$0xff]   ;;  %v792_v34 = vrot.slane %v8483_v6, %v8525_v7 }
 0x314   :  { %5669 = vmatprep.subr.bf16.mxu0 %v7345_v32  ;;  %v7378_v32 = vld [vmem:[#allocation16 + $0x4dc] ss:$28 sps:$4 sm:$0xff]  }
 0x315   :  { %5809 = vmatpush1.bf16.msra.mxu1 %v7316_v10 }
 0x316   :  { %5810 = vmatprep.subr.bf16.mxu1 %v7321_v33  ;;  %v7415_v33 = vld [vmem:[#allocation16 + $0x658] ss:$28 sps:$4 sm:$0xff]  }
 0x317   :  { %5670 = vmatpush1.bf16.msra.mxu0 %v7343_v36 }
 0x318   :  { %5671 = vmatprep.subr.bf16.mxu0 %v7351_v37  ;;  %v8536_v37 = vsub.s32 4, %v8413_v20 }
 0x319   :  { %5811 = vmatpush1.bf16.msra.mxu1 %v7319_v38 }
 0x31a   :  { %5812 = vmatprep.subr.bf16.mxu1 %v7324_v39 }
 0x31b   :  { %5672 = vmatpush1.bf16.msra.mxu0 %v7349_v14  ;;  %v7423_v14 = vld [vmem:[#allocation16 + $0x694] ss:$28 sps:$4 sm:$0xff]  }
 0x31c   :  { %5673 = vmatprep.subr.bf16.mxu0 %v7357_v40 }
 0x31d   :  { %5813 = vmatpush1.bf16.msra.mxu1 %v7322_v11 }
 0x31e   :  { %5814 = vmatprep.subr.bf16.mxu1 %v7327_v13 }
 0x31f   :  { %5674 = vmatpush1.bf16.msra.mxu0 %v7355_v16  ;;  %v7376_v16 = vld [vmem:[#allocation16 + $0x4d8] ss:$28 sps:$4 sm:$0xff]  }
 0x320   :  { %5675 = vmatprep.subr.bf16.mxu0 %v7363_v17 }
 0x321   :  { %5815 = vmatpush1.bf16.msra.mxu1 %v7325_v41 }
 0x322   :  { %5816 = vmatprep.subr.bf16.mxu1 %v7330_v42 }
 0x323   :  { %5676 = vmatpush1.bf16.msra.mxu0 %v7361_v18 }
 0x324   :  { %5677 = vmatprep.subr.bf16.mxu0 %v7369_v28  ;;  %v7384_v28 = vld [vmem:[#allocation16 + $0x514] ss:$28 sps:$4 sm:$0xff]  }
 0x325   :  { %5817 = vmatpush1.bf16.msra.mxu1 %v7328_v43 }
 0x326   :  { %5818 = vmatprep.subr.bf16.mxu1 %v7333_v44 }
 0x327   :  { %5678 = vmatpush1.bf16.msra.mxu0 %v7367_v45 }
 0x328   :  { %5679 = vmatprep.subr.bf16.mxu0 %v7375_v19  ;;  %v7421_v19 = vld [vmem:[#allocation16 + $0x690] ss:$28 sps:$4 sm:$0xff]  }
 0x329   :  { %5819 = vmatpush1.bf16.msra.mxu1 %v7331_v46  ;;  %v788_v46 = vrot.slane %v8483_v6, %v8536_v37 }
 0x32a   :  { %5820 = vmatprep.subr.bf16.mxu1 %v7336_v26 }
 0x32b   :  { %5680 = vmatpush1.bf16.msra.mxu0 %v7373_v48 }
 0x32c   :  { %5681 = vmatprep.subr.bf16.mxu0 %v7381_v49  ;;  %v7429_v49 = vld [vmem:[#allocation16 + $0x6cc] ss:$28 sps:$4 sm:$0xff]  }
 0x32d   :  { %5821 = vmatpush1.bf16.msra.mxu1 %v7334_v51 }
 0x32e   :  { %5831 = vmatprep.subr.bf16.mxu1 %v7342_v52 }
 0x32f   :  { %5682 = vmatpush1.bf16.msra.mxu0 %v7379_v53  ;;  %v7382_v53 = vld [vmem:[#allocation16 + $0x510] ss:$28 sps:$4 sm:$0xff]  }
 0x330   :  { %5823 = vmatmul.mubr.bf16.vlgmr.msra.gmra.mrb[16].mxu1 %v8518_v35  ;;  %5683 = vmatprep.subr.bf16.mxu0 %v7387_v54 }
 0x331   :  { %5832 = vmatpush1.bf16.msra.mxu1 %v7340_v47  ;;  %v7390_v47 = vld [vmem:[#allocation16 + $0x54c] ss:$28 sps:$4 sm:$0xff]  }
 0x332   :  { %5833 = vmatprep.subr.bf16.mxu1 %v7348_v55 }
 0x333   :  { %5684 = vmatpush1.bf16.msra.mxu0 %v7385_v50 }
 0x334   :  { %5685 = vmatprep.subr.bf16.mxu0 %v7393_v56  ;;  %v7427_v56 = vld [vmem:[#allocation16 + $0x6c8] ss:$28 sps:$4 sm:$0xff]  }
 0x335   :  { %5834 = vmatpush1.bf16.msra.mxu1 %v7346_v57 }
 0x336   :  { %5835 = vmatprep.subr.bf16.mxu1 %v7354_v58  ;;  %v7435_v58 = vld [vmem:[#allocation16 + $0x704] ss:$28 sps:$4 sm:$0xff]  }
 0x337   :  { %5686 = vmatpush1.bf16.msra.mxu0 %v7391_v59 }
 0x338   :  { %5687 = vmatprep.subr.bf16.mxu0 %v7399_v60 }
 0x339   :  { %5836 = vmatpush1.bf16.msra.mxu1 %v7352_v61  ;;  %v7388_v61 = vld [vmem:[#allocation16 + $0x548] ss:$28 sps:$4 sm:$0xff]  }
 0x33a   :  { %5837 = vmatprep.subr.bf16.mxu1 %v7360_v62 }
 0x33b   :  { %5688 = vmatpush1.bf16.msra.mxu0 %v7397_v63  ;;  %v7396_v63 = vld [vmem:[#allocation16 + $0x584] ss:$28 sps:$4 sm:$0xff]  }
 0x33c   :  { %5689 = vmatprep.subr.bf16.mxu0 %v7405_v0 }
 0x33d   :  { %5838 = vmatpush1.bf16.msra.mxu1 %v7358_v2 }
 0x33e   :  { %5839 = vmatprep.subr.bf16.mxu1 %v7366_v3 }
 0x33f   :  { %5690 = vmatpush1.bf16.msra.mxu0 %v7403_v1 }
 0x340   :  { %5691 = vmatprep.subr.bf16.mxu0 %v7411_v4 }
 0x341   :  { %5840 = vmatpush1.bf16.msra.mxu1 %v7364_v5 }
 0x342   :  { %5841 = vmatprep.subr.bf16.mxu1 %v7372_v8  ;;  %v7394_v8 = vld [vmem:[#allocation16 + $0x580] ss:$28 sps:$4 sm:$0xff]  }
 0x343   :  { %v2246_v10 = vpop.f32.mrb[8].mxu1  ;;  %5692 = vmatpush1.bf16.msra.mxu0 %v7409_v9 }
 0x344   :  { %v8533_v36 = vadd.f32 %v2246_v10, %v780_v23  ;;  %v2328_v38 = vpop.f32.mrb[8].mxu0  ;;  %v2248_v39 = vpop.f32.mrb[9].mxu1  ;;  %5693 = vmatprep.subr.bf16.mxu0 %v7417_v27  ;;  %v7402_v23 = vld [vmem:[#allocation16 + $0x5bc] ss:$28 sps:$4 sm:$0xff]  }
 0x345   :  { %v8538_v40 = vadd.f32 %v2248_v39, %v784_v29  ;;  %v2330_v11 = vpop.f32.mrb[9].mxu0  ;;  %v2250_v13 = vpop.f32.mrb[10].mxu1  ;;  %5842 = vmatpush1.bf16.msra.mxu1 %v7370_v31  ;;  %v8550_v57 = vadd.f32 %v2328_v38, %v788_v46  ;;  %v7408_v39 = vld [vmem:[#allocation16 + $0x5f4] ss:$28 sps:$4 sm:$0xff]  }
 0x346   :  { %v2433_v17 = vsel %vm332_vm1, %v8533_v36, 0.0  ;;  %v8542_v41 = vadd.f32 %v2330_v11, %v792_v34  ;;  %v2332_v42 = vpop.f32.mrb[10].mxu0  ;;  %v2251_v18 = vpop.f32.mrb[11].mxu1  ;;  %5843 = vmatprep.subr.bf16.mxu1 %v7378_v32 }
 0x347   :  { %v2434_v43 = vrot.slane %v2433_v17, 4  ;;  %v2440_v44 = vsel %vm332_vm1, %v8538_v40, 0.0  ;;  %v2333_v45 = vpop.f32.mrb[11].mxu0  ;;  %5694 = vmatpush1.bf16.msra.mxu0 %v7415_v33  ;;  %v2447_v3 = vsel %vm332_vm1, %v8550_v57, 0.0  ;;  %v7400_v33 = vld [vmem:[#allocation16 + $0x5b8] ss:$28 sps:$4 sm:$0xff]  }
 0x348   :  { %v2441_v26 = vrot.slane %v2440_v44, 4  ;;  %v2454_v48 = vsel %vm332_vm1, %v8542_v41, 0.0  ;;  %5695 = vmatprep.subr.bf16.mxu0 %v7423_v14  ;;  %v2448_v29 = vrot.slane %v2447_v3, 4 }
 0x349   :  { %v2435_v51 = vadd.f32 %v2434_v43, %v2433_v17  ;;  %v2455_v52 = vrot.slane %v2454_v48, 4  ;;  %5844 = vmatpush1.bf16.msra.mxu1 %v7376_v16 }
 0x34a   :  { %v2442_v54 = vadd.f32 %v2441_v26, %v2440_v44  ;;  %5845 = vmatprep.subr.bf16.mxu1 %v7384_v28  ;;  %v2449_v11 = vadd.f32 %v2448_v29, %v2447_v3  ;;  %v7414_v28 = vld [vmem:[#allocation16 + $0x62c] ss:$28 sps:$4 sm:$0xff]  }
 0x34b   :  { %v2436_v55 = vrot.slane %v2435_v51, 2  ;;  %v2456_v50 = vadd.f32 %v2455_v52, %v2454_v48  ;;  %5696 = vmatpush1.bf16.msra.mxu0 %v7421_v19  ;;  %v7412_v26 = vld [vmem:[#allocation16 + $0x628] ss:$28 sps:$4 sm:$0xff]  }
 0x34c   :  { %v2443_v6 = vrot.slane %v2442_v54, 2  ;;  %5697 = vmatprep.subr.bf16.mxu0 %v7429_v49  ;;  %v2450_v43 = vrot.slane %v2449_v11, 2 }
 0x34d   :  { %v2437_v59 = vadd.f32 %v2436_v55, %v2435_v51  ;;  %v2457_v60 = vrot.slane %v2456_v50, 2  ;;  %5846 = vmatpush1.bf16.msra.mxu1 %v7382_v53  ;;  %v7420_v51 = vld [vmem:[#allocation16 + $0x664] ss:$28 sps:$4 sm:$0xff]  }
 0x34e   :  { %v2444_v62 = vadd.f32 %v2443_v6, %v2442_v54  ;;  %5847 = vmatprep.subr.bf16.mxu1 %v7390_v47  ;;  %v2451_v52 = vadd.f32 %v2450_v43, %v2449_v11  ;;  %v2652_v43 = vrot.slane %v8504_v15, %v8425_v25 }
 0x34f   :  { %v2438_v0 = vrot.slane %v2437_v59, 1  ;;  %v2458_v2 = vadd.f32 %v2457_v60, %v2456_v50  ;;  %5698 = vmatpush1.bf16.msra.mxu0 %v7427_v56  ;;  %v7418_v50 = vld [vmem:[#allocation16 + $0x660] ss:$28 sps:$4 sm:$0xff]  }
 0x350   :  { %v2445_v1 = vrot.slane %v2444_v62, 1  ;;  %5708 = vmatprep.subr.bf16.mxu0 %v7435_v58  ;;  %v7426_v58 = vld [vmem:[#allocation16 + $0x69c] ss:$28 sps:$4 sm:$0xff]  }
 0x351   :  { %v2439_v4 = vadd.f32 %v2438_v0, %v2437_v59  ;;  %v2459_v5 = vrot.slane %v2458_v2, 1  ;;  %5848 = vmatpush1.bf16.msra.mxu1 %v7388_v61  ;;  %v2452_v59 = vrot.slane %v2451_v52, 1  ;;  %v7424_v0 = vld [vmem:[#allocation16 + $0x698] ss:$28 sps:$4 sm:$0xff]  }
 0x352   :  { %v2446_v9 = vadd.f32 %v2445_v1, %v2444_v62  ;;  %5849 = vmatprep.subr.bf16.mxu1 %v7396_v63  ;;  %v7432_v1 = vld [vmem:[#allocation16 + $0x6d4] ss:$28 sps:$4 sm:$0xff]  }
 0x353   :  { %v2477_v27 = vmul.f32 0.5, %v2439_v4  ;;  %v2460_v31 = vadd.f32 %v2459_v5, %v2458_v2  ;;  %v2453_v4 = vadd.f32 %v2452_v59, %v2451_v52 }
 0x354   :  { %v2478_v34 = vmul.f32 0.5, %v2446_v9 }
 0x355   :  { %v8555_v32 = vsub.f32 %v8533_v36, %v2477_v27  ;;  %v2480_v10 = vmul.f32 0.5, %v2460_v31  ;;  %5850 = vmatpush1.bf16.msra.mxu1 %v7394_v8  ;;  %v7430_v27 = vld [vmem:[#allocation16 + $0x6d0] ss:$28 sps:$4 sm:$0xff]  }
 0x356   :  { %v8558_v38 = vsub.f32 %v8538_v40, %v2478_v34  ;;  %5851 = vmatprep.subr.bf16.mxu1 %v7402_v23  ;;  %v7406_v40 = vld [vmem:[#allocation16 + $0x5f0] ss:$28 sps:$4 sm:$0xff]   ;;  %v2479_v34 = vmul.f32 0.5, %v2453_v4 }
 0x357   :  { %v2493_v14 = vmul.f32 %v8555_v32, %v8555_v32  ;;  %v8563_v13 = vsub.f32 %v8542_v41, %v2480_v10  ;;  %v7438_v31 = vld [vmem:[#allocation16 + $0x70c] ss:$28 sps:$4 sm:$0xff]  }
 0x358   :  { %v2494_v16 = vmul.f32 %v8558_v38, %v8558_v38  ;;  %v8573_v10 = vsub.f32 %v8550_v57, %v2479_v34  ;;  %v2611_v57 = vrot.slane %v8502_v12, %v8525_v7 }
 0x359   :  { %v2513_v36 = vsel %vm332_vm1, %v2493_v14, 0.0  ;;  %v2496_v17 = vmul.f32 %v8563_v13, %v8563_v13  ;;  %5852 = vmatpush1.bf16.msra.mxu1 %v7400_v33  ;;  %v2599_v33 = vrot.slane %v8502_v12, %v8419_v22 }
 0x35a   :  { %v2514_v42 = vrot.slane %v2513_v36, 4  ;;  %v2520_v18 = vsel %vm332_vm1, %v2494_v16, 0.0  ;;  %5853 = vmatprep.subr.bf16.mxu1 %v7408_v39  ;;  %v2495_v39 = vmul.f32 %v8573_v10, %v8573_v10  ;;  %v2648_v16 = vrot.slane %v8504_v15, %v8419_v22 }
 0x35b   :  { %v2521_v44 = vrot.slane %v2520_v18, 4  ;;  %v2534_v41 = vsel %vm332_vm1, %v2496_v17, 0.0 }
 0x35c   :  { %v2515_v45 = vadd.f32 %v2514_v42, %v2513_v36  ;;  %v2535_v19 = vrot.slane %v2534_v41, 4  ;;  %v2603_v36 = vrot.slane %v8502_v12, %v8425_v25 }
 0x35d   :  { %v2522_v46 = vadd.f32 %v2521_v44, %v2520_v18  ;;  %5854 = vmatpush1.bf16.msra.mxu1 %v7406_v40  ;;  %v2527_v18 = vsel %vm332_vm1, %v2495_v39, 0.0  ;;  %v2660_v44 = vrot.slane %v8504_v15, %v8525_v7 }
 0x35e   :  { %v2516_v48 = vrot.slane %v2515_v45, 2  ;;  %v2536_v49 = vadd.f32 %v2535_v19, %v2534_v41  ;;  %5855 = vmatprep.subr.bf16.mxu1 %v7414_v28  ;;  %v2528_v19 = vrot.slane %v2527_v18, 4 }
 0x35f   :  { %v2523_v53 = vrot.slane %v2522_v46, 2 }
 0x360   :  { %v2517_v54 = vadd.f32 %v2516_v48, %v2515_v45  ;;  %v2537_v47 = vrot.slane %v2536_v49, 2  ;;  %v2529_v52 = vadd.f32 %v2528_v19, %v2527_v18  ;;  %v7445_v18 = vld [vmem:[#allocation16 + $0x770] ss:$28 sps:$4 sm:$0xff]   ;;  %v7459_v19 = vld [vmem:[#allocation16 + $0x7e4] ss:$28 sps:$4 sm:$0xff]  }
 0x361   :  { %v2524_v55 = vadd.f32 %v2523_v53, %v2522_v46  ;;  %5856 = vmatpush1.bf16.msra.mxu1 %v7412_v26 }
 0x362   :  { %v2518_v56 = vrot.slane %v2517_v54, 1  ;;  %v2538_v6 = vadd.f32 %v2537_v47, %v2536_v49  ;;  %5857 = vmatprep.subr.bf16.mxu1 %v7420_v51 }
 0x363   :  { %v2525_v60 = vrot.slane %v2524_v55, 1 }
 0x364   :  { %v2519_v61 = vadd.f32 %v2518_v56, %v2517_v54  ;;  %v2539_v62 = vrot.slane %v2538_v6, 1  ;;  %v2530_v54 = vrot.slane %v2529_v52, 2 }
 0x365   :  { %v2526_v63 = vadd.f32 %v2525_v60, %v2524_v55  ;;  %5858 = vmatpush1.bf16.msra.mxu1 %v7418_v50 }
 0x366   :  { %v2557_v2 = vmul.f32 0.5, %v2519_v61  ;;  %v2540_v3 = vadd.f32 %v2539_v62, %v2538_v6  ;;  %5859 = vmatprep.subr.bf16.mxu1 %v7426_v58  ;;  %v2531_v50 = vadd.f32 %v2530_v54, %v2529_v52  ;;  %v7463_v52 = vld [vmem:[#allocation16 + $0x818] ss:$28 sps:$4 sm:$0xff]  }
 0x367   :  { %v2558_v5 = vmul.f32 0.5, %v2526_v63  ;;  %v7474_v54 = vld [vmem:[#allocation16 + $0x85c] ss:$28 sps:$4 sm:$0xff]  }
 0x368   :  { %v2565_v8 = vadd.f32 1e-05, %v2557_v2  ;;  %v2560_v9 = vmul.f32 0.5, %v2540_v3  ;;  %v2532_v62 = vrot.slane %v2531_v50, 1 }
 0x369   :  { %v2566_v23 = vadd.f32 1e-05, %v2558_v5  ;;  %5860 = vmatpush1.bf16.msra.mxu1 %v7424_v0 }
 0x36a   :  { %7905 = vrsqrt.f32 %v2565_v8  ;;  %v2568_v29 = vadd.f32 1e-05, %v2560_v9  ;;  %5861 = vmatprep.subr.bf16.mxu1 %v7432_v1  ;;  %v2533_v34 = vadd.f32 %v2532_v62, %v2531_v50  ;;  %v7477_v50 = vld [vmem:[#allocation16 + $0x88c] ss:$28 sps:$4 sm:$0xff]  }
 0x36b   :  { %7907 = vrsqrt.f32 %v2566_v23  ;;  %v7486_v62 = vld [vmem:[#allocation16 + $0x8cc] ss:$28 sps:$4 sm:$0xff]  }
 0x36c   :  { %7909 = vrsqrt.f32 %v2568_v29  ;;  %v7436_v29 = vld [vmem:[#allocation16 + $0x708] ss:$28 sps:$4 sm:$0xff]  }
 0x36d   :  { %5862 = vmatpush1.bf16.msra.mxu1 %v7430_v27  ;;  %v7433_v27 = vld [vmem:[#allocation16 + $0x700] ss:$28 sps:$4 sm:$0xff]  }
 0x36e   :  { %5872 = vmatprep.subr.bf16.mxu1 %v7438_v31 }
 0x374   :  { %v7906_v14 = vpop.eup %7905 }
 0x375   :  { %v2581_v11 = vmul.f32 %v7906_v14, %v8555_v32  ;;  %v7908_v17 = vpop.eup %7907  ;;  %v7441_v14 = vld [vmem:[#allocation16 + $0x73c] ss:$28 sps:$4 sm:$0xff]  }
 0x376   :  { %v7910_v40 = vpop.eup %7909  ;;  %v2582_v28 = vmul.f32 %v7908_v17, %v8558_v38  ;;  %v7442_v17 = vld [vmem:[#allocation16 + $0x740] ss:$28 sps:$4 sm:$0xff]  }
 0x377   :  { %v2630_v42 = vmul.f32 %v2599_v33, %v2581_v11  ;;  %v2584_v32 = vmul.f32 %v7910_v40, %v8563_v13  ;;  %v7444_v11 = vld [vmem:[#allocation16 + $0x744] ss:$28 sps:$4 sm:$0xff]   ;;  %v7447_v40 = vld [vmem:[#allocation16 + $0x774] ss:$28 sps:$4 sm:$0xff]  }
 0x378   :  { %v2631_v45 = vmul.f32 %v2603_v36, %v2582_v28  ;;  %v7439_v36 = vld [vmem:[#allocation16 + $0x738] ss:$28 sps:$4 sm:$0xff]  }
 0x379   :  { %v2679_v41 = vadd.f32 %v2648_v16, %v2630_v42  ;;  %v2633_v46 = vmul.f32 %v2611_v57, %v2584_v32  ;;  %v2559_v57 = vmul.f32 0.5, %v2533_v34  ;;  %v7450_v42 = vld [vmem:[#allocation16 + $0x77c] ss:$28 sps:$4 sm:$0xff]   ;;  %v7453_v32 = vld [vmem:[#allocation16 + $0x7ac] ss:$28 sps:$4 sm:$0xff]  }
 0x37a   :  { %v2680_v26 = vadd.f32 %v2652_v43, %v2631_v45  ;;  %v7448_v28 = vld [vmem:[#allocation16 + $0x778] ss:$28 sps:$4 sm:$0xff]   ;;  %v7454_v45 = vld [vmem:[#allocation16 + $0x7b0] ss:$28 sps:$4 sm:$0xff]  }
 0x37b   :  { %v2721_v48 = vmul.f32 1.442695, %v2679_v41  ;;  %v2682_v49 = vadd.f32 %v2660_v44, %v2633_v46  ;;  %v2695_v53 = vmul.f32 0.5, %v2679_v41  ;;  %vm2687_vm14 = vcmp.gt.f32.partialorder %v2679_v41, -0.001 }
 0x37c   :  { %v2723_v51 = vmul.f32 1.442695, %v2680_v26  ;;  %v2696_v47 = vmul.f32 0.5, %v2680_v26  ;;  %vm2688_vm15 = vcmp.gt.f32.partialorder %v2680_v26, -0.001  ;;  %vm2752_vm0 = vcmp.gt.f32.partialorder %v2680_v26, 0.0 }
 0x37d   :  { %7911 = vpow2.f32 %v2721_v48  ;;  %v2727_v38 = vmul.f32 1.442695, %v2682_v49  ;;  %v2698_v13 = vmul.f32 0.5, %v2682_v49  ;;  %v2703_v55 = vmul.f32 %v2695_v53, %v2679_v41  ;;  %v7456_v44 = vld [vmem:[#allocation16 + $0x7b4] ss:$28 sps:$4 sm:$0xff]  }
 0x37e   :  { %7913 = vpow2.f32 %v2723_v51  ;;  %v2704_v56 = vmul.f32 %v2696_v47, %v2680_v26  ;;  %vm2751_vm2 = vcmp.gt.f32.partialorder %v2679_v41, 0.0  ;;  %vm2690_vm3 = vcmp.gt.f32.partialorder %v2682_v49, -0.001  ;;  %v7462_v46 = vld [vmem:[#allocation16 + $0x7ec] ss:$28 sps:$4 sm:$0xff]  }
 0x37f   :  { %7915 = vpow2.f32 %v2727_v38  ;;  %v2706_v58 = vmul.f32 %v2698_v13, %v2682_v49  ;;  %v2711_v60 = vadd.f32 %v2703_v55, %v2679_v41  ;;  %vm2754_vm4 = vcmp.gt.f32.partialorder %v2682_v49, 0.0  ;;  %v7460_v48 = vld [vmem:[#allocation16 + $0x7e8] ss:$28 sps:$4 sm:$0xff]   ;;  %v7466_v38 = vld [vmem:[#allocation16 + $0x820] ss:$28 sps:$4 sm:$0xff]  }
 0x380   :  { %v2712_v63 = vadd.f32 %v2704_v56, %v2680_v26  ;;  %v2567_v43 = vadd.f32 1e-05, %v2559_v57  ;;  %v7468_v51 = vld [vmem:[#allocation16 + $0x824] ss:$28 sps:$4 sm:$0xff]   ;;  %v7471_v53 = vld [vmem:[#allocation16 + $0x854] ss:$28 sps:$4 sm:$0xff]  }
 0x381   :  { %v2714_v5 = vadd.f32 %v2706_v58, %v2682_v49  ;;  %v7469_v13 = vld [vmem:[#allocation16 + $0x850] ss:$28 sps:$4 sm:$0xff]   ;;  %v7472_v55 = vld [vmem:[#allocation16 + $0x858] ss:$28 sps:$4 sm:$0xff]   ;;  %v2607_v58 = vrot.slane %v8502_v12, %v8536_v37  ;;  %v7492_v12 = vld [vmem:[#allocation16 + $0x904] ss:$28 sps:$4 sm:$0xff]  }
 0x382   :  { %7917 = vrsqrt.f32 %v2567_v43  ;;  %v7480_v56 = vld [vmem:[#allocation16 + $0x894] ss:$28 sps:$4 sm:$0xff]   ;;  %v8617_v57 = vsub.s32 7, %v8413_v20 }
 0x383   :  { %v7504_v34 = vld [vmem:[#allocation16 + $0x974] ss:$28 sps:$4 sm:$0xff]  }
 0x387   :  { %v7912_v6 = vpop.eup %7911 }
 0x388   :  { %v7914_v59 = vpop.eup %7913  ;;  %v6604_v61 = vadd.f32 -1.0, %v7912_v6 }
 0x389   :  { %v6605_v0 = vadd.f32 -1.0, %v7914_v59  ;;  %v7916_v2 = vpop.eup %7915  ;;  %v7475_v59 = vld [vmem:[#allocation16 + $0x888] ss:$28 sps:$4 sm:$0xff]  }
 0x38a   :  { %v2743_v3 = vsel %vm2687_vm14, %v2711_v60, %v6604_v61  ;;  %v6607_v8 = vadd.f32 -1.0, %v7916_v2  ;;  %v7478_v60 = vld [vmem:[#allocation16 + $0x890] ss:$28 sps:$4 sm:$0xff]   ;;  %v7483_v61 = vld [vmem:[#allocation16 + $0x8c4] ss:$28 sps:$4 sm:$0xff]  }
 0x38b   :  { %v2744_v1 = vsel %vm2688_vm15, %v2712_v63, %v6605_v0  ;;  %v2759_v4 = vsel %vm2751_vm2, %v2679_v41, %v2743_v3  ;;  %v7451_v41 = vld [vmem:[#allocation16 + $0x7a8] ss:$28 sps:$4 sm:$0xff]   ;;  %v2656_v0 = vrot.slane %v8504_v15, %v8536_v37  ;;  %v7481_v2 = vld [vmem:[#allocation16 + $0x8c0] ss:$28 sps:$4 sm:$0xff]  }
 0x38c   :  { %v2760_v9 = vsel %vm2752_vm0, %v2680_v26, %v2744_v1  ;;  %v2746_v31 = vsel %vm2690_vm3, %v2714_v5, %v6607_v8  ;;  %v8595_v33 = vpack.c.bf16 %v2759_v4, %v2759_v4  ;;  %v7457_v26 = vld [vmem:[#allocation16 + $0x7e0] ss:$28 sps:$4 sm:$0xff]   ;;  %v7918_v47 = vpop.eup %7917  ;;  %v7484_v3 = vld [vmem:[#allocation16 + $0x8c8] ss:$28 sps:$4 sm:$0xff]   ;;  %v7487_v4 = vld [vmem:[#allocation16 + $0x8f8] ss:$28 sps:$4 sm:$0xff]  }
 0x38d   :  { %v8593_v23 = vpack.c.bf16 %v2760_v9, %v2760_v9  ;;  %v2762_v39 = vsel %vm2754_vm4, %v2682_v49, %v2746_v31  ;;  %v7465_v49 = vld [vmem:[#allocation16 + $0x81c] ss:$28 sps:$4 sm:$0xff]   ;;  %v2583_v6 = vmul.f32 %v7918_v47, %v8573_v10  ;;  %v7495_v8 = vld [vmem:[#allocation16 + $0x934] ss:$28 sps:$4 sm:$0xff]   ;;  %v7501_v31 = vld [vmem:[#allocation16 + $0x96c] ss:$28 sps:$4 sm:$0xff]  }
 0x38e   :  { %v8601_v16 = vpack.c.bf16 %v2762_v39, %v2762_v39  ;;  %v7489_v10 = vld [vmem:[#allocation16 + $0x8fc] ss:$28 sps:$4 sm:$0xff]   ;;  %v7499_v39 = vld [vmem:[#allocation16 + $0x968] ss:$28 sps:$4 sm:$0xff]  }
 0x38f   :  { %5699 = vmatprep.mubr.bf16.mxu0 %v8593_v23  ;;  %5863 = vmatprep.mubr.bf16.mxu1 %v8593_v23  ;;  %v2632_v63 = vmul.f32 %v2607_v58, %v2583_v6  ;;  %v7490_v5 = vld [vmem:[#allocation16 + $0x900] ss:$28 sps:$4 sm:$0xff]  }
 0x390   :  { %5700 = vmatmul.mubr.bf16.vlgmr.msra.gmra.mrb[12].mxu0 %v8595_v33  ;;  %5864 = vmatmul.mubr.bf16.vlgmr.msra.gmra.mrb[16].mxu1 %v8595_v33  ;;  %v7498_v9 = vld [vmem:[#allocation16 + $0x93c] ss:$28 sps:$4 sm:$0xff]  }
 0x391   :  { %5709 = vmatpush1.bf16.msra.mxu0 %v7433_v27  ;;  %5873 = vmatpush1.bf16.msra.mxu1 %v7436_v29  ;;  %v8610_v1 = vadd.f32 %v2656_v0, %v2632_v63  ;;  %v7493_v27 = vld [vmem:[#allocation16 + $0x930] ss:$28 sps:$4 sm:$0xff]   ;;  %v7496_v29 = vld [vmem:[#allocation16 + $0x938] ss:$28 sps:$4 sm:$0xff]  }
 0x392   :  { %5740 = vmatprep.mubr.bf16.mxu0 %v8601_v16  ;;  %5904 = vmatprep.mubr.bf16.mxu1 %v8601_v16 }
 0x393   :  { %5710 = vmatprep.subr.bf16.mxu0 %v7441_v14  ;;  %5874 = vmatprep.subr.bf16.mxu1 %v7444_v11  ;;  %v2725_v15 = vmul.f32 1.442695, %v8610_v1  ;;  %v7502_v14 = vld [vmem:[#allocation16 + $0x970] ss:$28 sps:$4 sm:$0xff]   ;;  %v7507_v11 = vld [vmem:[#allocation16 + $0x9a4] ss:$28 sps:$4 sm:$0xff]  }
 0x394   :  { %v2697_v43 = vmul.f32 0.5, %v8610_v1  ;;  %vm2689_vm5 = vcmp.gt.f32.partialorder %v8610_v1, -0.001  ;;  %vm2753_vm6 = vcmp.gt.f32.partialorder %v8610_v1, 0.0 }
 0x395   :  { %5711 = vmatpush1.bf16.msra.mxu0 %v7439_v36  ;;  %5875 = vmatpush1.bf16.msra.mxu1 %v7442_v17  ;;  %7919 = vpow2.f32 %v2725_v15  ;;  %v7510_v36 = vld [vmem:[#allocation16 + $0x9ac] ss:$28 sps:$4 sm:$0xff]   ;;  %v8614_v17 = vsub.s32 6, %v8413_v20 }
 0x396   :  { %5712 = vmatprep.subr.bf16.mxu0 %v7447_v40  ;;  %5876 = vmatprep.subr.bf16.mxu1 %v7450_v42  ;;  %v7505_v40 = vld [vmem:[#allocation16 + $0x9a0] ss:$28 sps:$4 sm:$0xff]   ;;  %v7508_v42 = vld [vmem:[#allocation16 + $0x9a8] ss:$28 sps:$4 sm:$0xff]  }
 0x399   :  { %5713 = vmatpush1.bf16.msra.mxu0 %v7445_v18  ;;  %5877 = vmatpush1.bf16.msra.mxu1 %v7448_v28  ;;  %v7513_v18 = vld [vmem:[#allocation16 + $0x9dc] ss:$28 sps:$4 sm:$0xff]   ;;  %v7516_v28 = vld [vmem:[#allocation16 + $0x9e4] ss:$28 sps:$4 sm:$0xff]  }
 0x39a   :  { %5714 = vmatprep.subr.bf16.mxu0 %v7453_v32  ;;  %5878 = vmatprep.subr.bf16.mxu1 %v7456_v44  ;;  %v7929_v32 = vld [vmem:[#allocation12] sm:$0xff] }
 0x39b   :  { %v796_v44 = vrot.slane %v7929_v32, %v8614_v17 }
 0x39d   :  { %5715 = vmatpush1.bf16.msra.mxu0 %v7451_v41  ;;  %5879 = vmatpush1.bf16.msra.mxu1 %v7454_v45  ;;  %v800_v41 = vrot.slane %v7929_v32, %v8617_v57  ;;  %v7546_v32 = vld [vmem:[#allocation16 + $0xafc] ss:$28 sps:$4 sm:$0xff]  }
 0x39e   :  { %5716 = vmatprep.subr.bf16.mxu0 %v7459_v19  ;;  %5880 = vmatprep.subr.bf16.mxu1 %v7462_v46  ;;  %v7511_v19 = vld [vmem:[#allocation16 + $0x9d8] ss:$28 sps:$4 sm:$0xff]   ;;  %v7514_v46 = vld [vmem:[#allocation16 + $0x9e0] ss:$28 sps:$4 sm:$0xff]  }
 0x39f   :  { %v7920_v45 = vpop.eup %7919 }
 0x3a0   :  { %v6606_v47 = vadd.f32 -1.0, %v7920_v45 }
 0x3a1   :  { %5717 = vmatpush1.bf16.msra.mxu0 %v7457_v26  ;;  %5881 = vmatpush1.bf16.msra.mxu1 %v7460_v48  ;;  %v7519_v48 = vld [vmem:[#allocation16 + $0xa14] ss:$28 sps:$4 sm:$0xff]  }
 0x3a2   :  { %5718 = vmatprep.subr.bf16.mxu0 %v7465_v49  ;;  %5882 = vmatprep.subr.bf16.mxu1 %v7468_v51  ;;  %v7522_v49 = vld [vmem:[#allocation16 + $0xa1c] ss:$28 sps:$4 sm:$0xff]   ;;  %v2705_v51 = vmul.f32 %v2697_v43, %v8610_v1  ;;  %v7543_v43 = vld [vmem:[#allocation16 + $0xaf4] ss:$28 sps:$4 sm:$0xff]  }
 0x3a5   :  { %5719 = vmatpush1.bf16.msra.mxu0 %v7463_v52  ;;  %5883 = vmatpush1.bf16.msra.mxu1 %v7466_v38 }
 0x3a6   :  { %5720 = vmatprep.subr.bf16.mxu0 %v7471_v53  ;;  %5884 = vmatprep.subr.bf16.mxu1 %v7474_v54 }
 0x3a9   :  { %5721 = vmatpush1.bf16.msra.mxu0 %v7469_v13  ;;  %5885 = vmatpush1.bf16.msra.mxu1 %v7472_v55 }
 0x3aa   :  { %5722 = vmatprep.subr.bf16.mxu0 %v7477_v50  ;;  %5886 = vmatprep.subr.bf16.mxu1 %v7480_v56  ;;  %v7517_v50 = vld [vmem:[#allocation16 + $0xa10] ss:$28 sps:$4 sm:$0xff]   ;;  %v7520_v56 = vld [vmem:[#allocation16 + $0xa18] ss:$28 sps:$4 sm:$0xff]  }
 0x3ad   :  { %5723 = vmatpush1.bf16.msra.mxu0 %v7475_v59  ;;  %5887 = vmatpush1.bf16.msra.mxu1 %v7478_v60  ;;  %v7525_v59 = vld [vmem:[#allocation16 + $0xa4c] ss:$28 sps:$4 sm:$0xff]   ;;  %v7528_v60 = vld [vmem:[#allocation16 + $0xa54] ss:$28 sps:$4 sm:$0xff]  }
 0x3ae   :  { %5724 = vmatprep.subr.bf16.mxu0 %v7483_v61  ;;  %5888 = vmatprep.subr.bf16.mxu1 %v7486_v62  ;;  %v2713_v61 = vadd.f32 %v2705_v51, %v8610_v1 }
 0x3b0   :  { %v2745_v0 = vsel %vm2689_vm5, %v2713_v61, %v6606_v47  ;;  %v7550_v47 = vld [vmem:[#allocation16 + $0xb30] ss:$28 sps:$4 sm:$0xff]  }
 0x3b1   :  { %5725 = vmatpush1.bf16.msra.mxu0 %v7481_v2  ;;  %5889 = vmatpush1.bf16.msra.mxu1 %v7484_v3  ;;  %v7523_v3 = vld [vmem:[#allocation16 + $0xa48] ss:$28 sps:$4 sm:$0xff]  }
 0x3b2   :  { %5726 = vmatprep.subr.bf16.mxu0 %v7489_v10  ;;  %5890 = vmatprep.subr.bf16.mxu1 %v7492_v12  ;;  %v7526_v10 = vld [vmem:[#allocation16 + $0xa50] ss:$28 sps:$4 sm:$0xff]  }
 0x3b5   :  { %5727 = vmatpush1.bf16.msra.mxu0 %v7487_v4  ;;  %5891 = vmatpush1.bf16.msra.mxu1 %v7490_v5  ;;  %v7531_v4 = vld [vmem:[#allocation16 + $0xa84] ss:$28 sps:$4 sm:$0xff]   ;;  %v7534_v5 = vld [vmem:[#allocation16 + $0xa8c] ss:$28 sps:$4 sm:$0xff]  }
 0x3b6   :  { %5728 = vmatprep.subr.bf16.mxu0 %v7495_v8  ;;  %5892 = vmatprep.subr.bf16.mxu1 %v7498_v9  ;;  %v2761_v9 = vsel %vm2753_vm6, %v8610_v1, %v2745_v0 }
 0x3b9   :  { %5729 = vmatpush1.bf16.msra.mxu0 %v7493_v27  ;;  %5893 = vmatpush1.bf16.msra.mxu1 %v7496_v29  ;;  %v7529_v29 = vld [vmem:[#allocation16 + $0xa80] ss:$28 sps:$4 sm:$0xff]  }
 0x3ba   :  { %5730 = vmatprep.subr.bf16.mxu0 %v7501_v31  ;;  %5894 = vmatprep.subr.bf16.mxu1 %v7504_v34  ;;  %v7532_v31 = vld [vmem:[#allocation16 + $0xa88] ss:$28 sps:$4 sm:$0xff]  }
 0x3bd   :  { %5731 = vmatpush1.bf16.msra.mxu0 %v7499_v39  ;;  %5895 = vmatpush1.bf16.msra.mxu1 %v7502_v14  ;;  %v8629_v39 = vpack.c.bf16 %v2761_v9, %v2761_v9  ;;  %v7537_v14 = vld [vmem:[#allocation16 + $0xabc] ss:$28 sps:$4 sm:$0xff]  }
 0x3be   :  { %5732 = vmatprep.subr.bf16.mxu0 %v7507_v11  ;;  %5896 = vmatprep.subr.bf16.mxu1 %v7510_v36  ;;  %v7540_v11 = vld [vmem:[#allocation16 + $0xac4] ss:$28 sps:$4 sm:$0xff]  }
 0x3c1   :  { %5733 = vmatpush1.bf16.msra.mxu0 %v7505_v40  ;;  %5897 = vmatpush1.bf16.msra.mxu1 %v7508_v42  ;;  %v7535_v42 = vld [vmem:[#allocation16 + $0xab8] ss:$28 sps:$4 sm:$0xff]  }
 0x3c2   :  { %5734 = vmatprep.subr.bf16.mxu0 %v7513_v18  ;;  %5898 = vmatprep.subr.bf16.mxu1 %v7516_v28  ;;  %v7538_v18 = vld [vmem:[#allocation16 + $0xac0] ss:$28 sps:$4 sm:$0xff]  }
 0x3c3   :  { %v2410_v26 = vpop.f32.mrb[12].mxu1 }
 0x3c4   :  { %v7154_v52 = vadd.f32 %v2410_v26, %v796_v44  ;;  %v2412_v38 = vpop.f32.mrb[13].mxu1 }
 0x3c5   :  { %v7155_v53 = vadd.f32 %v2412_v38, %v800_v41  ;;  %v2414_v54 = vpop.f32.mrb[14].mxu1  ;;  %5735 = vmatpush1.bf16.msra.mxu0 %v7511_v19  ;;  %5899 = vmatpush1.bf16.msra.mxu1 %v7514_v46  ;;  %v7541_v19 = vld [vmem:[#allocation16 + $0xaf0] ss:$28 sps:$4 sm:$0xff]   ;;  %v7544_v46 = vld [vmem:[#allocation16 + $0xaf8] ss:$28 sps:$4 sm:$0xff]  }
 0x3c6   :  { %v2461_v13 = vsel %vm332_vm1, %v7154_v52, 0.0  ;;  %v2415_v55 = vpop.f32.mrb[15].mxu1  ;;  %5736 = vmatprep.subr.bf16.mxu0 %v7519_v48  ;;  %5900 = vmatprep.subr.bf16.mxu1 %v7522_v49  ;;  %v7549_v48 = vld [vmem:[#allocation16 + $0xb2c] ss:$28 sps:$4 sm:$0xff]   ;;  %v7552_v49 = vld [vmem:[#allocation16 + $0xb34] ss:$28 sps:$4 sm:$0xff]  }
 0x3c7   :  { %v2462_v6 = vrot.slane %v2461_v13, 4  ;;  %v2468_v58 = vsel %vm332_vm1, %v7155_v53, 0.0  ;;  %v7547_v54 = vld [vmem:[#allocation16 + $0xb28] ss:$28 sps:$4 sm:$0xff]  }
 0x3c8   :  { %v2469_v62 = vrot.slane %v2468_v58, 4  ;;  %v7555_v55 = vld [vmem:[#allocation16 + $0xb64] ss:$28 sps:$4 sm:$0xff]  }
 0x3c9   :  { %v2463_v63 = vadd.f32 %v2462_v6, %v2461_v13  ;;  %5737 = vmatpush1.bf16.msra.mxu0 %v7517_v50  ;;  %5901 = vmatpush1.bf16.msra.mxu1 %v7520_v56  ;;  %v7558_v50 = vld [vmem:[#allocation16 + $0xb6c] ss:$28 sps:$4 sm:$0xff]  }
 0x3ca   :  { %v2470_v2 = vadd.f32 %v2469_v62, %v2468_v58  ;;  %5738 = vmatprep.subr.bf16.mxu0 %v7525_v59  ;;  %5902 = vmatprep.subr.bf16.mxu1 %v7528_v60  ;;  %v7553_v59 = vld [vmem:[#allocation16 + $0xb60] ss:$28 sps:$4 sm:$0xff]   ;;  %v7556_v60 = vld [vmem:[#allocation16 + $0xb68] ss:$28 sps:$4 sm:$0xff]  }
 0x3cb   :  { %v2464_v12 = vrot.slane %v2463_v63, 2  ;;  %v7561_v62 = vld [vmem:[#allocation16 + $0xb9c] ss:$28 sps:$4 sm:$0xff]  }
 0x3cc   :  { %v2471_v8 = vrot.slane %v2470_v2, 2 }
 0x3cd   :  { %v2465_v15 = vadd.f32 %v2464_v12, %v2463_v63  ;;  %5739 = vmatpush1.bf16.msra.mxu0 %v7523_v3  ;;  %5903 = vmatpush1.bf16.msra.mxu1 %v7526_v10  ;;  %v7564_v63 = vld [vmem:[#allocation16 + $0xba4] ss:$28 sps:$4 sm:$0xff]   ;;  %v7559_v10 = vld [vmem:[#allocation16 + $0xb98] ss:$28 sps:$4 sm:$0xff]  }
 0x3ce   :  { %v2472_v27 = vadd.f32 %v2471_v8, %v2470_v2  ;;  %5749 = vmatprep.subr.bf16.mxu0 %v7531_v4  ;;  %5913 = vmatprep.subr.bf16.mxu1 %v7534_v5  ;;  %v7562_v12 = vld [vmem:[#allocation16 + $0xba0] ss:$28 sps:$4 sm:$0xff]   ;;  %v7567_v5 = vld [vmem:[#allocation16 + $0xbd4] ss:$28 sps:$4 sm:$0xff]  }
 0x3cf   :  { %v2466_v34 = vrot.slane %v2465_v15, 1  ;;  %v7570_v8 = vld [vmem:[#allocation16 + $0xbdc] ss:$28 sps:$4 sm:$0xff]  }
 0x3d0   :  { %v2473_v36 = vrot.slane %v2472_v27, 1  ;;  %5741 = vmatmul.mubr.bf16.vlgmr.msra.gmra.mrb[12].mxu0 %v8629_v39  ;;  %5905 = vmatmul.mubr.bf16.vlgmr.msra.gmra.mrb[16].mxu1 %v8629_v39 }
 0x3d1   :  { %v2467_v40 = vadd.f32 %v2466_v34, %v2465_v15  ;;  %5750 = vmatpush1.bf16.msra.mxu0 %v7529_v29  ;;  %5914 = vmatpush1.bf16.msra.mxu1 %v7532_v31  ;;  %v7565_v29 = vld [vmem:[#allocation16 + $0xbd0] ss:$28 sps:$4 sm:$0xff]   ;;  %v7568_v31 = vld [vmem:[#allocation16 + $0xbd8] ss:$28 sps:$4 sm:$0xff]  }
 0x3d2   :  { %v2474_v1 = vadd.f32 %v2473_v36, %v2472_v27  ;;  %5751 = vmatprep.subr.bf16.mxu0 %v7537_v14  ;;  %5915 = vmatprep.subr.bf16.mxu1 %v7540_v11  ;;  %v7573_v14 = vld [vmem:[#allocation16 + $0xc0c] ss:$28 sps:$4 sm:$0xff]   ;;  %v7576_v11 = vld [vmem:[#allocation16 + $0xc14] ss:$28 sps:$4 sm:$0xff]  }
 0x3d3   :  { %v2481_v28 = vmul.f32 0.5, %v2467_v40 }
 0x3d4   :  { %v2482_v44 = vmul.f32 0.5, %v2474_v1  ;;  %v7571_v1 = vld [vmem:[#allocation16 + $0xc08] ss:$28 sps:$4 sm:$0xff]  }
 0x3d5   :  { %v8633_v41 = vsub.f32 %v7154_v52, %v2481_v28  ;;  %5752 = vmatpush1.bf16.msra.mxu0 %v7535_v42  ;;  %5916 = vmatpush1.bf16.msra.mxu1 %v7538_v18  ;;  %v7574_v42 = vld [vmem:[#allocation16 + $0xc10] ss:$28 sps:$4 sm:$0xff]   ;;  %v7579_v18 = vld [vmem:[#allocation16 + $0xc44] ss:$28 sps:$4 sm:$0xff]  }
 0x3d6   :  { %v8635_v45 = vsub.f32 %v7155_v53, %v2482_v44  ;;  %5753 = vmatprep.subr.bf16.mxu0 %v7543_v43  ;;  %5917 = vmatprep.subr.bf16.mxu1 %v7546_v32  ;;  %v7582_v28 = vld [vmem:[#allocation16 + $0xc4c] ss:$28 sps:$4 sm:$0xff]   ;;  %v7577_v43 = vld [vmem:[#allocation16 + $0xc40] ss:$28 sps:$4 sm:$0xff]  }
 0x3d7   :  { %v2497_v26 = vmul.f32 %v8633_v41, %v8633_v41  ;;  %v7580_v32 = vld [vmem:[#allocation16 + $0xc48] ss:$28 sps:$4 sm:$0xff]   ;;  %v7585_v44 = vld [vmem:[#allocation16 + $0xc7c] ss:$28 sps:$4 sm:$0xff]  }
 0x3d8   :  { %v2498_v51 = vmul.f32 %v8635_v45, %v8635_v45 }
 0x3d9   :  { %v2541_v38 = vsel %vm332_vm1, %v2497_v26, 0.0  ;;  %5754 = vmatpush1.bf16.msra.mxu0 %v7541_v19  ;;  %5918 = vmatpush1.bf16.msra.mxu1 %v7544_v46  ;;  %v7588_v19 = vld [vmem:[#allocation16 + $0xc84] ss:$28 sps:$4 sm:$0xff]   ;;  %v7583_v46 = vld [vmem:[#allocation16 + $0xc78] ss:$28 sps:$4 sm:$0xff]  }
 0x3da   :  { %v2542_v52 = vrot.slane %v2541_v38, 4  ;;  %v2548_v53 = vsel %vm332_vm1, %v2498_v51, 0.0  ;;  %5755 = vmatprep.subr.bf16.mxu0 %v7549_v48  ;;  %5919 = vmatprep.subr.bf16.mxu1 %v7552_v49  ;;  %v7586_v26 = vld [vmem:[#allocation16 + $0xc80] ss:$28 sps:$4 sm:$0xff]   ;;  %v7930_v48 = vld [vmem:[#allocation13] sm:$0xff] }
 0x3db   :  { %v2549_v13 = vrot.slane %v2548_v53, 4  ;;  %v2615_v49 = vrot.slane %v7930_v48, %v8614_v17  ;;  %v7591_v51 = vld [vmem:[#allocation16 + $0xcb4] ss:$28 sps:$4 sm:$0xff]  }
 0x3dc   :  { %v2543_v56 = vadd.f32 %v2542_v52, %v2541_v38  ;;  %v7594_v38 = vld [vmem:[#allocation16 + $0xcbc] ss:$28 sps:$4 sm:$0xff]  }
 0x3dd   :  { %v2550_v6 = vadd.f32 %v2549_v13, %v2548_v53  ;;  %5756 = vmatpush1.bf16.msra.mxu0 %v7547_v54  ;;  %5920 = vmatpush1.bf16.msra.mxu1 %v7550_v47  ;;  %v2619_v53 = vrot.slane %v7930_v48, %v8617_v57  ;;  %v7931_v13 = vld [vmem:[#allocation15] sm:$0xff] }
 0x3de   :  { %v2544_v58 = vrot.slane %v2543_v56, 2  ;;  %5757 = vmatprep.subr.bf16.mxu0 %v7555_v55  ;;  %5921 = vmatprep.subr.bf16.mxu1 %v7558_v50  ;;  %v2664_v55 = vrot.slane %v7931_v13, %v8614_v17 }
 0x3df   :  { %v2551_v61 = vrot.slane %v2550_v6, 2 }
 0x3e0   :  { %v2545_v0 = vadd.f32 %v2544_v58, %v2543_v56  ;;  %v2668_v56 = vrot.slane %v7931_v13, %v8617_v57  ;;  %v7592_v58 = vld [vmem:[#allocation16 + $0xcb8] ss:$28 sps:$4 sm:$0xff]   ;;  %v7603_v57 = vld [vmem:[#allocation16 + $0xd24] ss:$28 sps:$4 sm:$0xff]  }
 0x3e1   :  { %v2552_v2 = vadd.f32 %v2551_v61, %v2550_v6  ;;  %5758 = vmatpush1.bf16.msra.mxu0 %v7553_v59  ;;  %5922 = vmatpush1.bf16.msra.mxu1 %v7556_v60  ;;  %v7589_v6 = vld [vmem:[#allocation16 + $0xcb0] ss:$28 sps:$4 sm:$0xff]   ;;  %v7629_v13 = vld [vmem:[#allocation16 + $0x18] ss:$28 sps:$4 sm:$0xff]  }
 0x3e2   :  { %v2546_v3 = vrot.slane %v2545_v0, 1  ;;  %5759 = vmatprep.subr.bf16.mxu0 %v7561_v62  ;;  %5923 = vmatprep.subr.bf16.mxu1 %v7564_v63  ;;  %v7597_v60 = vld [vmem:[#allocation16 + $0xcec] ss:$28 sps:$4 sm:$0xff]   ;;  %v7600_v61 = vld [vmem:[#allocation16 + $0xcf4] ss:$28 sps:$4 sm:$0xff]  }
 0x3e3   :  { %v2553_v4 = vrot.slane %v2552_v2, 1 }
 0x3e4   :  { %v2547_v9 = vadd.f32 %v2546_v3, %v2545_v0  ;;  %v7595_v0 = vld [vmem:[#allocation16 + $0xce8] ss:$28 sps:$4 sm:$0xff]  }
 0x3e5   :  { %v2554_v15 = vadd.f32 %v2553_v4, %v2552_v2  ;;  %5760 = vmatpush1.bf16.msra.mxu0 %v7559_v10  ;;  %5924 = vmatpush1.bf16.msra.mxu1 %v7562_v12  ;;  %v7598_v2 = vld [vmem:[#allocation16 + $0xcf0] ss:$28 sps:$4 sm:$0xff]   ;;  %v7601_v12 = vld [vmem:[#allocation16 + $0xd20] ss:$28 sps:$4 sm:$0xff]   ;;  %v7604_v4 = vld [vmem:[#allocation16 + $0xd28] ss:$28 sps:$4 sm:$0xff]  }
 0x3e6   :  { %v2561_v27 = vmul.f32 0.5, %v2547_v9  ;;  %5761 = vmatprep.subr.bf16.mxu0 %v7567_v5  ;;  %5925 = vmatprep.subr.bf16.mxu1 %v7570_v8  ;;  %v7609_v5 = vld [vmem:[#allocation16 + $0xd5c] ss:$28 sps:$4 sm:$0xff]   ;;  %v7612_v8 = vld [vmem:[#allocation16 + $0xd64] ss:$28 sps:$4 sm:$0xff]  }
 0x3e7   :  { %v2562_v34 = vmul.f32 0.5, %v2554_v15 }
 0x3e8   :  { %v2569_v36 = vadd.f32 1e-05, %v2561_v27  ;;  %v7607_v27 = vld [vmem:[#allocation16 + $0xd58] ss:$28 sps:$4 sm:$0xff]  }
 0x3e9   :  { %v2570_v40 = vadd.f32 1e-05, %v2562_v34  ;;  %5762 = vmatpush1.bf16.msra.mxu0 %v7565_v29  ;;  %5926 = vmatpush1.bf16.msra.mxu1 %v7568_v31  ;;  %v7610_v29 = vld [vmem:[#allocation16 + $0xd60] ss:$28 sps:$4 sm:$0xff]   ;;  %v7615_v31 = vld [vmem:[#allocation16 + $0xd94] ss:$28 sps:$4 sm:$0xff]  }
 0x3ea   :  { %7921 = vrsqrt.f32 %v2569_v36  ;;  %5763 = vmatprep.subr.bf16.mxu0 %v7573_v14  ;;  %5927 = vmatprep.subr.bf16.mxu1 %v7576_v11  ;;  %v7618_v34 = vld [vmem:[#allocation16 + $0xd9c] ss:$28 sps:$4 sm:$0xff]   ;;  %v7613_v36 = vld [vmem:[#allocation16 + $0xd90] ss:$28 sps:$4 sm:$0xff]  }
 0x3eb   :  { %7923 = vrsqrt.f32 %v2570_v40  ;;  %v7616_v40 = vld [vmem:[#allocation16 + $0xd98] ss:$28 sps:$4 sm:$0xff]  }
 0x3ed   :  { %5764 = vmatpush1.bf16.msra.mxu0 %v7571_v1  ;;  %5928 = vmatpush1.bf16.msra.mxu1 %v7574_v42  ;;  %v7621_v42 = vld [vmem:[#allocation16 + $0xdcc] ss:$28 sps:$4 sm:$0xff]  }
 0x3ee   :  { %5765 = vmatprep.subr.bf16.mxu0 %v7579_v18  ;;  %5929 = vmatprep.subr.bf16.mxu1 %v7582_v28  ;;  %v7624_v18 = vld [vmem:[#allocation16 + $0xdd4] ss:$28 sps:$4 sm:$0xff]  }
 0x3f1   :  { %5766 = vmatpush1.bf16.msra.mxu0 %v7577_v43  ;;  %5930 = vmatpush1.bf16.msra.mxu1 %v7580_v32 }
 0x3f2   :  { %5767 = vmatprep.subr.bf16.mxu0 %v7585_v44  ;;  %5931 = vmatprep.subr.bf16.mxu1 %v7588_v19 }
 0x3f4   :  { %v7922_v52 = vpop.eup %7921 }
 0x3f5   :  { %v7924_v54 = vpop.eup %7923  ;;  %v2585_v47 = vmul.f32 %v7922_v52, %v8633_v41  ;;  %5768 = vmatpush1.bf16.msra.mxu0 %v7583_v46  ;;  %5932 = vmatpush1.bf16.msra.mxu1 %v7586_v26  ;;  %v7619_v46 = vld [vmem:[#allocation16 + $0xdc8] ss:$28 sps:$4 sm:$0xff]   ;;  %v7622_v26 = vld [vmem:[#allocation16 + $0xdd0] ss:$28 sps:$4 sm:$0xff]   ;;  %v7628_v52 = vld [vmem:[#allocation16 + $0x1d8] ss:$28 sps:$4 sm:$0xff]  }
 0x3f6   :  { %v2586_v50 = vmul.f32 %v7924_v54, %v8635_v45  ;;  %5769 = vmatprep.subr.bf16.mxu0 %v7591_v51  ;;  %5933 = vmatprep.subr.bf16.mxu1 %v7594_v38  ;;  %v7606_v45 = vld [vmem:[#allocation16 + $0xd2c] ss:$28 sps:$4 sm:$0xff]   ;;  %v7627_v38 = vld [vmem:[#allocation16 + $0x14] ss:$28 sps:$4 sm:$0xff]  }
 0x3f7   :  { %v2634_v59 = vmul.f32 %v2615_v49, %v2585_v47  ;;  %v7625_v47 = vld [vmem:[#allocation16 + $0x10] ss:$28 sps:$4 sm:$0xff]  }
 0x3f8   :  { %v2635_v62 = vmul.f32 %v2619_v53, %v2586_v50  ;;  %v7632_v50 = vld [vmem:[#allocation16 + $0x4c] ss:$28 sps:$4 sm:$0xff]  }
 0x3f9   :  { %v8649_v63 = vadd.f32 %v2664_v55, %v2634_v59  ;;  %5770 = vmatpush1.bf16.msra.mxu0 %v7589_v6  ;;  %5934 = vmatpush1.bf16.msra.mxu1 %v7592_v58  ;;  %v7630_v6 = vld [vmem:[#allocation16 + $0x48] ss:$28 sps:$4 sm:$0xff]   ;;  %v7634_v58 = vld [vmem:[#allocation16 + $0x50] ss:$28 sps:$4 sm:$0xff]  }
 0x3fa   :  { %v2684_v41 = vadd.f32 %v2668_v56, %v2635_v62  ;;  %5771 = vmatprep.subr.bf16.mxu0 %v7597_v60  ;;  %5935 = vmatprep.subr.bf16.mxu1 %v7600_v61  ;;  %v7633_v56 = vld [vmem:[#allocation16 + $0x210] ss:$28 sps:$4 sm:$0xff]   ;;  %v7637_v59 = vld [vmem:[#allocation16 + $0x84] ss:$28 sps:$4 sm:$0xff]  }
 0x3fb   :  { %v2729_v3 = vmul.f32 1.442695, %v8649_v63  ;;  %v2699_v9 = vmul.f32 0.5, %v8649_v63  ;;  %vm2691_vm1 = vcmp.gt.f32.partialorder %v8649_v63, -0.001  ;;  %vm2755_vm9 = vcmp.gt.f32.partialorder %v8649_v63, 0.0 }
 0x3fc   :  { %v2731_v10 = vmul.f32 1.442695, %v2684_v41  ;;  %v2700_v15 = vmul.f32 0.5, %v2684_v41  ;;  %vm2692_vm7 = vcmp.gt.f32.partialorder %v2684_v41, -0.001  ;;  %vm2756_vm8 = vcmp.gt.f32.partialorder %v2684_v41, 0.0 }
 0x3fd   :  { %7925 = vpow2.f32 %v2729_v3  ;;  %5772 = vmatpush1.bf16.msra.mxu0 %v7595_v0  ;;  %5936 = vmatpush1.bf16.msra.mxu1 %v7598_v2  ;;  %v2707_v14 = vmul.f32 %v2699_v9, %v8649_v63  ;;  %v7638_v60 = vld [vmem:[#allocation16 + $0x248] ss:$28 sps:$4 sm:$0xff]   ;;  %v7635_v61 = vld [vmem:[#allocation16 + $0x80] ss:$28 sps:$4 sm:$0xff]   ;;  %v7640_v0 = vld [vmem:[#allocation16 + $0xb8] ss:$28 sps:$4 sm:$0xff]  }
 0x3fe   :  { %7927 = vpow2.f32 %v2731_v10  ;;  %5773 = vmatprep.subr.bf16.mxu0 %v7603_v57  ;;  %5937 = vmatprep.subr.bf16.mxu1 %v7606_v45  ;;  %v2708_v11 = vmul.f32 %v2700_v15, %v2684_v41  ;;  %v7639_v62 = vld [vmem:[#allocation16 + $0x88] ss:$28 sps:$4 sm:$0xff]   ;;  %v7644_v2 = vld [vmem:[#allocation16 + $0xc0] ss:$28 sps:$4 sm:$0xff]   ;;  %v7647_v57 = vld [vmem:[#allocation16 + $0xf4] ss:$28 sps:$4 sm:$0xff]  }
 0x3ff   :  { %v2715_v43 = vadd.f32 %v2707_v14, %v8649_v63  ;;  %v7645_v45 = vld [vmem:[#allocation16 + $0xf0] ss:$28 sps:$4 sm:$0xff]   ;;  %v7649_v3 = vld [vmem:[#allocation16 + $0xf8] ss:$28 sps:$4 sm:$0xff]   ;;  %v7658_v9 = vld [vmem:[#allocation16 + $0x328] ss:$28 sps:$4 sm:$0xff]  }
 0x400   :  { %v2716_v44 = vadd.f32 %v2708_v11, %v2684_v41  ;;  %v7652_v10 = vld [vmem:[#allocation16 + $0x12c] ss:$28 sps:$4 sm:$0xff]   ;;  %v7655_v15 = vld [vmem:[#allocation16 + $0x160] ss:$28 sps:$4 sm:$0xff]   ;;  %v7667_v11 = vld [vmem:[#allocation16 + $0x1d4] ss:$28 sps:$4 sm:$0xff]  }
 0x401   :  { %5774 = vmatpush1.bf16.msra.mxu0 %v7601_v12  ;;  %5938 = vmatpush1.bf16.msra.mxu1 %v7604_v4  ;;  %v7653_v12 = vld [vmem:[#allocation16 + $0x2f0] ss:$28 sps:$4 sm:$0xff]   ;;  %v7650_v4 = vld [vmem:[#allocation16 + $0x128] ss:$28 sps:$4 sm:$0xff]   ;;  %v7664_v14 = vld [vmem:[#allocation16 + $0x1a0] ss:$28 sps:$4 sm:$0xff]  }
 0x402   :  { %5775 = vmatprep.subr.bf16.mxu0 %v7609_v5  ;;  %5939 = vmatprep.subr.bf16.mxu1 %v7612_v8  ;;  %v7654_v5 = vld [vmem:[#allocation16 + $0x130] ss:$28 sps:$4 sm:$0xff]   ;;  %v7657_v8 = vld [vmem:[#allocation16 + $0x164] ss:$28 sps:$4 sm:$0xff]  }
 0x405   :  { %5776 = vmatpush1.bf16.msra.mxu0 %v7607_v27  ;;  %5940 = vmatpush1.bf16.msra.mxu1 %v7610_v29  ;;  %v7659_v27 = vld [vmem:[#allocation16 + $0x168] ss:$28 sps:$4 sm:$0xff]   ;;  %v7662_v29 = vld [vmem:[#allocation16 + $0x19c] ss:$28 sps:$4 sm:$0xff]  }
 0x406   :  { %5777 = vmatprep.subr.bf16.mxu0 %v7615_v31  ;;  %5941 = vmatprep.subr.bf16.mxu1 %v7618_v34  ;;  %v7663_v31 = vld [vmem:[#allocation16 + $0x360] ss:$28 sps:$4 sm:$0xff]   ;;  %v7660_v34 = vld [vmem:[#allocation16 + $0x198] ss:$28 sps:$4 sm:$0xff]  }
 0x407   :  { %v7926_v1 = vpop.eup %7925 }
 0x408   :  { %v7928_v28 = vpop.eup %7927  ;;  %v6608_v32 = vadd.f32 -1.0, %v7926_v1  ;;  %v7669_v1 = vld [vmem:[#allocation16 + $0x398] ss:$28 sps:$4 sm:$0xff]  }
 0x409   :  { %v6609_v19 = vadd.f32 -1.0, %v7928_v28  ;;  %5778 = vmatpush1.bf16.msra.mxu0 %v7613_v36  ;;  %5942 = vmatpush1.bf16.msra.mxu1 %v7616_v40  ;;  %v7668_v36 = vld [vmem:[#allocation16 + $0x558] ss:$28 sps:$4 sm:$0xff]   ;;  %v7665_v40 = vld [vmem:[#allocation16 + $0x1d0] ss:$28 sps:$4 sm:$0xff]  }
 0x40a   :  { %v2747_v48 = vsel %vm2691_vm1, %v2715_v43, %v6608_v32  ;;  %5779 = vmatprep.subr.bf16.mxu0 %v7621_v42  ;;  %5943 = vmatprep.subr.bf16.mxu1 %v7624_v18  ;;  %v7672_v42 = vld [vmem:[#allocation16 + $0x20c] ss:$28 sps:$4 sm:$0xff]   ;;  %v7677_v32 = vld [vmem:[#allocation16 + $0x244] ss:$28 sps:$4 sm:$0xff]  }
 0x40b   :  { %v2748_v49 = vsel %vm2692_vm7, %v2716_v44, %v6609_v19  ;;  %v2763_v53 = vsel %vm2755_vm9, %v8649_v63, %v2747_v48  ;;  %v7642_v63 = vld [vmem:[#allocation16 + $0xbc] ss:$28 sps:$4 sm:$0xff]   ;;  %v7673_v18 = vld [vmem:[#allocation16 + $0x590] ss:$28 sps:$4 sm:$0xff]   ;;  %v7670_v28 = vld [vmem:[#allocation16 + $0x208] ss:$28 sps:$4 sm:$0xff]  }
 0x40c   :  { %v2764_v51 = vsel %vm2756_vm8, %v2684_v41, %v2748_v49  ;;  %v8662_v55 = vpack.c.bf16 %v2763_v53, %v2763_v53  ;;  %v7643_v41 = vld [vmem:[#allocation16 + $0x280] ss:$28 sps:$4 sm:$0xff]   ;;  %v7674_v43 = vld [vmem:[#allocation16 + $0x3d0] ss:$28 sps:$4 sm:$0xff]   ;;  %v7678_v44 = vld [vmem:[#allocation16 + $0x5c8] ss:$28 sps:$4 sm:$0xff]  }
 0x40d   :  { %v8658_v54 = vpack.c.bf16 %v2764_v51, %v2764_v51  ;;  %5780 = vmatpush1.bf16.msra.mxu0 %v7619_v46  ;;  %5944 = vmatpush1.bf16.msra.mxu1 %v7622_v26  ;;  %v7675_v19 = vld [vmem:[#allocation16 + $0x240] ss:$28 sps:$4 sm:$0xff]   ;;  %v7679_v46 = vld [vmem:[#allocation16 + $0x408] ss:$28 sps:$4 sm:$0xff]   ;;  %v7680_v49 = vld [vmem:[#allocation16 + $0x278] ss:$28 sps:$4 sm:$0xff]  }
 0x40e   :  { %5954 = vmatprep.subr.bf16.mxu0 %v7627_v38  ;;  %7058 = vmatprep.subr.bf16.mxu1 %v7628_v52  ;;  %v7682_v26 = vld [vmem:[#allocation16 + $0x27c] ss:$28 sps:$4 sm:$0xff]   ;;  %v7687_v38 = vld [vmem:[#allocation16 + $0x2b4] ss:$28 sps:$4 sm:$0xff]  }
 0x40f   :  { %5781 = vmatprep.mubr.bf16.mxu0 %v8658_v54  ;;  %5945 = vmatprep.mubr.bf16.mxu1 %v8658_v54  ;;  %v7683_v48 = vld [vmem:[#allocation16 + $0x600] ss:$28 sps:$4 sm:$0xff]   ;;  %v7688_v52 = vld [vmem:[#allocation16 + $0x638] ss:$28 sps:$4 sm:$0xff]   ;;  %v7685_v53 = vld [vmem:[#allocation16 + $0x2b0] ss:$28 sps:$4 sm:$0xff]  }
 0x410   :  { %5782 = vmatmul.mubr.bf16.vlgmr.msra.gmra.mrb[12].mxu0 %v8662_v55  ;;  %5946 = vmatmul.mubr.bf16.vlgmr.msra.gmra.mrb[16].mxu1 %v8662_v55  ;;  %v7684_v51 = vld [vmem:[#allocation16 + $0x440] ss:$28 sps:$4 sm:$0xff]  }
 0x411   :  { %5955 = vmatpush1.bf16.msra.mxu0 %v7625_v47  ;;  %7059 = vmatpush3.bf16.msra.mxu1 %v7629_v13  ;;  %v7689_v47 = vld [vmem:[#allocation16 + $0x478] ss:$28 sps:$4 sm:$0xff]   ;;  %v7692_v13 = vld [vmem:[#allocation16 + $0x2ec] ss:$28 sps:$4 sm:$0xff]  }
 0x412   :  { %5986 = vmatprep.mubr.bf16.mxu0 %v8516_v30  ;;  %6150 = vmatprep.mubr.bf16.mxu1 %v8516_v30  ;;  %v7648_v30 = vld [vmem:[#allocation16 + $0x2b8] ss:$28 sps:$4 sm:$0xff]  }
 0x413   :  { %5956 = vmatprep.subr.bf16.mxu0 %v7632_v50  ;;  %7060 = vmatprep.subr.bf16.mxu1 %v7633_v56  ;;  %v7693_v50 = vld [vmem:[#allocation16 + $0x670] ss:$28 sps:$4 sm:$0xff]   ;;  %v7690_v56 = vld [vmem:[#allocation16 + $0x2e8] ss:$28 sps:$4 sm:$0xff]  }
 0x415   :  { %5957 = vmatpush1.bf16.msra.mxu0 %v7630_v6  ;;  %7061 = vmatpush3.bf16.msra.mxu1 %v7634_v58  ;;  %v7694_v6 = vld [vmem:[#allocation16 + $0x4b0] ss:$28 sps:$4 sm:$0xff]   ;;  %v7697_v58 = vld [vmem:[#allocation16 + $0x324] ss:$28 sps:$4 sm:$0xff]  }
 0x416   :  { %5958 = vmatprep.subr.bf16.mxu0 %v7637_v59  ;;  %7062 = vmatprep.subr.bf16.mxu1 %v7638_v60  ;;  %v7698_v59 = vld [vmem:[#allocation16 + $0x6a8] ss:$28 sps:$4 sm:$0xff]   ;;  %v7695_v60 = vld [vmem:[#allocation16 + $0x320] ss:$28 sps:$4 sm:$0xff]  }
 0x419   :  { %5959 = vmatpush1.bf16.msra.mxu0 %v7635_v61  ;;  %7063 = vmatpush3.bf16.msra.mxu1 %v7639_v62  ;;  %v7699_v61 = vld [vmem:[#allocation16 + $0x4e8] ss:$28 sps:$4 sm:$0xff]   ;;  %v7702_v62 = vld [vmem:[#allocation16 + $0x35c] ss:$28 sps:$4 sm:$0xff]  }
 0x41a   :  { %5960 = vmatprep.subr.bf16.mxu0 %v7642_v63  ;;  %7064 = vmatprep.subr.bf16.mxu1 %v7643_v41  ;;  %v7703_v63 = vld [vmem:[#allocation16 + $0x6e0] ss:$28 sps:$4 sm:$0xff]   ;;  %v7700_v41 = vld [vmem:[#allocation16 + $0x358] ss:$28 sps:$4 sm:$0xff]  }
 0x41d   :  { %5961 = vmatpush1.bf16.msra.mxu0 %v7640_v0  ;;  %7065 = vmatpush3.bf16.msra.mxu1 %v7644_v2  ;;  %v7704_v0 = vld [vmem:[#allocation16 + $0x520] ss:$28 sps:$4 sm:$0xff]   ;;  %v7707_v2 = vld [vmem:[#allocation16 + $0x394] ss:$28 sps:$4 sm:$0xff]  }
 0x41e   :  { %5962 = vmatprep.subr.bf16.mxu0 %v7647_v57  ;;  %7066 = vmatprep.subr.bf16.mxu1 %v7648_v30  ;;  %v7708_v57 = vld [vmem:[#allocation16 + $0x8d8] ss:$28 sps:$4 sm:$0xff]   ;;  %v7705_v30 = vld [vmem:[#allocation16 + $0x390] ss:$28 sps:$4 sm:$0xff]  }
 0x421   :  { %5963 = vmatpush1.bf16.msra.mxu0 %v7645_v45  ;;  %7067 = vmatpush3.bf16.msra.mxu1 %v7649_v3  ;;  %v7709_v45 = vld [vmem:[#allocation16 + $0x718] ss:$28 sps:$4 sm:$0xff]   ;;  %v7712_v3 = vld [vmem:[#allocation16 + $0x3cc] ss:$28 sps:$4 sm:$0xff]  }
 0x422   :  { %5964 = vmatprep.subr.bf16.mxu0 %v7652_v10  ;;  %7068 = vmatprep.subr.bf16.mxu1 %v7653_v12  ;;  %v7713_v10 = vld [vmem:[#allocation16 + $0x910] ss:$28 sps:$4 sm:$0xff]   ;;  %v7710_v12 = vld [vmem:[#allocation16 + $0x3c8] ss:$28 sps:$4 sm:$0xff]  }
 0x425   :  { %5965 = vmatpush1.bf16.msra.mxu0 %v7650_v4  ;;  %7069 = vmatpush3.bf16.msra.mxu1 %v7654_v5  ;;  %v7714_v4 = vld [vmem:[#allocation16 + $0x750] ss:$28 sps:$4 sm:$0xff]   ;;  %v7717_v5 = vld [vmem:[#allocation16 + $0x404] ss:$28 sps:$4 sm:$0xff]  }
 0x426   :  { %5966 = vmatprep.subr.bf16.mxu0 %v7657_v8  ;;  %7070 = vmatprep.subr.bf16.mxu1 %v7658_v9  ;;  %v7718_v8 = vld [vmem:[#allocation16 + $0x948] ss:$28 sps:$4 sm:$0xff]   ;;  %v7715_v9 = vld [vmem:[#allocation16 + $0x400] ss:$28 sps:$4 sm:$0xff]  }
 0x429   :  { %5967 = vmatpush1.bf16.msra.mxu0 %v7655_v15  ;;  %7071 = vmatpush3.bf16.msra.mxu1 %v7659_v27  ;;  %v7719_v15 = vld [vmem:[#allocation16 + $0x788] ss:$28 sps:$4 sm:$0xff]   ;;  %v7723_v27 = vld [vmem:[#allocation16 + $0x980] ss:$28 sps:$4 sm:$0xff]  }
 0x42a   :  { %5968 = vmatprep.subr.bf16.mxu0 %v7662_v29  ;;  %7072 = vmatprep.subr.bf16.mxu1 %v7663_v31  ;;  %v7720_v29 = vld [vmem:[#allocation16 + $0x438] ss:$28 sps:$4 sm:$0xff]  }
 0x42b   :  { %v7727_v31 = vld [vmem:[#allocation16 + $0x474] ss:$28 sps:$4 sm:$0xff]  }
 0x42d   :  { %5969 = vmatpush1.bf16.msra.mxu0 %v7660_v34  ;;  %7073 = vmatpush3.bf16.msra.mxu1 %v7664_v14  ;;  %v7728_v34 = vld [vmem:[#allocation16 + $0x9b8] ss:$28 sps:$4 sm:$0xff]   ;;  %v7725_v14 = vld [vmem:[#allocation16 + $0x470] ss:$28 sps:$4 sm:$0xff]  }
 0x42e   :  { %5970 = vmatprep.subr.bf16.mxu0 %v7667_v11  ;;  %7080 = vmatprep.subr.bf16.mxu1 %v7668_v36  ;;  %v7729_v11 = vld [vmem:[#allocation16 + $0x7f8] ss:$28 sps:$4 sm:$0xff]   ;;  %v7732_v36 = vld [vmem:[#allocation16 + $0x4ac] ss:$28 sps:$4 sm:$0xff]  }
 0x430   :  { %6151 = vmatmul.mubr.bf16.vlgmr.msra.gmra.mrb[20].mxu1 %v8518_v35 }
 0x431   :  { %5971 = vmatpush1.bf16.msra.mxu0 %v7665_v40  ;;  %7081 = vmatpush3.bf16.msra.mxu1 %v7669_v1  ;;  %v7733_v40 = vld [vmem:[#allocation16 + $0x9f0] ss:$28 sps:$4 sm:$0xff]   ;;  %v7730_v1 = vld [vmem:[#allocation16 + $0x4a8] ss:$28 sps:$4 sm:$0xff]  }
 0x432   :  { %6190 = vmatprep.mubr.bf16.mxu1 %v8593_v23  ;;  %5972 = vmatprep.subr.bf16.mxu0 %v7672_v42  ;;  %v7734_v42 = vld [vmem:[#allocation16 + $0x830] ss:$28 sps:$4 sm:$0xff]  }
 0x433   :  { %7082 = vmatprep.subr.bf16.mxu1 %v7673_v18  ;;  %v7737_v18 = vld [vmem:[#allocation16 + $0x4e4] ss:$28 sps:$4 sm:$0xff]  }
 0x435   :  { %5973 = vmatpush1.bf16.msra.mxu0 %v7670_v28  ;;  %7083 = vmatpush3.bf16.msra.mxu1 %v7674_v43  ;;  %v7738_v28 = vld [vmem:[#allocation16 + $0xa28] ss:$28 sps:$4 sm:$0xff]   ;;  %v7735_v43 = vld [vmem:[#allocation16 + $0x4e0] ss:$28 sps:$4 sm:$0xff]  }
 0x436   :  { %5974 = vmatprep.subr.bf16.mxu0 %v7677_v32  ;;  %7084 = vmatprep.subr.bf16.mxu1 %v7678_v44  ;;  %v7739_v32 = vld [vmem:[#allocation16 + $0x868] ss:$28 sps:$4 sm:$0xff]   ;;  %v7742_v44 = vld [vmem:[#allocation16 + $0x51c] ss:$28 sps:$4 sm:$0xff]  }
 0x439   :  { %5975 = vmatpush1.bf16.msra.mxu0 %v7675_v19  ;;  %7085 = vmatpush3.bf16.msra.mxu1 %v7679_v46  ;;  %v7743_v19 = vld [vmem:[#allocation16 + $0xa60] ss:$28 sps:$4 sm:$0xff]   ;;  %v7740_v46 = vld [vmem:[#allocation16 + $0x518] ss:$28 sps:$4 sm:$0xff]  }
 0x43a   :  { %5976 = vmatprep.subr.bf16.mxu0 %v7682_v26  ;;  %7086 = vmatprep.subr.bf16.mxu1 %v7683_v48  ;;  %v7744_v26 = vld [vmem:[#allocation16 + $0x8a0] ss:$28 sps:$4 sm:$0xff]   ;;  %v7747_v48 = vld [vmem:[#allocation16 + $0x554] ss:$28 sps:$4 sm:$0xff]  }
 0x43d   :  { %5977 = vmatpush1.bf16.msra.mxu0 %v7680_v49  ;;  %7087 = vmatpush3.bf16.msra.mxu1 %v7684_v51  ;;  %v7748_v49 = vld [vmem:[#allocation16 + $0xc58] ss:$28 sps:$4 sm:$0xff]   ;;  %v7745_v51 = vld [vmem:[#allocation16 + $0x550] ss:$28 sps:$4 sm:$0xff]  }
 0x43e   :  { %5978 = vmatprep.subr.bf16.mxu0 %v7687_v38  ;;  %7088 = vmatprep.subr.bf16.mxu1 %v7688_v52  ;;  %v7749_v38 = vld [vmem:[#allocation16 + $0xa98] ss:$28 sps:$4 sm:$0xff]   ;;  %v7752_v52 = vld [vmem:[#allocation16 + $0x58c] ss:$28 sps:$4 sm:$0xff]  }
 0x441   :  { %5979 = vmatpush1.bf16.msra.mxu0 %v7685_v53  ;;  %7089 = vmatpush3.bf16.msra.mxu1 %v7689_v47  ;;  %v7753_v53 = vld [vmem:[#allocation16 + $0xc90] ss:$28 sps:$4 sm:$0xff]   ;;  %v7750_v47 = vld [vmem:[#allocation16 + $0x588] ss:$28 sps:$4 sm:$0xff]  }
 0x442   :  { %5980 = vmatprep.subr.bf16.mxu0 %v7692_v13  ;;  %7090 = vmatprep.subr.bf16.mxu1 %v7693_v50  ;;  %v7754_v13 = vld [vmem:[#allocation16 + $0xad0] ss:$28 sps:$4 sm:$0xff]   ;;  %v7757_v50 = vld [vmem:[#allocation16 + $0x5c4] ss:$28 sps:$4 sm:$0xff]  }
 0x445   :  { %5981 = vmatpush1.bf16.msra.mxu0 %v7690_v56  ;;  %7091 = vmatpush3.bf16.msra.mxu1 %v7694_v6  ;;  %v7758_v56 = vld [vmem:[#allocation16 + $0xcc8] ss:$28 sps:$4 sm:$0xff]   ;;  %v7755_v6 = vld [vmem:[#allocation16 + $0x5c0] ss:$28 sps:$4 sm:$0xff]  }
 0x446   :  { %5982 = vmatprep.subr.bf16.mxu0 %v7697_v58  ;;  %7092 = vmatprep.subr.bf16.mxu1 %v7698_v59  ;;  %v7759_v58 = vld [vmem:[#allocation16 + $0xb08] ss:$28 sps:$4 sm:$0xff]   ;;  %v7762_v59 = vld [vmem:[#allocation16 + $0x5fc] ss:$28 sps:$4 sm:$0xff]  }
 0x449   :  { %5983 = vmatpush1.bf16.msra.mxu0 %v7695_v60  ;;  %7093 = vmatpush3.bf16.msra.mxu1 %v7699_v61  ;;  %v7763_v60 = vld [vmem:[#allocation16 + $0xd00] ss:$28 sps:$4 sm:$0xff]   ;;  %v7760_v61 = vld [vmem:[#allocation16 + $0x5f8] ss:$28 sps:$4 sm:$0xff]  }
 0x44a   :  { %5984 = vmatprep.subr.bf16.mxu0 %v7702_v62  ;;  %7094 = vmatprep.subr.bf16.mxu1 %v7703_v63  ;;  %v7764_v62 = vld [vmem:[#allocation16 + $0xb40] ss:$28 sps:$4 sm:$0xff]   ;;  %v7767_v63 = vld [vmem:[#allocation16 + $0x634] ss:$28 sps:$4 sm:$0xff]  }
 0x44d   :  { %5985 = vmatpush1.bf16.msra.mxu0 %v7700_v41  ;;  %7095 = vmatpush3.bf16.msra.mxu1 %v7704_v0  ;;  %v7768_v41 = vld [vmem:[#allocation16 + $0xd38] ss:$28 sps:$4 sm:$0xff]   ;;  %v7765_v0 = vld [vmem:[#allocation16 + $0x630] ss:$28 sps:$4 sm:$0xff]  }
 0x44e   :  { %5995 = vmatprep.subr.bf16.mxu0 %v7707_v2  ;;  %7102 = vmatprep.subr.bf16.mxu1 %v7708_v57  ;;  %v7769_v2 = vld [vmem:[#allocation16 + $0xb78] ss:$28 sps:$4 sm:$0xff]   ;;  %v7772_v57 = vld [vmem:[#allocation16 + $0x66c] ss:$28 sps:$4 sm:$0xff]  }
 0x450   :  { %5987 = vmatmul.mubr.bf16.vlgmr.msra.gmra.mrb[16].mxu0 %v8518_v35  ;;  %6191 = vmatmul.mubr.bf16.vlgmr.msra.gmra.mrb[24].mxu1 %v8595_v33  ;;  %v7722_v35 = vld [vmem:[#allocation16 + $0x43c] ss:$28 sps:$4 sm:$0xff]  }
 0x451   :  { %5996 = vmatpush1.bf16.msra.mxu0 %v7705_v30  ;;  %6027 = vmatprep.mubr.bf16.mxu0 %v8593_v23  ;;  %v7724_v23 = vld [vmem:[#allocation16 + $0x7c0] ss:$28 sps:$4 sm:$0xff]   ;;  %v7773_v30 = vld [vmem:[#allocation16 + $0xd70] ss:$28 sps:$4 sm:$0xff]  }
 0x452   :  { %7103 = vmatpush3.bf16.msra.mxu1 %v7709_v45  ;;  %6230 = vmatprep.mubr.bf16.mxu1 %v8601_v16  ;;  %v7770_v45 = vld [vmem:[#allocation16 + $0x668] ss:$28 sps:$4 sm:$0xff]  }
 0x453   :  { %5997 = vmatprep.subr.bf16.mxu0 %v7712_v3  ;;  %7104 = vmatprep.subr.bf16.mxu1 %v7713_v10  ;;  %v7774_v3 = vld [vmem:[#allocation16 + $0xbb0] ss:$28 sps:$4 sm:$0xff]   ;;  %v7777_v10 = vld [vmem:[#allocation16 + $0x6a4] ss:$28 sps:$4 sm:$0xff]  }
 0x455   :  { %5998 = vmatpush1.bf16.msra.mxu0 %v7710_v12  ;;  %v7778_v12 = vld [vmem:[#allocation16 + $0xda8] ss:$28 sps:$4 sm:$0xff]  }
 0x456   :  { %7105 = vmatpush3.bf16.msra.mxu1 %v7714_v4  ;;  %5999 = vmatprep.subr.bf16.mxu0 %v7717_v5  ;;  %v7775_v4 = vld [vmem:[#allocation16 + $0x6a0] ss:$28 sps:$4 sm:$0xff]   ;;  %v7779_v5 = vld [vmem:[#allocation16 + $0xbe8] ss:$28 sps:$4 sm:$0xff]  }
 0x457   :  { %7106 = vmatprep.subr.bf16.mxu1 %v7718_v8  ;;  %v7782_v8 = vld [vmem:[#allocation16 + $0x6dc] ss:$28 sps:$4 sm:$0xff]  }
 0x459   :  { %6000 = vmatpush1.bf16.msra.mxu0 %v7715_v9  ;;  %v7783_v9 = vld [vmem:[#allocation16 + $0xde0] ss:$28 sps:$4 sm:$0xff]  }
 0x45a   :  { %7107 = vmatpush3.bf16.msra.mxu1 %v7719_v15  ;;  %6001 = vmatprep.subr.bf16.mxu0 %v7722_v35  ;;  %v7780_v15 = vld [vmem:[#allocation16 + $0x6d8] ss:$28 sps:$4 sm:$0xff]   ;;  %v7784_v35 = vld [vmem:[#allocation16 + $0xc20] ss:$28 sps:$4 sm:$0xff]  }
 0x45b   :  { %7108 = vmatprep.subr.bf16.mxu1 %v7723_v27  ;;  %v7787_v27 = vld [vmem:[#allocation16 + $0x714] ss:$28 sps:$4 sm:$0xff]  }
 0x45d   :  { %6002 = vmatpush1.bf16.msra.mxu0 %v7720_v29  ;;  %v7785_v29 = vld [vmem:[#allocation16 + $0x710] ss:$28 sps:$4 sm:$0xff]  }
 0x45e   :  { %7109 = vmatpush3.bf16.msra.mxu1 %v7724_v23  ;;  %6003 = vmatprep.subr.bf16.mxu0 %v7727_v31  ;;  %v7790_v23 = vld [vmem:[#allocation16 + $0x74c] ss:$28 sps:$4 sm:$0xff]  }
 0x45f   :  { %7110 = vmatprep.subr.bf16.mxu1 %v7728_v34  ;;  %v7788_v31 = vld [vmem:[#allocation16 + $0x748] ss:$28 sps:$4 sm:$0xff]  }
 0x460   :  { %v7793_v34 = vld [vmem:[#allocation16 + $0x784] ss:$28 sps:$4 sm:$0xff]  }
 0x461   :  { %6004 = vmatpush1.bf16.msra.mxu0 %v7725_v14  ;;  %v7791_v14 = vld [vmem:[#allocation16 + $0x780] ss:$28 sps:$4 sm:$0xff]  }
 0x462   :  { %7111 = vmatpush3.bf16.msra.mxu1 %v7729_v11  ;;  %6005 = vmatprep.subr.bf16.mxu0 %v7732_v36  ;;  %v7796_v11 = vld [vmem:[#allocation16 + $0x7bc] ss:$28 sps:$4 sm:$0xff]  }
 0x463   :  { %7112 = vmatprep.subr.bf16.mxu1 %v7733_v40  ;;  %v7794_v36 = vld [vmem:[#allocation16 + $0x7b8] ss:$28 sps:$4 sm:$0xff]  }
 0x464   :  { %v7799_v40 = vld [vmem:[#allocation16 + $0x7f4] ss:$28 sps:$4 sm:$0xff]  }
 0x465   :  { %6006 = vmatpush1.bf16.msra.mxu0 %v7730_v1  ;;  %v7797_v1 = vld [vmem:[#allocation16 + $0x7f0] ss:$28 sps:$4 sm:$0xff]  }
 0x466   :  { %7113 = vmatpush3.bf16.msra.mxu1 %v7734_v42  ;;  %6007 = vmatprep.subr.bf16.mxu0 %v7737_v18  ;;  %v7800_v42 = vld [vmem:[#allocation16 + $0x828] ss:$28 sps:$4 sm:$0xff]  }
 0x467   :  { %7114 = vmatprep.subr.bf16.mxu1 %v7738_v28  ;;  %v7805_v18 = vld [vmem:[#allocation16 + $0x864] ss:$28 sps:$4 sm:$0xff]   ;;  %v7808_v28 = vld [vmem:[#allocation16 + $0x89c] ss:$28 sps:$4 sm:$0xff]  }
 0x469   :  { %6008 = vmatpush1.bf16.msra.mxu0 %v7735_v43  ;;  %v7806_v43 = vld [vmem:[#allocation16 + $0x898] ss:$28 sps:$4 sm:$0xff]  }
 0x46a   :  { %7115 = vmatpush3.bf16.msra.mxu1 %v7739_v32  ;;  %6009 = vmatprep.subr.bf16.mxu0 %v7742_v44  ;;  %v7811_v32 = vld [vmem:[#allocation16 + $0x8d4] ss:$28 sps:$4 sm:$0xff]  }
 0x46b   :  { %7116 = vmatprep.subr.bf16.mxu1 %v7743_v19  ;;  %v7809_v44 = vld [vmem:[#allocation16 + $0x8d0] ss:$28 sps:$4 sm:$0xff]  }
 0x46c   :  { %v7814_v19 = vld [vmem:[#allocation16 + $0x90c] ss:$28 sps:$4 sm:$0xff]  }
 0x46d   :  { %6010 = vmatpush1.bf16.msra.mxu0 %v7740_v46  ;;  %v7812_v46 = vld [vmem:[#allocation16 + $0x908] ss:$28 sps:$4 sm:$0xff]  }
 0x46e   :  { %7117 = vmatpush3.bf16.msra.mxu1 %v7744_v26  ;;  %6011 = vmatprep.subr.bf16.mxu0 %v7747_v48  ;;  %v7817_v26 = vld [vmem:[#allocation16 + $0x944] ss:$28 sps:$4 sm:$0xff]  }
 0x46f   :  { %7124 = vmatprep.subr.bf16.mxu1 %v7748_v49  ;;  %v7815_v48 = vld [vmem:[#allocation16 + $0x940] ss:$28 sps:$4 sm:$0xff]  }
 0x470   :  { %v7820_v49 = vld [vmem:[#allocation16 + $0x97c] ss:$28 sps:$4 sm:$0xff]  }
 0x471   :  { %6231 = vmatmul.mubr.bf16.vlgmr.msra.gmra.mrb[28].mxu1 %v8629_v39  ;;  %6012 = vmatpush1.bf16.msra.mxu0 %v7745_v51  ;;  %v7818_v51 = vld [vmem:[#allocation16 + $0x978] ss:$28 sps:$4 sm:$0xff]  }
 0x472   :  { %7125 = vmatpush3.bf16.msra.mxu1 %v7749_v38  ;;  %6270 = vmatprep.mubr.bf16.mxu1 %v8658_v54  ;;  %v7823_v38 = vld [vmem:[#allocation16 + $0x9b4] ss:$28 sps:$4 sm:$0xff]  }
 0x473   :  { %6013 = vmatprep.subr.bf16.mxu0 %v7752_v52  ;;  %7126 = vmatprep.subr.bf16.mxu1 %v7753_v53  ;;  %v7821_v52 = vld [vmem:[#allocation16 + $0x9b0] ss:$28 sps:$4 sm:$0xff]  }
 0x474   :  { %v7826_v53 = vld [vmem:[#allocation16 + $0x9ec] ss:$28 sps:$4 sm:$0xff]  }
 0x475   :  { %6014 = vmatpush1.bf16.msra.mxu0 %v7750_v47  ;;  %v7824_v47 = vld [vmem:[#allocation16 + $0x9e8] ss:$28 sps:$4 sm:$0xff]  }
 0x476   :  { %7127 = vmatpush3.bf16.msra.mxu1 %v7754_v13  ;;  %6015 = vmatprep.subr.bf16.mxu0 %v7757_v50  ;;  %v7829_v13 = vld [vmem:[#allocation16 + $0xa24] ss:$28 sps:$4 sm:$0xff]  }
 0x477   :  { %7128 = vmatprep.subr.bf16.mxu1 %v7758_v56  ;;  %v7827_v50 = vld [vmem:[#allocation16 + $0xa20] ss:$28 sps:$4 sm:$0xff]  }
 0x478   :  { %v7832_v56 = vld [vmem:[#allocation16 + $0xa5c] ss:$28 sps:$4 sm:$0xff]  }
 0x479   :  { %6016 = vmatpush1.bf16.msra.mxu0 %v7755_v6  ;;  %v7830_v6 = vld [vmem:[#allocation16 + $0xa58] ss:$28 sps:$4 sm:$0xff]  }
 0x47a   :  { %7129 = vmatpush3.bf16.msra.mxu1 %v7759_v58  ;;  %6017 = vmatprep.subr.bf16.mxu0 %v7762_v59  ;;  %v7835_v58 = vld [vmem:[#allocation16 + $0xa94] ss:$28 sps:$4 sm:$0xff]  }
 0x47b   :  { %7130 = vmatprep.subr.bf16.mxu1 %v7763_v60  ;;  %v7833_v59 = vld [vmem:[#allocation16 + $0xa90] ss:$28 sps:$4 sm:$0xff]  }
 0x47c   :  { %v7838_v60 = vld [vmem:[#allocation16 + $0xacc] ss:$28 sps:$4 sm:$0xff]  }
 0x47d   :  { %6018 = vmatpush1.bf16.msra.mxu0 %v7760_v61  ;;  %v7836_v61 = vld [vmem:[#allocation16 + $0xac8] ss:$28 sps:$4 sm:$0xff]  }
 0x47e   :  { %7131 = vmatpush3.bf16.msra.mxu1 %v7764_v62  ;;  %6019 = vmatprep.subr.bf16.mxu0 %v7767_v63  ;;  %v7841_v62 = vld [vmem:[#allocation16 + $0xb04] ss:$28 sps:$4 sm:$0xff]  }
 0x47f   :  { %7132 = vmatprep.subr.bf16.mxu1 %v7768_v41  ;;  %v7839_v63 = vld [vmem:[#allocation16 + $0xb00] ss:$28 sps:$4 sm:$0xff]  }
 0x480   :  { %v7844_v41 = vld [vmem:[#allocation16 + $0xb3c] ss:$28 sps:$4 sm:$0xff]  }
 0x481   :  { %6020 = vmatpush1.bf16.msra.mxu0 %v7765_v0  ;;  %v7842_v0 = vld [vmem:[#allocation16 + $0xb38] ss:$28 sps:$4 sm:$0xff]  }
 0x482   :  { %7133 = vmatpush3.bf16.msra.mxu1 %v7769_v2  ;;  %6021 = vmatprep.subr.bf16.mxu0 %v7772_v57  ;;  %v7847_v2 = vld [vmem:[#allocation16 + $0xb74] ss:$28 sps:$4 sm:$0xff]  }
 0x483   :  { %7134 = vmatprep.subr.bf16.mxu1 %v7773_v30  ;;  %v7845_v57 = vld [vmem:[#allocation16 + $0xb70] ss:$28 sps:$4 sm:$0xff]   ;;  %v8681_v30 = vld [vmem:[#allocation18] sm:$0xff] }
 0x485   :  { %6022 = vmatpush1.bf16.msra.mxu0 %v7770_v45  ;;  %v8204_v45 = vmov 1983009808  }
 0x486   :  { %7135 = vmatpush3.bf16.msra.mxu1 %v7774_v3  ;;  %6023 = vmatprep.subr.bf16.mxu0 %v7777_v10  ;;  %v7850_v3 = vld [vmem:[#allocation16 + $0xbac] ss:$28 sps:$4 sm:$0xff]   ;;  %v3298_v10 = vrot.slane %v8681_v30, %v8419_v22 }
 0x487   :  { %7136 = vmatprep.subr.bf16.mxu1 %v7778_v12  ;;  %v7848_v12 = vld [vmem:[#allocation16 + $0xba8] ss:$28 sps:$4 sm:$0xff]  }
 0x489   :  { %6024 = vmatpush1.bf16.msra.mxu0 %v7775_v4  ;;  %v3294_v4 = vrot.slane %v8681_v30, %v8422_v24 }
 0x48a   :  { %7137 = vmatpush3.bf16.msra.mxu1 %v7779_v5  ;;  %6025 = vmatprep.subr.bf16.mxu0 %v7782_v8  ;;  %v3302_v8 = vrot.slane %v8681_v30, %v8425_v25  ;;  %v7856_v25 = vld [vmem:[#allocation16 + $0xc1c] ss:$28 sps:$4 sm:$0xff]  }
 0x48b   :  { %7138 = vmatprep.subr.bf16.mxu1 %v7783_v9  ;;  %v7853_v9 = vld [vmem:[#allocation16 + $0xbe4] ss:$28 sps:$4 sm:$0xff]  }
 0x48d   :  { %6026 = vmatpush1.bf16.msra.mxu0 %v7780_v15 }
 0x48e   :  { %7139 = vmatpush3.bf16.msra.mxu1 %v7784_v35  ;;  %6036 = vmatprep.subr.bf16.mxu0 %v7787_v27 }
 0x490   :  { %6028 = vmatmul.mubr.bf16.vlgmr.msra.gmra.mrb[16].mxu0 %v8595_v33  ;;  %v7802_v33 = vld [vmem:[#allocation16 + $0x82c] ss:$28 sps:$4 sm:$0xff]  }
 0x491   :  { %6271 = vmatmul.mubr.bf16.vlgmr.msra.gmra.mrb[32].mxu1 %v8662_v55  ;;  %6037 = vmatpush1.bf16.msra.mxu0 %v7785_v29 }
 0x492   :  { %6068 = vmatprep.mubr.bf16.mxu0 %v8601_v16  ;;  %6038 = vmatprep.subr.bf16.mxu0 %v7790_v23  ;;  %v7803_v16 = vld [vmem:[#allocation16 + $0x860] ss:$28 sps:$4 sm:$0xff]  }
 0x495   :  { %6039 = vmatpush1.bf16.msra.mxu0 %v7788_v31 }
 0x496   :  { %6040 = vmatprep.subr.bf16.mxu0 %v7793_v34 }
 0x499   :  { %6041 = vmatpush1.bf16.msra.mxu0 %v7791_v14 }
 0x49a   :  { %6042 = vmatprep.subr.bf16.mxu0 %v7796_v11  ;;  %v7851_v11 = vld [vmem:[#allocation16 + $0xbe0] ss:$28 sps:$4 sm:$0xff]  }
 0x49d   :  { %6043 = vmatpush1.bf16.msra.mxu0 %v7794_v36 }
 0x49e   :  { %6044 = vmatprep.subr.bf16.mxu0 %v7799_v40 }
 0x4a1   :  { %6045 = vmatpush1.bf16.msra.mxu0 %v7797_v1 }
 0x4a2   :  { %6046 = vmatprep.subr.bf16.mxu0 %v7802_v33 }
 0x4a5   :  { %6047 = vmatpush1.bf16.msra.mxu0 %v7800_v42 }
 0x4a6   :  { %6048 = vmatprep.subr.bf16.mxu0 %v7805_v18 }
 0x4a9   :  { %6049 = vmatpush1.bf16.msra.mxu0 %v7803_v16  ;;  %v7854_v16 = vld [vmem:[#allocation16 + $0xc18] ss:$28 sps:$4 sm:$0xff]  }
 0x4aa   :  { %6050 = vmatprep.subr.bf16.mxu0 %v7808_v28 }
 0x4ad   :  { %6051 = vmatpush1.bf16.msra.mxu0 %v7806_v43  ;;  %v7857_v43 = vld [vmem:[#allocation16 + $0xc50] ss:$28 sps:$4 sm:$0xff]  }
 0x4ae   :  { %6052 = vmatprep.subr.bf16.mxu0 %v7811_v32  ;;  %v7862_v32 = vld [vmem:[#allocation16 + $0xc8c] ss:$28 sps:$4 sm:$0xff]  }
 0x4b1   :  { %6053 = vmatpush1.bf16.msra.mxu0 %v7809_v44  ;;  %v7860_v44 = vld [vmem:[#allocation16 + $0xc88] ss:$28 sps:$4 sm:$0xff]  }
 0x4b2   :  { %6054 = vmatprep.subr.bf16.mxu0 %v7814_v19  ;;  %v7865_v19 = vld [vmem:[#allocation16 + $0xcc4] ss:$28 sps:$4 sm:$0xff]  }
 0x4b5   :  { %6055 = vmatpush1.bf16.msra.mxu0 %v7812_v46  ;;  %v7863_v46 = vld [vmem:[#allocation16 + $0xcc0] ss:$28 sps:$4 sm:$0xff]  }
 0x4b6   :  { %6056 = vmatprep.subr.bf16.mxu0 %v7817_v26  ;;  %v7868_v26 = vld [vmem:[#allocation16 + $0xcfc] ss:$28 sps:$4 sm:$0xff]  }
 0x4b9   :  { %6057 = vmatpush1.bf16.msra.mxu0 %v7815_v48  ;;  %v7866_v48 = vld [vmem:[#allocation16 + $0xcf8] ss:$28 sps:$4 sm:$0xff]  }
 0x4ba   :  { %6058 = vmatprep.subr.bf16.mxu0 %v7820_v49  ;;  %v7871_v49 = vld [vmem:[#allocation16 + $0xd34] ss:$28 sps:$4 sm:$0xff]  }
 0x4bd   :  { %6059 = vmatpush1.bf16.msra.mxu0 %v7818_v51  ;;  %v7869_v51 = vld [vmem:[#allocation16 + $0xd30] ss:$28 sps:$4 sm:$0xff]  }
 0x4be   :  { %6060 = vmatprep.subr.bf16.mxu0 %v7823_v38  ;;  %v7874_v38 = vld [vmem:[#allocation16 + $0xd6c] ss:$28 sps:$4 sm:$0xff]  }
 0x4c1   :  { %6061 = vmatpush1.bf16.msra.mxu0 %v7821_v52  ;;  %v7872_v52 = vld [vmem:[#allocation16 + $0xd68] ss:$28 sps:$4 sm:$0xff]  }
 0x4c2   :  { %6062 = vmatprep.subr.bf16.mxu0 %v7826_v53  ;;  %v7877_v53 = vld [vmem:[#allocation16 + $0xda4] ss:$28 sps:$4 sm:$0xff]  }
 0x4c5   :  { %6063 = vmatpush1.bf16.msra.mxu0 %v7824_v47 }
 0x4c6   :  { %6064 = vmatprep.subr.bf16.mxu0 %v7829_v13 }
 0x4c9   :  { %6065 = vmatpush1.bf16.msra.mxu0 %v7827_v50 }
 0x4ca   :  { %6066 = vmatprep.subr.bf16.mxu0 %v7832_v56 }
 0x4cd   :  { %6067 = vmatpush1.bf16.msra.mxu0 %v7830_v6  ;;  %v7875_v6 = vld [vmem:[#allocation16 + $0xda0] ss:$28 sps:$4 sm:$0xff]  }
 0x4ce   :  { %6077 = vmatprep.subr.bf16.mxu0 %v7835_v58 }
 0x4d0   :  { %6069 = vmatmul.mubr.bf16.vlgmr.msra.gmra.mrb[16].mxu0 %v8629_v39  ;;  %v6288_v39 = vunpack.c.l.s4 %v8204_v45 }
 0x4d1   :  { %6078 = vmatpush1.bf16.msra.mxu0 %v7833_v59  ;;  %6109 = vmatprep.mubr.bf16.mxu0 %v8658_v54  ;;  %v3290_v54 = vrot.slane %v8681_v30, %v8416_v21  ;;  %v7880_v59 = vld [vmem:[#allocation16 + $0xddc] ss:$28 sps:$4 sm:$0xff]  }
 0x4d2   :  { %6079 = vmatprep.subr.bf16.mxu0 %v7838_v60  ;;  %v6289_v5 = vunpack.c.0.s8 %v6288_v39  ;;  %v7878_v60 = vld [vmem:[#allocation16 + $0xdd8] ss:$28 sps:$4 sm:$0xff]  }
 0x4d4   :  { %v8692_v22 = vsub.s32 %v6289_v5, %v8413_v20  ;;  %v7859_v20 = vld [vmem:[#allocation16 + $0xc54] ss:$28 sps:$4 sm:$0xff]  }
 0x4d5   :  { %6080 = vmatpush1.bf16.msra.mxu0 %v7836_v61  ;;  %v3314_v61 = vrot.slane %v8681_v30, %v8614_v17  ;;  %v3306_v17 = vrot.slane %v8681_v30, %v8536_v37 }
 0x4d6   :  { %6081 = vmatprep.subr.bf16.mxu0 %v7841_v62 }
 0x4d9   :  { %6082 = vmatpush1.bf16.msra.mxu0 %v7839_v63 }
 0x4da   :  { %6083 = vmatprep.subr.bf16.mxu0 %v7844_v41 }
 0x4dd   :  { %6084 = vmatpush1.bf16.msra.mxu0 %v7842_v0 }
 0x4de   :  { %6085 = vmatprep.subr.bf16.mxu0 %v7847_v2 }
 0x4e1   :  { %6086 = vmatpush1.bf16.msra.mxu0 %v7845_v57 }
 0x4e2   :  { %6087 = vmatprep.subr.bf16.mxu0 %v7850_v3 }
 0x4e3   :  { %v5783_v15 = vpop.f32.mrb[12].mxu0  ;;  %v5947_v35 = vpop.f32.mrb[16].mxu1 }
 0x4e4   :  { %v7156_v27 = vadd.f32 %v5783_v15, %v3290_v54  ;;  %v7158_v29 = vadd.f32 %v5947_v35, %v3298_v10  ;;  %v5785_v23 = vpop.f32.mrb[13].mxu0  ;;  %v5949_v21 = vpop.f32.mrb[17].mxu1 }
 0x4e5   :  { %v7157_v31 = vadd.f32 %v5785_v23, %v3294_v4  ;;  %v7159_v34 = vadd.f32 %v5949_v21, %v3302_v8  ;;  %6088 = vmatpush1.bf16.msra.mxu0 %v7848_v12  ;;  %v5787_v14 = vpop.f32.mrb[14].mxu0  ;;  %v5951_v24 = vpop.f32.mrb[18].mxu1 }
 0x4e6   :  { %v5788_v36 = vpop.f32.mrb[15].mxu0  ;;  %v5952_v40 = vpop.f32.mrb[19].mxu1  ;;  %6089 = vmatprep.subr.bf16.mxu0 %v7853_v9 }
 0x4e7   :  { %v6285_v1 = vcombine.low %v7156_v27, %v7157_v31  ;;  %v6286_v33 = vcombine.low %v7158_v29, %v7159_v34  ;;  %v3310_v27 = vrot.slane %v8681_v30, %v8525_v7 }
 0x4e9   :  { %v6293_v42 = vrot.slane %v6285_v1, %v8692_v22  ;;  %v6300_v18 = vrot.slane %v6286_v33, %v8692_v22  ;;  %6090 = vmatpush1.bf16.msra.mxu0 %v7851_v11 }
 0x4ea   :  { %6091 = vmatprep.subr.bf16.mxu0 %v7856_v25 }
 0x4eb   :  { %v6301_v28 = vcombine.low %v6293_v42, %v6300_v18 }
 0x4ed   :  { %6320 = vst [vmem:[%s8722_s11] sm:$0xff] %v6301_v28  ;;  %6092 = vmatpush1.bf16.msra.mxu0 %v7854_v16 }
 0x4ee   :  { %6093 = vmatprep.subr.bf16.mxu0 %v7859_v20 }
 0x4f1   :  { %6094 = vmatpush1.bf16.msra.mxu0 %v7857_v43 }
 0x4f2   :  { %6095 = vmatprep.subr.bf16.mxu0 %v7862_v32 }
 0x4f5   :  { %6096 = vmatpush1.bf16.msra.mxu0 %v7860_v44 }
 0x4f6   :  { %6097 = vmatprep.subr.bf16.mxu0 %v7865_v19 }
 0x4f9   :  { %6098 = vmatpush1.bf16.msra.mxu0 %v7863_v46 }
 0x4fa   :  { %6099 = vmatprep.subr.bf16.mxu0 %v7868_v26 }
 0x4fd   :  { %6100 = vmatpush1.bf16.msra.mxu0 %v7866_v48 }
 0x4fe   :  { %6101 = vmatprep.subr.bf16.mxu0 %v7871_v49 }
 0x501   :  { %6102 = vmatpush1.bf16.msra.mxu0 %v7869_v51 }
 0x502   :  { %6103 = vmatprep.subr.bf16.mxu0 %v7874_v38 }
 0x503   :  { %v7074_v47 = vpop.f32.mrb[20].mxu1 }
 0x504   :  { %v7075_v13 = vpop.f32.mrb[21].mxu1 }
 0x505   :  { %v7076_v50 = vadd.f32 %v7075_v13, %v7074_v47  ;;  %6104 = vmatpush1.bf16.msra.mxu0 %v7872_v52  ;;  %v7077_v56 = vpop.f32.mrb[22].mxu1 }
 0x506   :  { %v7078_v58 = vpop.f32.mrb[23].mxu1  ;;  %6105 = vmatprep.subr.bf16.mxu0 %v7877_v53 }
 0x507   :  { %v6153_v41 = vadd.f32 %v7076_v50, %v3314_v61 }
 0x509   :  { %6106 = vmatpush1.bf16.msra.mxu0 %v7875_v6 }
 0x50a   :  { %6107 = vmatprep.subr.bf16.mxu0 %v7880_v59 }
 0x50d   :  { %6108 = vmatpush1.bf16.msra.mxu0 %v7878_v60 }
 0x510   :  { %6110 = vmatmul.mubr.bf16.vlgmr.msra.gmra.mrb[16].mxu0 %v8662_v55 }
 0x523   :  { %v7096_v62 = vpop.f32.mrb[24].mxu1 }
 0x524   :  { %v7097_v63 = vpop.f32.mrb[25].mxu1 }
 0x525   :  { %v7098_v0 = vadd.f32 %v7097_v63, %v7096_v62  ;;  %v7099_v2 = vpop.f32.mrb[26].mxu1 }
 0x526   :  { %v7100_v57 = vpop.f32.mrb[27].mxu1 }
 0x527   :  { %v6193_v45 = vadd.f32 %v7098_v0, %v6153_v41 }
 0x544   :  { %v7118_v39 = vpop.f32.mrb[28].mxu1 }
 0x545   :  { %v7119_v3 = vpop.f32.mrb[29].mxu1 }
 0x546   :  { %v7120_v54 = vadd.f32 %v7119_v3, %v7118_v39  ;;  %v7121_v10 = vpop.f32.mrb[30].mxu1 }
 0x547   :  { %v7122_v12 = vpop.f32.mrb[31].mxu1 }
 0x548   :  { %v6233_v4 = vadd.f32 %v7120_v54, %v6193_v45 }
 0x564   :  { %v7140_v5 = vpop.f32.mrb[32].mxu1 }
 0x565   :  { %v7141_v8 = vpop.f32.mrb[33].mxu1 }
 0x566   :  { %v7142_v9 = vadd.f32 %v7141_v8, %v7140_v5  ;;  %v7143_v55 = vpop.f32.mrb[34].mxu1 }
 0x567   :  { %v7144_v15 = vpop.f32.mrb[35].mxu1 }
 0x568   :  { %v6273_v35 = vadd.f32 %v7142_v9, %v6233_v4 }
 0x56a   :  { %v6316_v11 = vrot.slane %v6273_v35, %v8692_v22 }
 0x5e3   :  { %v6111_v29 = vpop.f32.mrb[16].mxu0 }
 0x5e4   :  { %v7160_v23 = vadd.f32 %v6111_v29, %v3306_v17  ;;  %v6113_v21 = vpop.f32.mrb[17].mxu0 }
 0x5e5   :  { %v7161_v31 = vadd.f32 %v6113_v21, %v3310_v27  ;;  %v6115_v34 = vpop.f32.mrb[18].mxu0 }
 0x5e6   :  { %v6116_v14 = vpop.f32.mrb[19].mxu0 }
 0x5e7   :  { %v6302_v24 = vcombine.low %v7160_v23, %v7161_v31 }
 0x5e9   :  { %v6309_v36 = vrot.slane %v6302_v24, %v8692_v22 }
 0x5eb   :  { %v6317_v40 = vcombine.low %v6309_v36, %v6316_v11 }
 0x5ed   :  { %6321 = vst [vmem:[%s8722_s11 + $0x8] sm:$0x3f] %v6317_v40 }
 0x5ee   :  { %6326 = vsyncpa [#allocation3], 1 }
 0x5ef   :  { %6327 = vsyncpa [#allocation5], 1 }
 0x5f0   :  { %6328 = vsyncpa [#allocation8], 1 }
 0x5f1   :  { %6329 = vsyncpa [#allocation11], 1 }
 0x5f2   :  { %6330 = vsyncpa [#allocation14], 1 }
 0x5f3   :  { %6331 = vsyncpa [#allocation17], 1 }

</bundles_post_ra>
